<compile_context>
chip_gen: v7x
topology: tpu7x:2x2x1
jax: 0.10.0
libtpu: 0.0.40
codegen_flags: <defaults>
</compile_context>

<pallas_src>
import jax
import jax.numpy as jnp
from jax.experimental import pallas as pl
from jax.experimental.pallas import tpu as pltpu

IN_FEATURES = 6400
HIDDEN = 200
HIDDEN_PAD = 256          # pad 200 -> 256 so the hidden activation is lane-dense
NUM_ACTIONS = 2
BM_MAX = 128              # batch tile cap (keeps VMEM bounded, preserves megacore axis)


def policy_kernel(x_ref, w1_ref, b1_ref, w2_ref, b2_ref, out_ref):
    # Grid = (batch tiles,).  W1 is a resident whole-array block.
    # x_ref:  (bm, 6400) f32        w1_ref: (6400, HIDDEN_PAD) bf16
    # b1_ref: (1, HIDDEN_PAD) f32   w2_ref: (HIDDEN_PAD, A) f32
    # b2_ref: (1, A) f32            out_ref: (bm, A) f32
    x_bf16 = x_ref[...].astype(jnp.bfloat16)        # VPU cast, hidden under the DMA
    # bf16 x bf16 -> f32 accumulation on the MXU, whole K=6400 in one dot.
    h = jnp.dot(x_bf16, w1_ref[...], preferred_element_type=jnp.float32)
    h = jnp.maximum(h + b1_ref[...], 0.0)
    scores = (
        jnp.dot(h, w2_ref[...], preferred_element_type=jnp.float32) + b2_ref[...]
    )
    scores = scores - jnp.max(scores, axis=-1, keepdims=True)
    e = jnp.exp(scores)
    out_ref[...] = e / jnp.sum(e, axis=-1, keepdims=True)


def prepare_params(w1, b1, w2, b2):
    """One-time conversion from PyTorch (out, in) layout to kernel layout.

    Returns (w1_p bf16 (6400, 256), b1_p f32 (1, 256),
             w2_p f32 (256, A),     b2_p f32 (1, A)).
    Zero padding of the extra hidden units is exact: relu(0 + 0) = 0 and the
    padded W2 rows are zero, so the scores are unchanged.
    """
    num_actions = w2.shape[0]
    w1_t = jnp.asarray(w1, jnp.float32).T                      # (6400, 200)
    w1_p = (
        jnp.zeros((IN_FEATURES, HIDDEN_PAD), jnp.float32)
        .at[:, :HIDDEN].set(w1_t)
        .astype(jnp.bfloat16)                                  # halve W1 HBM traffic
    )
    b1_p = (
        jnp.zeros((1, HIDDEN_PAD), jnp.float32)
        .at[0, :HIDDEN].set(jnp.asarray(b1, jnp.float32))
    )
    w2_t = jnp.asarray(w2, jnp.float32).T                      # (200, A)
    w2_p = (
        jnp.zeros((HIDDEN_PAD, num_actions), jnp.float32)
        .at[:HIDDEN, :].set(w2_t)
    )
    b2_p = jnp.asarray(b2, jnp.float32).reshape(1, num_actions)
    return w1_p, b1_p, w2_p, b2_p


@jax.jit
def policy_forward(x, w1_p, b1_p, w2_p, b2_p):
    """x: (B, 6400) f32; params from prepare_params(). Returns (B, A) f32 probs."""
    B = x.shape[0]
    num_actions = w2_p.shape[1]

    if B <= BM_MAX:
        bm, B_pad = B, B                      # single batch tile, no padding
    else:
        bm = BM_MAX
        B_pad = ((B + bm - 1) // bm) * bm     # pad batch up to a multiple of 128
    n_b = B_pad // bm

    x_p = x if B_pad == B else jnp.pad(x, ((0, B_pad - B), (0, 0)))

    grid_spec = pltpu.PrefetchScalarGridSpec(
        num_scalar_prefetch=0,
        grid=(n_b,),
        in_specs=[
            pl.BlockSpec((bm, IN_FEATURES), lambda i: (i, 0)),             # x (f32)
            pl.BlockSpec((IN_FEATURES, HIDDEN_PAD), lambda i: (0, 0)),     # W1 resident
            pl.BlockSpec((1, HIDDEN_PAD), lambda i: (0, 0)),               # b1
            pl.BlockSpec((HIDDEN_PAD, num_actions), lambda i: (0, 0)),     # W2
            pl.BlockSpec((1, num_actions), lambda i: (0, 0)),              # b2
        ],
        out_specs=pl.BlockSpec((bm, num_actions), lambda i: (i, 0)),
    )

    out = pl.pallas_call(
        policy_kernel,
        out_shape=jax.ShapeDtypeStruct((B_pad, num_actions), jnp.float32),
        grid_spec=grid_spec,
        compiler_params=pltpu.CompilerParams(
            dimension_semantics=("parallel",),
            vmem_limit_bytes=32 << 20,   # ~13 MB actually used at bm=128
        ),
    )(x_p, w1_p, b1_p, w2_p, b2_p)

    return out[:B] if B_pad != B else out


def init_params(key, num_actions=NUM_ACTIONS):
    """nn.Linear default init: U(-1/sqrt(fan_in), +1/sqrt(fan_in)), PyTorch layout."""
    k1, k2, k3, k4 = jax.random.split(key, 4)
    bound1 = 1.0 / jnp.sqrt(IN_FEATURES)
    bound2 = 1.0 / jnp.sqrt(HIDDEN)
    w1 = jax.random.uniform(k1, (HIDDEN, IN_FEATURES), jnp.float32, -bound1, bound1)
    b1 = jax.random.uniform(k2, (HIDDEN,), jnp.float32, -bound1, bound1)
    w2 = jax.random.uniform(k3, (num_actions, HIDDEN), jnp.float32, -bound2, bound2)
    b2 = jax.random.uniform(k4, (num_actions,), jnp.float32, -bound2, bound2)
    return w1, b1, w2, b2


def reference_forward_f32(x, w1, b1, w2, b2):
    h = jnp.maximum(x @ w1.T + b1, 0.0)
    s = h @ w2.T + b2
    return jax.nn.softmax(s, axis=1)


def reference_forward_bf16(x, w1, b1, w2, b2):
    # Same dtype policy as the kernel: bf16 operands for the big matmul,
    # f32 accumulation and f32 elementwise epilogue.
    h = jnp.dot(
        x.astype(jnp.bfloat16), w1.T.astype(jnp.bfloat16),
        preferred_element_type=jnp.float32,
    ) + b1
    h = jnp.maximum(h, 0.0)
    s = h @ w2.T + b2
    return jax.nn.softmax(s, axis=1)


# TODO(synk): select_action's Categorical sampling / saved_log_probs bookkeeping is
# host-side RL plumbing, not part of the forward pass, and is not implemented here.

if __name__ == "__main__":
    key = jax.random.PRNGKey(0)
    kx, kp, kx2 = jax.random.split(key, 3)

    B = 4  # small batch; feature dims fixed by the module (6400 -> 200 -> 2)
    x = jax.random.uniform(kx, (B, IN_FEATURES), jnp.float32)  # pong frames in [0, 1]
    w1, b1, w2, b2 = init_params(kp)

    params = prepare_params(w1, b1, w2, b2)   # one-time layout/dtype conversion

    probs = jax.block_until_ready(policy_forward(x, *params))

    ref_bf16 = reference_forward_bf16(x, w1, b1, w2, b2)
    ref_f32 = reference_forward_f32(x, w1, b1, w2, b2)

    assert probs.shape == (B, NUM_ACTIONS)
    # Tight check against a reference with the same bf16-matmul dtype policy.
    assert jnp.allclose(probs, ref_bf16, atol=1e-4, rtol=1e-4)
    # Looser check against the pure-f32 PyTorch-equivalent reference.
    assert jnp.allclose(probs, ref_f32, atol=1e-2, rtol=1e-2)
    assert jnp.allclose(jnp.sum(probs, axis=1), 1.0, atol=1e-5)

    # Exercise the padded multi-tile batch path (B > 128, not a multiple of 128).
    B2 = 130
    x2 = jax.random.uniform(kx2, (B2, IN_FEATURES), jnp.float32)
    probs2 = jax.block_until_ready(policy_forward(x2, *params))
    ref2 = reference_forward_bf16(x2, w1, b1, w2, b2)
    assert probs2.shape == (B2, NUM_ACTIONS)
    assert jnp.allclose(probs2, ref2, atol=1e-4, rtol=1e-4)
    assert jnp.allclose(jnp.sum(probs2, axis=1), 1.0, atol=1e-5)

    print("KERNEL_OK")
</pallas_src>

<mosaic_0001>
module attributes {stable_mosaic.version = 11 : i64} {
  func.func @policy_kernel(%arg0: i32, %arg1: memref<4x6400xf32, #tpu.memory_space<vmem>>, %arg2: memref<6400x256xbf16, #tpu.memory_space<vmem>>, %arg3: memref<1x256xf32, #tpu.memory_space<vmem>>, %arg4: memref<256x2xf32, #tpu.memory_space<vmem>>, %arg5: memref<1x2xf32, #tpu.memory_space<vmem>>, %arg6: memref<4x2xf32, #tpu.memory_space<vmem>>) attributes {dimension_semantics = [#tpu.dimension_semantics<parallel>], iteration_bounds = array<i64: 1>, scalar_prefetch = 0 : i64, scratch_operands = 0 : i64, tpu.core_type = #tpu.core_type<tc>, window_params = [{transform_indices = @transform_0, window_bounds = array<i64: 4, 6400>}, {pipeline_mode = #tpu.pipeline_mode<synchronous>, transform_indices = @transform_1, window_bounds = array<i64: 6400, 256>}, {pipeline_mode = #tpu.pipeline_mode<synchronous>, transform_indices = @transform_2, window_bounds = array<i64: 1, 256>}, {pipeline_mode = #tpu.pipeline_mode<synchronous>, transform_indices = @transform_3, window_bounds = array<i64: 256, 2>}, {pipeline_mode = #tpu.pipeline_mode<synchronous>, transform_indices = @transform_4, window_bounds = array<i64: 1, 2>}, {transform_indices = @transform_5, window_bounds = array<i64: 4, 2>}]} {
    %c0 = arith.constant 0 : index
    %c0_0 = arith.constant 0 : index
    %0 = vector.load %arg1[%c0, %c0_0] : memref<4x6400xf32, #tpu.memory_space<vmem>>, vector<4x6400xf32>
    %1 = arith.truncf %0 : vector<4x6400xf32> to vector<4x6400xbf16>
    %c0_1 = arith.constant 0 : index
    %c0_2 = arith.constant 0 : index
    %2 = vector.load %arg2[%c0_1, %c0_2] : memref<6400x256xbf16, #tpu.memory_space<vmem>>, vector<6400x256xbf16>
    %cst = arith.constant dense<0.000000e+00> : vector<4x256xf32>
    %3 = tpu.matmul %1, %2, %cst {dimension_numbers = #tpu.dot_dimension_numbers<[1], [0], [0], [1], [0, 0, 1, 1], [], []>} : vector<4x6400xbf16>, vector<6400x256xbf16>, vector<4x256xf32> -> vector<4x256xf32>
    %c0_3 = arith.constant 0 : index
    %c0_4 = arith.constant 0 : index
    %4 = vector.load %arg3[%c0_3, %c0_4] : memref<1x256xf32, #tpu.memory_space<vmem>>, vector<1x256xf32>
    %5 = vector.broadcast %4 : vector<1x256xf32> to vector<4x256xf32>
    %6 = arith.addf %3, %5 : vector<4x256xf32>
    %cst_5 = arith.constant 0.000000e+00 : f32
    %7 = vector.broadcast %cst_5 : f32 to vector<4x256xf32>
    %8 = arith.maximumf %6, %7 : vector<4x256xf32>
    %c0_6 = arith.constant 0 : index
    %c0_7 = arith.constant 0 : index
    %9 = vector.load %arg4[%c0_6, %c0_7] : memref<256x2xf32, #tpu.memory_space<vmem>>, vector<256x2xf32>
    %cst_8 = arith.constant dense<0.000000e+00> : vector<4x2xf32>
    %10 = tpu.matmul %8, %9, %cst_8 {dimension_numbers = #tpu.dot_dimension_numbers<[1], [0], [0], [1], [0, 0, 1, 1], [], []>} : vector<4x256xf32>, vector<256x2xf32>, vector<4x2xf32> -> vector<4x2xf32>
    %c0_9 = arith.constant 0 : index
    %c0_10 = arith.constant 0 : index
    %11 = vector.load %arg5[%c0_9, %c0_10] : memref<1x2xf32, #tpu.memory_space<vmem>>, vector<1x2xf32>
    %12 = vector.broadcast %11 : vector<1x2xf32> to vector<4x2xf32>
    %13 = arith.addf %10, %12 : vector<4x2xf32>
    %cst_11 = arith.constant dense<0xFF800000> : vector<4xf32>
    %14 = vector.multi_reduction <maximumf>, %13, %cst_11 [1] : vector<4x2xf32> to vector<4xf32>
    %15 = vector.shape_cast %14 : vector<4xf32> to vector<4x1xf32>
    %16 = vector.broadcast %15 : vector<4x1xf32> to vector<4x2xf32>
    %17 = arith.subf %13, %16 : vector<4x2xf32>
    %18 = math.exp %17 : vector<4x2xf32>
    %cst_12 = arith.constant dense<0.000000e+00> : vector<4xf32>
    %19 = vector.multi_reduction <add>, %18, %cst_12 [1] : vector<4x2xf32> to vector<4xf32>
    %20 = vector.shape_cast %19 : vector<4xf32> to vector<4x1xf32>
    %21 = vector.broadcast %20 : vector<4x1xf32> to vector<4x2xf32>
    %22 = arith.divf %18, %21 : vector<4x2xf32>
    %c0_13 = arith.constant 0 : index
    %c0_14 = arith.constant 0 : index
    %23 = vector.load %arg6[%c0_13, %c0_14] : memref<4x2xf32, #tpu.memory_space<vmem>>, vector<4x2xf32>
    tpu.vector_store %arg6[%c0_13, %c0_14], %22 {strides = array<i32>} : memref<4x2xf32, #tpu.memory_space<vmem>>, vector<4x2xf32>,
    return
  }
  func.func @transform_0(%arg0: i32) -> (i32, i32) {
    %c0_i32 = arith.constant 0 : i32
    %c0_i32_0 = arith.constant 0 : i32
    return %arg0, %c0_i32 : i32, i32
  }
  func.func @transform_1(%arg0: i32) -> (i32, i32) {
    %c0_i32 = arith.constant 0 : i32
    %c0_i32_0 = arith.constant 0 : i32
    %c0_i32_1 = arith.constant 0 : i32
    return %c0_i32, %c0_i32_0 : i32, i32
  }
  func.func @transform_2(%arg0: i32) -> (i32, i32) {
    %c0_i32 = arith.constant 0 : i32
    %c0_i32_0 = arith.constant 0 : i32
    %c0_i32_1 = arith.constant 0 : i32
    return %c0_i32, %c0_i32_0 : i32, i32
  }
  func.func @transform_3(%arg0: i32) -> (i32, i32) {
    %c0_i32 = arith.constant 0 : i32
    %c0_i32_0 = arith.constant 0 : i32
    %c0_i32_1 = arith.constant 0 : i32
    return %c0_i32, %c0_i32_0 : i32, i32
  }
  func.func @transform_4(%arg0: i32) -> (i32, i32) {
    %c0_i32 = arith.constant 0 : i32
    %c0_i32_0 = arith.constant 0 : i32
    %c0_i32_1 = arith.constant 0 : i32
    return %c0_i32, %c0_i32_0 : i32, i32
  }
  func.func @transform_5(%arg0: i32) -> (i32, i32) {
    %c0_i32 = arith.constant 0 : i32
    %c0_i32_0 = arith.constant 0 : i32
    return %arg0, %c0_i32 : i32, i32
  }
}

</mosaic_0001>

<bundles_post_ra>
// kernel: policy_forward.1
= control target key start
LH: loop header
LB: loop body
LE: loop exit
PB: predicated region body
PF: predicated region fallthrough
CT: control target
= control target key end

     0   :  { %10 = vsyncpa [#allocation3], 0  ;;  %s8801_s0 = inlined_call_operand.hbm [shape: f32[4,6400], index: 0, kind: input, shape index: {}]   ;;  %s8802_s1 = inlined_call_operand.hbm [shape: bf16[6400,256], index: 1, kind: input, shape index: {}]   ;;  %s8803_s2 = inlined_call_operand.hbm [shape: f32[1,256], index: 2, kind: input, shape index: {}]   ;;  %s8804_s3 = inlined_call_operand.vmem [shape: f32[256,2], index: 3, kind: input, shape index: {}]   ;;  %s8805_s4 = inlined_call_operand.hbm [shape: f32[1,2], index: 4, kind: input, shape index: {}]   ;;  %s8806_s5 = inlined_call_operand.vmem [shape: f32[4,2], index: 5, kind: output, shape index: {}]  }
   0x1   :  { %11 = vsyncpa [#allocation5], 0 }
   0x2   :  { %12 = vsyncpa [#allocation8], 0  ;;  %s8480_s18 = smov [#allocation4]   ;;  %s8386_s22 = scalar_lea.hbm %s8802_s1, 102400 }
   0x3   :  { %s28_s19 = sshll.u32 %s8480_s18, 4  ;;  %p8387_p0 = scmp.ne.s32.totalorder %s8802_s1, %s8386_s22  ;;  %s29_s19 = int_to_ptr.vmem [resolvable:$true] %s28_s19 }
   0x4   :  { %p8390_p1 = scmp.lt.u32.totalorder %s8386_s22, %s8802_s1 }
   0x6   :  { %p8392_p2 = pnand %p8390_p1, %p8387_p0 }
   0x8   :  { %8395 = shalt.err (!%p8392_p2)
}
   0x9   :  { %s8396_s27 = scalar_lea.vmem %s29_s19, 102400  ;;  %p8401_p4 = scmp.lt.s32.totalorder %s29_s19, %s29_s19 }
   0xa   :  { %p8397_p3 = scmp.ne.s32.totalorder %s29_s19, %s8396_s27  ;;  %p8402_p5 = scmp.lt.s32.totalorder %s8396_s27, %s8396_s27 }
   0xc   :  { %p8403_p6 = por %p8402_p5, %p8401_p4 }
   0xe   :  { %p8404_p7 = pnand %p8403_p6, %p8397_p3 }
  0x10   :  { %8407 = shalt.err (!%p8404_p7)
}
  0x11   :  { %s8481_s28 = smov 128   ;;  %s8482_s29 = smov 8  }
  0x12   :  { %34 = dma.hbm_to_vmem [thread:$0]  %s8802_s1, 102400, %s29_s19, [#allocation5], %s8481_s28, %s8481_s28, %s8482_s29  }
  0x13   :  { %s8483_s7 = smov [#allocation2]   ;;  %s8484_s9 = smov [#allocation6]  }
  0x14   :  { %s19_s8 = sshll.u32 %s8483_s7, 4  ;;  %s41_s10 = sshll.u32 %s8484_s9, 4  ;;  %s20_s8 = int_to_ptr.vmem [resolvable:$true] %s19_s8  ;;  %s42_s10 = int_to_ptr.vmem [resolvable:$true] %s41_s10 }
  0x15   :  { %s8408_s13 = scalar_lea.hbm %s8801_s0, 3200 }
  0x16   :  { %p8409_p8 = scmp.ne.s32.totalorder %s8801_s0, %s8408_s13  ;;  %p8412_p9 = scmp.lt.u32.totalorder %s8408_s13, %s8801_s0 }
  0x18   :  { %p8414_p10 = pnand %p8412_p9, %p8409_p8 }
  0x1a   :  { %8417 = shalt.err (!%p8414_p10)
}
  0x1b   :  { %s8418_s1 = scalar_lea.vmem %s20_s8, 3200  ;;  %p8423_p12 = scmp.lt.s32.totalorder %s20_s8, %s20_s8 }
  0x1c   :  { %p8419_p11 = scmp.ne.s32.totalorder %s20_s8, %s8418_s1  ;;  %p8424_p13 = scmp.lt.s32.totalorder %s8418_s1, %s8418_s1 }
  0x1e   :  { %p8425_p0 = por %p8424_p13, %p8423_p12 }
  0x20   :  { %p8426_p1 = pnand %p8425_p0, %p8419_p11 }
  0x22   :  { %8429 = shalt.err (!%p8426_p1)
}
  0x23   :  { %22 = dma.hbm_to_vmem [thread:$0]  %s8801_s0, 3200, %s20_s8, [#allocation3]  }
  0x24   :  { %s8430_s22 = scalar_lea.hbm %s8803_s2, 32 }
  0x25   :  { %p8431_p2 = scmp.ne.s32.totalorder %s8803_s2, %s8430_s22  ;;  %p8434_p3 = scmp.lt.u32.totalorder %s8430_s22, %s8803_s2 }
  0x27   :  { %p8436_p4 = pnand %p8434_p3, %p8431_p2 }
  0x29   :  { %8439 = shalt.err (!%p8436_p4)
}
  0x2a   :  { %s8440_s27 = scalar_lea.vmem %s42_s10, 32  ;;  %p8445_p6 = scmp.lt.s32.totalorder %s42_s10, %s42_s10 }
  0x2b   :  { %p8441_p5 = scmp.ne.s32.totalorder %s42_s10, %s8440_s27  ;;  %p8446_p7 = scmp.lt.s32.totalorder %s8440_s27, %s8440_s27 }
  0x2d   :  { %p8447_p8 = por %p8446_p7, %p8445_p6 }
  0x2f   :  { %p8448_p9 = pnand %p8447_p8, %p8441_p5 }
  0x31   :  { %8451 = shalt.err (!%p8448_p9)
}
  0x32   :  { %44 = dma.hbm_to_vmem [thread:$0]  %s8803_s2, 32, %s42_s10, [#allocation5]  }
  0x33   :  { %s8485_s29 = smov [#allocation7]   ;;  %s8452_s8 = scalar_lea.hbm %s8805_s4, 16 }
  0x34   :  { %s53_s30 = sshll.u32 %s8485_s29, 4  ;;  %p8453_p10 = scmp.ne.s32.totalorder %s8805_s4, %s8452_s8  ;;  %s54_s30 = int_to_ptr.vmem [resolvable:$true] %s53_s30 }
  0x35   :  { %p8456_p11 = scmp.lt.u32.totalorder %s8452_s8, %s8805_s4 }
  0x37   :  { %p8458_p12 = pnand %p8456_p11, %p8453_p10 }
  0x39   :  { %8461 = shalt.err (!%p8458_p12)
}
  0x3a   :  { %s8462_s14 = scalar_lea.vmem %s54_s30, 16  ;;  %s8466_s2 = scalar_lea.vmem %s54_s30, 32 }
  0x3b   :  { %p8463_p13 = scmp.ne.s32.totalorder %s54_s30, %s8462_s14  ;;  %p8467_p0 = scmp.lt.s32.totalorder %s54_s30, %s54_s30 }
  0x3c   :  { %p8468_p1 = scmp.lt.s32.totalorder %s8466_s2, %s8462_s14 }
  0x3e   :  { %p8469_p2 = por %p8468_p1, %p8467_p0 }
  0x40   :  { %p8470_p3 = pnand %p8469_p2, %p8463_p13 }
  0x42   :  { %8473 = shalt.err (!%p8470_p3)
}
  0x43   :  { %56 = dma.hbm_to_vmem [thread:$0]  %s8805_s4, 16, %s54_s30, [#allocation8]  }
  0x44   :  { %8474 = dma.done.wait [#allocation3], 3200  }
  0x45   :  { %8475 = vsyncadd [#allocation3], 4294964096 }
  0x46   :  { %8476 = dma.done.wait [#allocation5], 102432  }
  0x47   :  { %8477 = vsyncadd [#allocation5], 4294864864 }
  0x48   :  { %8478 = dma.done.wait [#allocation8], 16  }
  0x49   :  { %8479 = vsyncadd [#allocation8], 4294967280  ;;  %v7157_v0 = vld [vmem:[#allocation4 + $0x4] ss:$8 sps:$4 sm:$0xff]   ;;  %v7161_v2 = vld [vmem:[#allocation4] ss:$8 sps:$4 sm:$0xff]  }
  0x4a   :  { %v7159_v1 = vld [vmem:[#allocation4 + $0xc04] ss:$8 sps:$4 sm:$0xff]   ;;  %5031 = vmatprep.subr.bf16.mxu1 %v7157_v0  ;;  %v7162_v3 = vld [vmem:[#allocation4 + $0xc00] ss:$8 sps:$4 sm:$0xff]   ;;  %v7163_v4 = vld [vmem:[#allocation4 + $0x14] ss:$8 sps:$4 sm:$0xff]  }
  0x4b   :  { %5523 = vmatprep.subr.bf16.mxu0 %v7159_v1  ;;  %5032 = vmatpush1.bf16.msra.mxu1 %v7161_v2  ;;  %v7165_v5 = vld [vmem:[#allocation4 + $0xc14] ss:$8 sps:$4 sm:$0xff]   ;;  %v7167_v6 = vld [vmem:[#allocation4 + $0x10] ss:$8 sps:$4 sm:$0xff]   ;;  %v7169_v8 = vld [vmem:[#allocation4 + $0x24] ss:$8 sps:$4 sm:$0xff]  }
  0x4c   :  { %5524 = vmatpush1.bf16.msra.mxu0 %v7162_v3  ;;  %5033 = vmatprep.subr.bf16.mxu1 %v7163_v4  ;;  %v7168_v7 = vld [vmem:[#allocation4 + $0xc10] ss:$8 sps:$4 sm:$0xff]   ;;  %v7171_v9 = vld [vmem:[#allocation4 + $0xc24] ss:$8 sps:$4 sm:$0xff]   ;;  %v7173_v10 = vld [vmem:[#allocation4 + $0x20] ss:$8 sps:$4 sm:$0xff]  }
  0x4d   :  { %5525 = vmatprep.subr.bf16.mxu0 %v7165_v5  ;;  %v7174_v11 = vld [vmem:[#allocation4 + $0xc20] ss:$8 sps:$4 sm:$0xff]   ;;  %v7175_v12 = vld [vmem:[#allocation4 + $0x34] ss:$8 sps:$4 sm:$0xff]   ;;  %v7179_v14 = vld [vmem:[#allocation4 + $0x30] ss:$8 sps:$4 sm:$0xff]  }
  0x4e   :  { %v7177_v13 = vld [vmem:[#allocation4 + $0xc34] ss:$8 sps:$4 sm:$0xff]   ;;  %v7180_v15 = vld [vmem:[#allocation4 + $0xc30] ss:$8 sps:$4 sm:$0xff]   ;;  %v7181_v16 = vld [vmem:[#allocation4 + $0x44] ss:$8 sps:$4 sm:$0xff]  }
  0x4f   :  { %5034 = vmatpush1.bf16.msra.mxu1 %v7167_v6  ;;  %v7183_v17 = vld [vmem:[#allocation4 + $0xc44] ss:$8 sps:$4 sm:$0xff]   ;;  %v7185_v18 = vld [vmem:[#allocation4 + $0x40] ss:$8 sps:$4 sm:$0xff]   ;;  %v7187_v20 = vld [vmem:[#allocation4 + $0x54] ss:$8 sps:$4 sm:$0xff]  }
  0x50   :  { %5526 = vmatpush1.bf16.msra.mxu0 %v7168_v7  ;;  %5035 = vmatprep.subr.bf16.mxu1 %v7169_v8  ;;  %v7186_v19 = vld [vmem:[#allocation4 + $0xc40] ss:$8 sps:$4 sm:$0xff]   ;;  %v7189_v21 = vld [vmem:[#allocation4 + $0xc54] ss:$8 sps:$4 sm:$0xff]   ;;  %v7191_v22 = vld [vmem:[#allocation4 + $0x50] ss:$8 sps:$4 sm:$0xff]  }
  0x51   :  { %5527 = vmatprep.subr.bf16.mxu0 %v7171_v9  ;;  %v7192_v23 = vld [vmem:[#allocation4 + $0xc50] ss:$8 sps:$4 sm:$0xff]   ;;  %v7193_v24 = vld [vmem:[#allocation4 + $0x64] ss:$8 sps:$4 sm:$0xff]   ;;  %v7197_v26 = vld [vmem:[#allocation4 + $0x60] ss:$8 sps:$4 sm:$0xff]  }
  0x52   :  { %v7195_v25 = vld [vmem:[#allocation4 + $0xc64] ss:$8 sps:$4 sm:$0xff]   ;;  %v7198_v27 = vld [vmem:[#allocation4 + $0xc60] ss:$8 sps:$4 sm:$0xff]   ;;  %v7199_v28 = vld [vmem:[#allocation4 + $0x74] ss:$8 sps:$4 sm:$0xff]  }
  0x53   :  { %5036 = vmatpush1.bf16.msra.mxu1 %v7173_v10  ;;  %v7201_v29 = vld [vmem:[#allocation4 + $0xc74] ss:$8 sps:$4 sm:$0xff]   ;;  %v7203_v30 = vld [vmem:[#allocation4 + $0x70] ss:$8 sps:$4 sm:$0xff]   ;;  %v7205_v32 = vld [vmem:[#allocation4 + $0x84] ss:$8 sps:$4 sm:$0xff]  }
  0x54   :  { %5528 = vmatpush1.bf16.msra.mxu0 %v7174_v11  ;;  %5037 = vmatprep.subr.bf16.mxu1 %v7175_v12  ;;  %v7204_v31 = vld [vmem:[#allocation4 + $0xc70] ss:$8 sps:$4 sm:$0xff]   ;;  %v7207_v33 = vld [vmem:[#allocation4 + $0xc84] ss:$8 sps:$4 sm:$0xff]   ;;  %v7209_v34 = vld [vmem:[#allocation4 + $0x80] ss:$8 sps:$4 sm:$0xff]  }
  0x55   :  { %5529 = vmatprep.subr.bf16.mxu0 %v7177_v13  ;;  %v7210_v35 = vld [vmem:[#allocation4 + $0xc80] ss:$8 sps:$4 sm:$0xff]   ;;  %v7211_v36 = vld [vmem:[#allocation4 + $0x94] ss:$8 sps:$4 sm:$0xff]   ;;  %v7215_v38 = vld [vmem:[#allocation4 + $0x90] ss:$8 sps:$4 sm:$0xff]  }
  0x56   :  { %v7213_v37 = vld [vmem:[#allocation4 + $0xc94] ss:$8 sps:$4 sm:$0xff]   ;;  %v7216_v39 = vld [vmem:[#allocation4 + $0xc90] ss:$8 sps:$4 sm:$0xff]   ;;  %v7217_v40 = vld [vmem:[#allocation4 + $0xa4] ss:$8 sps:$4 sm:$0xff]  }
  0x57   :  { %5038 = vmatpush1.bf16.msra.mxu1 %v7179_v14  ;;  %v7219_v41 = vld [vmem:[#allocation4 + $0xca4] ss:$8 sps:$4 sm:$0xff]   ;;  %v7221_v42 = vld [vmem:[#allocation4 + $0xa0] ss:$8 sps:$4 sm:$0xff]   ;;  %v7223_v44 = vld [vmem:[#allocation4 + $0xb4] ss:$8 sps:$4 sm:$0xff]  }
  0x58   :  { %5530 = vmatpush1.bf16.msra.mxu0 %v7180_v15  ;;  %5039 = vmatprep.subr.bf16.mxu1 %v7181_v16  ;;  %v7222_v43 = vld [vmem:[#allocation4 + $0xca0] ss:$8 sps:$4 sm:$0xff]   ;;  %v7225_v45 = vld [vmem:[#allocation4 + $0xcb4] ss:$8 sps:$4 sm:$0xff]   ;;  %v7227_v47 = vld [vmem:[#allocation4 + $0xb0] ss:$8 sps:$4 sm:$0xff]  }
  0x59   :  { %5531 = vmatprep.subr.bf16.mxu0 %v7183_v17  ;;  %v69_v46 = vld [vmem:[#allocation2] sm:$0xff]  ;;  %v7229_v51 = vld [vmem:[#allocation4 + $0xc4] ss:$8 sps:$4 sm:$0xff]   ;;  %v7233_v56 = vld [vmem:[#allocation4 + $0xc0] ss:$8 sps:$4 sm:$0xff]   ;;  %vm6167_vm0 = vcmask 11264  }
  0x5a   :  { %v119_v48 = vcombine.high %v69_v46, %v69_v46  ;;  %v7228_v49 = vld [vmem:[#allocation4 + $0xcb0] ss:$8 sps:$4 sm:$0xff]   ;;  %v7231_v52 = vld [vmem:[#allocation4 + $0xcc4] ss:$8 sps:$4 sm:$0xff]   ;;  %v7234_v57 = vld [vmem:[#allocation4 + $0xcc0] ss:$8 sps:$4 sm:$0xff]   ;;  %v169_v8 = vpack.c.bf16 %v69_v46, %v69_v46 }
  0x5b   :  { %5040 = vmatpush1.bf16.msra.mxu1 %v7185_v18  ;;  %v81_v50 = vld [vmem:[#allocation2 + $0x60] sm:$0xff]  ;;  %v7241_v62 = vld [vmem:[#allocation4 + $0xe4] ss:$8 sps:$4 sm:$0xff]   ;;  %v7245_v0 = vld [vmem:[#allocation4 + $0xe0] ss:$8 sps:$4 sm:$0xff]  }
  0x5c   :  { %5532 = vmatpush1.bf16.msra.mxu0 %v7186_v19  ;;  %5041 = vmatprep.subr.bf16.mxu1 %v7187_v20  ;;  %v170_v53 = vpack.c.bf16 %v119_v48, %v119_v48  ;;  %v131_v54 = vcombine.high %v81_v50, %v81_v50  ;;  %v7235_v58 = vld [vmem:[#allocation4 + $0xd4] ss:$8 sps:$4 sm:$0xff]   ;;  %v7239_v60 = vld [vmem:[#allocation4 + $0xd0] ss:$8 sps:$4 sm:$0xff]   ;;  %v7243_v63 = vld [vmem:[#allocation4 + $0xce4] ss:$8 sps:$4 sm:$0xff]   ;;  %v193_v9 = vpack.c.bf16 %v81_v50, %v81_v50 }
  0x5d   :  { %5533 = vmatprep.subr.bf16.mxu0 %v7189_v21  ;;  %v7237_v59 = vld [vmem:[#allocation4 + $0xcd4] ss:$8 sps:$4 sm:$0xff]   ;;  %v7240_v61 = vld [vmem:[#allocation4 + $0xcd0] ss:$8 sps:$4 sm:$0xff]   ;;  %v7246_v1 = vld [vmem:[#allocation4 + $0xce0] ss:$8 sps:$4 sm:$0xff]  }
  0x5e   :  { %5063 = vmatprep.mubr.bf16.mxu1 %v170_v53  ;;  %v194_v55 = vpack.c.bf16 %v131_v54, %v131_v54  ;;  %v7247_v2 = vld [vmem:[#allocation4 + $0xf4] ss:$8 sps:$4 sm:$0xff]   ;;  %v7251_v4 = vld [vmem:[#allocation4 + $0xf0] ss:$8 sps:$4 sm:$0xff]   ;;  %v7256_v6 = vld [vmem:[#allocation4 + $0x104] ss:$8 sps:$4 sm:$0xff]  }
  0x5f   :  { %5042 = vmatpush1.bf16.msra.mxu1 %v7191_v22  ;;  %v7249_v3 = vld [vmem:[#allocation4 + $0xcf4] ss:$8 sps:$4 sm:$0xff]   ;;  %v7252_v5 = vld [vmem:[#allocation4 + $0xcf0] ss:$8 sps:$4 sm:$0xff]   ;;  %v7260_v7 = vld [vmem:[#allocation4 + $0xd04] ss:$8 sps:$4 sm:$0xff]  }
  0x60   :  { %5534 = vmatpush1.bf16.msra.mxu0 %v7192_v23  ;;  %5043 = vmatprep.subr.bf16.mxu1 %v7193_v24  ;;  %v7254_v10 = vld [vmem:[#allocation4 + $0x100] ss:$8 sps:$4 sm:$0xff]   ;;  %v7263_v12 = vld [vmem:[#allocation4 + $0x114] ss:$8 sps:$4 sm:$0xff]   ;;  %v7261_v14 = vld [vmem:[#allocation4 + $0x110] ss:$8 sps:$4 sm:$0xff]  }
  0x61   :  { %5535 = vmatprep.subr.bf16.mxu0 %v7195_v25  ;;  %5555 = vmatprep.mubr.bf16.mxu0 %v194_v55  ;;  %v7258_v11 = vld [vmem:[#allocation4 + $0xd00] ss:$8 sps:$4 sm:$0xff]   ;;  %v7266_v13 = vld [vmem:[#allocation4 + $0xd14] ss:$8 sps:$4 sm:$0xff]   ;;  %v7264_v15 = vld [vmem:[#allocation4 + $0xd10] ss:$8 sps:$4 sm:$0xff]  }
  0x62   :  { %v7269_v16 = vld [vmem:[#allocation4 + $0x124] ss:$8 sps:$4 sm:$0xff]   ;;  %v7267_v18 = vld [vmem:[#allocation4 + $0x120] ss:$8 sps:$4 sm:$0xff]   ;;  %v7275_v20 = vld [vmem:[#allocation4 + $0x134] ss:$8 sps:$4 sm:$0xff]  }
  0x63   :  { %5044 = vmatpush1.bf16.msra.mxu1 %v7197_v26  ;;  %v7272_v17 = vld [vmem:[#allocation4 + $0xd24] ss:$8 sps:$4 sm:$0xff]   ;;  %v7270_v19 = vld [vmem:[#allocation4 + $0xd20] ss:$8 sps:$4 sm:$0xff]   ;;  %v7278_v21 = vld [vmem:[#allocation4 + $0xd34] ss:$8 sps:$4 sm:$0xff]  }
  0x64   :  { %5536 = vmatpush1.bf16.msra.mxu0 %v7198_v27  ;;  %5045 = vmatprep.subr.bf16.mxu1 %v7199_v28  ;;  %v7273_v22 = vld [vmem:[#allocation4 + $0x130] ss:$8 sps:$4 sm:$0xff]   ;;  %v7281_v24 = vld [vmem:[#allocation4 + $0x144] ss:$8 sps:$4 sm:$0xff]   ;;  %v7279_v26 = vld [vmem:[#allocation4 + $0x140] ss:$8 sps:$4 sm:$0xff]  }
  0x65   :  { %5537 = vmatprep.subr.bf16.mxu0 %v7201_v29  ;;  %v7276_v23 = vld [vmem:[#allocation4 + $0xd30] ss:$8 sps:$4 sm:$0xff]   ;;  %v7284_v25 = vld [vmem:[#allocation4 + $0xd44] ss:$8 sps:$4 sm:$0xff]   ;;  %v7282_v27 = vld [vmem:[#allocation4 + $0xd40] ss:$8 sps:$4 sm:$0xff]  }
  0x66   :  { %v7287_v28 = vld [vmem:[#allocation4 + $0x154] ss:$8 sps:$4 sm:$0xff]   ;;  %v7305_v46 = vld [vmem:[#allocation4 + $0x184] ss:$8 sps:$4 sm:$0xff]   ;;  %v7303_v48 = vld [vmem:[#allocation4 + $0x180] ss:$8 sps:$4 sm:$0xff]  }
  0x67   :  { %5046 = vmatpush1.bf16.msra.mxu1 %v7203_v30  ;;  %v7290_v29 = vld [vmem:[#allocation4 + $0xd54] ss:$8 sps:$4 sm:$0xff]   ;;  %v7285_v30 = vld [vmem:[#allocation4 + $0x150] ss:$8 sps:$4 sm:$0xff]   ;;  %v7317_v54 = vld [vmem:[#allocation4 + $0x1a4] ss:$8 sps:$4 sm:$0xff]  }
  0x68   :  { %5538 = vmatpush1.bf16.msra.mxu0 %v7204_v31  ;;  %5047 = vmatprep.subr.bf16.mxu1 %v7205_v32  ;;  %v7288_v31 = vld [vmem:[#allocation4 + $0xd50] ss:$8 sps:$4 sm:$0xff]   ;;  %v7293_v32 = vld [vmem:[#allocation4 + $0x164] ss:$8 sps:$4 sm:$0xff]   ;;  %v7311_v50 = vld [vmem:[#allocation4 + $0x194] ss:$8 sps:$4 sm:$0xff]  }
  0x69   :  { %5539 = vmatprep.subr.bf16.mxu0 %v7207_v33  ;;  %v7296_v33 = vld [vmem:[#allocation4 + $0xd64] ss:$8 sps:$4 sm:$0xff]   ;;  %v7312_v53 = vld [vmem:[#allocation4 + $0xd90] ss:$8 sps:$4 sm:$0xff]  }
  0x6a   :  { %v7320_v55 = vld [vmem:[#allocation4 + $0xda4] ss:$8 sps:$4 sm:$0xff]  }
  0x6b   :  { %5048 = vmatpush1.bf16.msra.mxu1 %v7209_v34  ;;  %v8564_v34 = vld [vmem:[#allocation2 + $0x8] sm:$0xff] }
  0x6c   :  { %5540 = vmatpush1.bf16.msra.mxu0 %v7210_v35  ;;  %5049 = vmatprep.subr.bf16.mxu1 %v7211_v36  ;;  %v7291_v35 = vld [vmem:[#allocation4 + $0x160] ss:$8 sps:$4 sm:$0xff]  }
  0x6d   :  { %5541 = vmatprep.subr.bf16.mxu0 %v7213_v37  ;;  %v7294_v36 = vld [vmem:[#allocation4 + $0xd60] ss:$8 sps:$4 sm:$0xff]   ;;  %v120_v37 = vcombine.high %v8564_v34, %v8564_v34 }
  0x6f   :  { %5050 = vmatpush1.bf16.msra.mxu1 %v7215_v38  ;;  %v8568_v38 = vld [vmem:[#allocation2 + $0x68] sm:$0xff] }
  0x70   :  { %5542 = vmatpush1.bf16.msra.mxu0 %v7216_v39  ;;  %5051 = vmatprep.subr.bf16.mxu1 %v7217_v40  ;;  %v7299_v39 = vld [vmem:[#allocation4 + $0x174] ss:$8 sps:$4 sm:$0xff]   ;;  %v132_v40 = vcombine.high %v8568_v38, %v8568_v38 }
  0x71   :  { %5543 = vmatprep.subr.bf16.mxu0 %v7219_v41  ;;  %v7302_v41 = vld [vmem:[#allocation4 + $0xd74] ss:$8 sps:$4 sm:$0xff]  }
  0x73   :  { %5052 = vmatpush1.bf16.msra.mxu1 %v7221_v42  ;;  %v172_v42 = vpack.c.bf16 %v120_v37, %v120_v37  ;;  %v7374_v37 = vld [vmem:[#allocation4 + $0xe30] ss:$8 sps:$4 sm:$0xff]  }
  0x74   :  { %5544 = vmatpush1.bf16.msra.mxu0 %v7222_v43  ;;  %5053 = vmatprep.subr.bf16.mxu1 %v7223_v44  ;;  %v196_v43 = vpack.c.bf16 %v132_v40, %v132_v40  ;;  %v7297_v44 = vld [vmem:[#allocation4 + $0x170] ss:$8 sps:$4 sm:$0xff]   ;;  %v7377_v40 = vld [vmem:[#allocation4 + $0x240] ss:$8 sps:$4 sm:$0xff]  }
  0x75   :  { %5545 = vmatprep.subr.bf16.mxu0 %v7225_v45  ;;  %v7300_v45 = vld [vmem:[#allocation4 + $0xd70] ss:$8 sps:$4 sm:$0xff]  }
  0x77   :  { %5054 = vmatpush1.bf16.msra.mxu1 %v7227_v47  ;;  %v7308_v47 = vld [vmem:[#allocation4 + $0xd84] ss:$8 sps:$4 sm:$0xff]  }
  0x78   :  { %5546 = vmatpush1.bf16.msra.mxu0 %v7228_v49  ;;  %5055 = vmatprep.subr.bf16.mxu1 %v7229_v51  ;;  %v7306_v49 = vld [vmem:[#allocation4 + $0xd80] ss:$8 sps:$4 sm:$0xff]   ;;  %v7314_v51 = vld [vmem:[#allocation4 + $0xd94] ss:$8 sps:$4 sm:$0xff]  }
  0x79   :  { %5547 = vmatprep.subr.bf16.mxu0 %v7231_v52  ;;  %v7309_v52 = vld [vmem:[#allocation4 + $0x190] ss:$8 sps:$4 sm:$0xff]  }
  0x7b   :  { %5056 = vmatpush1.bf16.msra.mxu1 %v7233_v56  ;;  %v7315_v56 = vld [vmem:[#allocation4 + $0x1a0] ss:$8 sps:$4 sm:$0xff]  }
  0x7c   :  { %5548 = vmatpush1.bf16.msra.mxu0 %v7234_v57  ;;  %5057 = vmatprep.subr.bf16.mxu1 %v7235_v58  ;;  %v7318_v57 = vld [vmem:[#allocation4 + $0xda0] ss:$8 sps:$4 sm:$0xff]   ;;  %v7323_v58 = vld [vmem:[#allocation4 + $0x1b4] ss:$8 sps:$4 sm:$0xff]  }
  0x7d   :  { %5549 = vmatprep.subr.bf16.mxu0 %v7237_v59  ;;  %v7326_v59 = vld [vmem:[#allocation4 + $0xdb4] ss:$8 sps:$4 sm:$0xff]  }
  0x7f   :  { %5058 = vmatpush1.bf16.msra.mxu1 %v7239_v60  ;;  %v7321_v60 = vld [vmem:[#allocation4 + $0x1b0] ss:$8 sps:$4 sm:$0xff]  }
  0x80   :  { %5550 = vmatpush1.bf16.msra.mxu0 %v7240_v61  ;;  %5059 = vmatprep.subr.bf16.mxu1 %v7241_v62  ;;  %v7324_v61 = vld [vmem:[#allocation4 + $0xdb0] ss:$8 sps:$4 sm:$0xff]   ;;  %v7329_v62 = vld [vmem:[#allocation4 + $0x1c4] ss:$8 sps:$4 sm:$0xff]  }
  0x81   :  { %5551 = vmatprep.subr.bf16.mxu0 %v7243_v63  ;;  %v7332_v63 = vld [vmem:[#allocation4 + $0xdc4] ss:$8 sps:$4 sm:$0xff]  }
  0x83   :  { %5060 = vmatpush1.bf16.msra.mxu1 %v7245_v0  ;;  %v7327_v0 = vld [vmem:[#allocation4 + $0x1c0] ss:$8 sps:$4 sm:$0xff]  }
  0x84   :  { %5552 = vmatpush1.bf16.msra.mxu0 %v7246_v1  ;;  %5061 = vmatprep.subr.bf16.mxu1 %v7247_v2  ;;  %v7330_v1 = vld [vmem:[#allocation4 + $0xdc0] ss:$8 sps:$4 sm:$0xff]   ;;  %v7335_v2 = vld [vmem:[#allocation4 + $0x1d4] ss:$8 sps:$4 sm:$0xff]  }
  0x85   :  { %5553 = vmatprep.subr.bf16.mxu0 %v7249_v3  ;;  %v7338_v3 = vld [vmem:[#allocation4 + $0xdd4] ss:$8 sps:$4 sm:$0xff]  }
  0x87   :  { %5062 = vmatpush1.bf16.msra.mxu1 %v7251_v4  ;;  %v7333_v4 = vld [vmem:[#allocation4 + $0x1d0] ss:$8 sps:$4 sm:$0xff]  }
  0x88   :  { %5554 = vmatpush1.bf16.msra.mxu0 %v7252_v5  ;;  %5072 = vmatprep.subr.bf16.mxu1 %v7256_v6  ;;  %v7336_v5 = vld [vmem:[#allocation4 + $0xdd0] ss:$8 sps:$4 sm:$0xff]   ;;  %v7341_v6 = vld [vmem:[#allocation4 + $0x1e4] ss:$8 sps:$4 sm:$0xff]  }
  0x89   :  { %5564 = vmatprep.subr.bf16.mxu0 %v7260_v7  ;;  %v7344_v7 = vld [vmem:[#allocation4 + $0xde4] ss:$8 sps:$4 sm:$0xff]  }
  0x8a   :  { %5064 = vmatmul.mubr.bf16.vlgmr.msra.gmra.mrb[0].mxu1 %v169_v8  ;;  %v7339_v8 = vld [vmem:[#allocation4 + $0x1e0] ss:$8 sps:$4 sm:$0xff]  }
  0x8b   :  { %5556 = vmatmul.mubr.bf16.vlgmr.msra.gmra.mrb[0].mxu0 %v193_v9  ;;  %5073 = vmatpush1.bf16.msra.mxu1 %v7254_v10  ;;  %v7342_v9 = vld [vmem:[#allocation4 + $0xde0] ss:$8 sps:$4 sm:$0xff]   ;;  %v7347_v10 = vld [vmem:[#allocation4 + $0x1f4] ss:$8 sps:$4 sm:$0xff]  }
  0x8c   :  { %5565 = vmatpush1.bf16.msra.mxu0 %v7258_v11  ;;  %5074 = vmatprep.subr.bf16.mxu1 %v7263_v12  ;;  %v7350_v11 = vld [vmem:[#allocation4 + $0xdf4] ss:$8 sps:$4 sm:$0xff]   ;;  %v7345_v12 = vld [vmem:[#allocation4 + $0x1f0] ss:$8 sps:$4 sm:$0xff]  }
  0x8d   :  { %5566 = vmatprep.subr.bf16.mxu0 %v7266_v13  ;;  %5104 = vmatprep.mubr.bf16.mxu1 %v172_v42  ;;  %v7348_v13 = vld [vmem:[#allocation4 + $0xdf0] ss:$8 sps:$4 sm:$0xff]   ;;  %v7385_v42 = vld [vmem:[#allocation4 + $0x254] ss:$8 sps:$4 sm:$0xff]  }
  0x8e   :  { %5596 = vmatprep.mubr.bf16.mxu0 %v196_v43  ;;  %v7388_v43 = vld [vmem:[#allocation4 + $0xe54] ss:$8 sps:$4 sm:$0xff]  }
  0x8f   :  { %5075 = vmatpush1.bf16.msra.mxu1 %v7261_v14  ;;  %v7354_v14 = vld [vmem:[#allocation4 + $0x204] ss:$8 sps:$4 sm:$0xff]  }
  0x90   :  { %5567 = vmatpush1.bf16.msra.mxu0 %v7264_v15  ;;  %5076 = vmatprep.subr.bf16.mxu1 %v7269_v16  ;;  %v7358_v15 = vld [vmem:[#allocation4 + $0xe04] ss:$8 sps:$4 sm:$0xff]   ;;  %v171_v16 = vpack.c.bf16 %v8564_v34, %v8564_v34  ;;  %v7373_v34 = vld [vmem:[#allocation4 + $0x234] ss:$8 sps:$4 sm:$0xff]  }
  0x91   :  { %5568 = vmatprep.subr.bf16.mxu0 %v7272_v17  ;;  %v7352_v17 = vld [vmem:[#allocation4 + $0x200] ss:$8 sps:$4 sm:$0xff]  }
  0x93   :  { %5077 = vmatpush1.bf16.msra.mxu1 %v7267_v18  ;;  %v195_v18 = vpack.c.bf16 %v8568_v38, %v8568_v38  ;;  %v7379_v38 = vld [vmem:[#allocation4 + $0x244] ss:$8 sps:$4 sm:$0xff]  }
  0x94   :  { %5569 = vmatpush1.bf16.msra.mxu0 %v7270_v19  ;;  %5078 = vmatprep.subr.bf16.mxu1 %v7275_v20  ;;  %v7356_v19 = vld [vmem:[#allocation4 + $0xe00] ss:$8 sps:$4 sm:$0xff]   ;;  %v7361_v20 = vld [vmem:[#allocation4 + $0x214] ss:$8 sps:$4 sm:$0xff]  }
  0x95   :  { %5570 = vmatprep.subr.bf16.mxu0 %v7278_v21  ;;  %v7364_v21 = vld [vmem:[#allocation4 + $0xe14] ss:$8 sps:$4 sm:$0xff]  }
  0x97   :  { %5079 = vmatpush1.bf16.msra.mxu1 %v7273_v22  ;;  %v8576_v22 = vld [vmem:[#allocation2 + $0x10] sm:$0xff] }
  0x98   :  { %5571 = vmatpush1.bf16.msra.mxu0 %v7276_v23  ;;  %5080 = vmatprep.subr.bf16.mxu1 %v7281_v24  ;;  %v121_v23 = vcombine.high %v8576_v22, %v8576_v22  ;;  %v8580_v24 = vld [vmem:[#allocation2 + $0x70] sm:$0xff] }
  0x99   :  { %5572 = vmatprep.subr.bf16.mxu0 %v7284_v25  ;;  %v7359_v25 = vld [vmem:[#allocation4 + $0x210] ss:$8 sps:$4 sm:$0xff]  }
  0x9b   :  { %5081 = vmatpush1.bf16.msra.mxu1 %v7279_v26  ;;  %v7362_v26 = vld [vmem:[#allocation4 + $0xe10] ss:$8 sps:$4 sm:$0xff]  }
  0x9c   :  { %5573 = vmatpush1.bf16.msra.mxu0 %v7282_v27  ;;  %5082 = vmatprep.subr.bf16.mxu1 %v7287_v28  ;;  %v174_v27 = vpack.c.bf16 %v121_v23, %v121_v23  ;;  %v133_v28 = vcombine.high %v8580_v24, %v8580_v24  ;;  %v8584_v23 = vld [vmem:[#allocation2 + $0x18] sm:$0xff] }
  0x9d   :  { %5574 = vmatprep.subr.bf16.mxu0 %v7290_v29  ;;  %v7367_v29 = vld [vmem:[#allocation4 + $0x224] ss:$8 sps:$4 sm:$0xff]  }
  0x9f   :  { %5083 = vmatpush1.bf16.msra.mxu1 %v7285_v30  ;;  %v7370_v30 = vld [vmem:[#allocation4 + $0xe24] ss:$8 sps:$4 sm:$0xff]  }
  0xa0   :  { %5575 = vmatpush1.bf16.msra.mxu0 %v7288_v31  ;;  %5084 = vmatprep.subr.bf16.mxu1 %v7293_v32  ;;  %v198_v31 = vpack.c.bf16 %v133_v28, %v133_v28  ;;  %v7365_v32 = vld [vmem:[#allocation4 + $0x220] ss:$8 sps:$4 sm:$0xff]   ;;  %v122_v28 = vcombine.high %v8584_v23, %v8584_v23 }
  0xa1   :  { %5576 = vmatprep.subr.bf16.mxu0 %v7296_v33  ;;  %v7368_v33 = vld [vmem:[#allocation4 + $0xe20] ss:$8 sps:$4 sm:$0xff]  }
  0xa3   :  { %5085 = vmatpush1.bf16.msra.mxu1 %v7291_v35  ;;  %v7376_v35 = vld [vmem:[#allocation4 + $0xe34] ss:$8 sps:$4 sm:$0xff]  }
  0xa4   :  { %5577 = vmatpush1.bf16.msra.mxu0 %v7294_v36  ;;  %5086 = vmatprep.subr.bf16.mxu1 %v7299_v39  ;;  %v7371_v36 = vld [vmem:[#allocation4 + $0x230] ss:$8 sps:$4 sm:$0xff]   ;;  %v7382_v39 = vld [vmem:[#allocation4 + $0xe44] ss:$8 sps:$4 sm:$0xff]  }
  0xa5   :  { %5578 = vmatprep.subr.bf16.mxu0 %v7302_v41  ;;  %v7380_v41 = vld [vmem:[#allocation4 + $0xe40] ss:$8 sps:$4 sm:$0xff]  }
  0xa7   :  { %5087 = vmatpush1.bf16.msra.mxu1 %v7297_v44  ;;  %v7383_v44 = vld [vmem:[#allocation4 + $0x250] ss:$8 sps:$4 sm:$0xff]  }
  0xa8   :  { %5579 = vmatpush1.bf16.msra.mxu0 %v7300_v45  ;;  %5088 = vmatprep.subr.bf16.mxu1 %v7305_v46  ;;  %v7386_v45 = vld [vmem:[#allocation4 + $0xe50] ss:$8 sps:$4 sm:$0xff]   ;;  %v7391_v46 = vld [vmem:[#allocation4 + $0x264] ss:$8 sps:$4 sm:$0xff]  }
  0xa9   :  { %5580 = vmatprep.subr.bf16.mxu0 %v7308_v47  ;;  %v7394_v47 = vld [vmem:[#allocation4 + $0xe64] ss:$8 sps:$4 sm:$0xff]  }
  0xab   :  { %5089 = vmatpush1.bf16.msra.mxu1 %v7303_v48  ;;  %v7389_v48 = vld [vmem:[#allocation4 + $0x260] ss:$8 sps:$4 sm:$0xff]  }
  0xac   :  { %5581 = vmatpush1.bf16.msra.mxu0 %v7306_v49  ;;  %5090 = vmatprep.subr.bf16.mxu1 %v7311_v50  ;;  %v7392_v49 = vld [vmem:[#allocation4 + $0xe60] ss:$8 sps:$4 sm:$0xff]   ;;  %v7397_v50 = vld [vmem:[#allocation4 + $0x274] ss:$8 sps:$4 sm:$0xff]  }
  0xad   :  { %5582 = vmatprep.subr.bf16.mxu0 %v7314_v51  ;;  %v7400_v51 = vld [vmem:[#allocation4 + $0xe74] ss:$8 sps:$4 sm:$0xff]  }
  0xaf   :  { %5091 = vmatpush1.bf16.msra.mxu1 %v7309_v52  ;;  %v7395_v52 = vld [vmem:[#allocation4 + $0x270] ss:$8 sps:$4 sm:$0xff]  }
  0xb0   :  { %5583 = vmatpush1.bf16.msra.mxu0 %v7312_v53  ;;  %5092 = vmatprep.subr.bf16.mxu1 %v7317_v54  ;;  %v7398_v53 = vld [vmem:[#allocation4 + $0xe70] ss:$8 sps:$4 sm:$0xff]   ;;  %v7403_v54 = vld [vmem:[#allocation4 + $0x284] ss:$8 sps:$4 sm:$0xff]  }
  0xb1   :  { %5584 = vmatprep.subr.bf16.mxu0 %v7320_v55  ;;  %v7406_v55 = vld [vmem:[#allocation4 + $0xe84] ss:$8 sps:$4 sm:$0xff]  }
  0xb3   :  { %5093 = vmatpush1.bf16.msra.mxu1 %v7315_v56  ;;  %v7401_v56 = vld [vmem:[#allocation4 + $0x280] ss:$8 sps:$4 sm:$0xff]  }
  0xb4   :  { %5585 = vmatpush1.bf16.msra.mxu0 %v7318_v57  ;;  %5094 = vmatprep.subr.bf16.mxu1 %v7323_v58  ;;  %v7404_v57 = vld [vmem:[#allocation4 + $0xe80] ss:$8 sps:$4 sm:$0xff]   ;;  %v7409_v58 = vld [vmem:[#allocation4 + $0x294] ss:$8 sps:$4 sm:$0xff]  }
  0xb5   :  { %5586 = vmatprep.subr.bf16.mxu0 %v7326_v59  ;;  %v7412_v59 = vld [vmem:[#allocation4 + $0xe94] ss:$8 sps:$4 sm:$0xff]  }
  0xb7   :  { %5095 = vmatpush1.bf16.msra.mxu1 %v7321_v60  ;;  %v7407_v60 = vld [vmem:[#allocation4 + $0x290] ss:$8 sps:$4 sm:$0xff]  }
  0xb8   :  { %5587 = vmatpush1.bf16.msra.mxu0 %v7324_v61  ;;  %5096 = vmatprep.subr.bf16.mxu1 %v7329_v62  ;;  %v7410_v61 = vld [vmem:[#allocation4 + $0xe90] ss:$8 sps:$4 sm:$0xff]   ;;  %v7415_v62 = vld [vmem:[#allocation4 + $0x2a4] ss:$8 sps:$4 sm:$0xff]  }
  0xb9   :  { %5588 = vmatprep.subr.bf16.mxu0 %v7332_v63  ;;  %v7418_v63 = vld [vmem:[#allocation4 + $0xea4] ss:$8 sps:$4 sm:$0xff]  }
  0xbb   :  { %5097 = vmatpush1.bf16.msra.mxu1 %v7327_v0  ;;  %v7413_v0 = vld [vmem:[#allocation4 + $0x2a0] ss:$8 sps:$4 sm:$0xff]  }
  0xbc   :  { %5589 = vmatpush1.bf16.msra.mxu0 %v7330_v1  ;;  %5098 = vmatprep.subr.bf16.mxu1 %v7335_v2  ;;  %v7416_v1 = vld [vmem:[#allocation4 + $0xea0] ss:$8 sps:$4 sm:$0xff]   ;;  %v7421_v2 = vld [vmem:[#allocation4 + $0x2b4] ss:$8 sps:$4 sm:$0xff]  }
  0xbd   :  { %5590 = vmatprep.subr.bf16.mxu0 %v7338_v3  ;;  %v7424_v3 = vld [vmem:[#allocation4 + $0xeb4] ss:$8 sps:$4 sm:$0xff]  }
  0xbf   :  { %5099 = vmatpush1.bf16.msra.mxu1 %v7333_v4  ;;  %v7419_v4 = vld [vmem:[#allocation4 + $0x2b0] ss:$8 sps:$4 sm:$0xff]  }
  0xc0   :  { %5591 = vmatpush1.bf16.msra.mxu0 %v7336_v5  ;;  %5100 = vmatprep.subr.bf16.mxu1 %v7341_v6  ;;  %v7422_v5 = vld [vmem:[#allocation4 + $0xeb0] ss:$8 sps:$4 sm:$0xff]   ;;  %v7427_v6 = vld [vmem:[#allocation4 + $0x2c4] ss:$8 sps:$4 sm:$0xff]  }
  0xc1   :  { %5592 = vmatprep.subr.bf16.mxu0 %v7344_v7  ;;  %v7430_v7 = vld [vmem:[#allocation4 + $0xec4] ss:$8 sps:$4 sm:$0xff]  }
  0xc3   :  { %5101 = vmatpush1.bf16.msra.mxu1 %v7339_v8  ;;  %v7425_v8 = vld [vmem:[#allocation4 + $0x2c0] ss:$8 sps:$4 sm:$0xff]  }
  0xc4   :  { %5593 = vmatpush1.bf16.msra.mxu0 %v7342_v9  ;;  %5102 = vmatprep.subr.bf16.mxu1 %v7347_v10  ;;  %v7428_v9 = vld [vmem:[#allocation4 + $0xec0] ss:$8 sps:$4 sm:$0xff]   ;;  %v7433_v10 = vld [vmem:[#allocation4 + $0x2d4] ss:$8 sps:$4 sm:$0xff]  }
  0xc5   :  { %5594 = vmatprep.subr.bf16.mxu0 %v7350_v11  ;;  %v7436_v11 = vld [vmem:[#allocation4 + $0xed4] ss:$8 sps:$4 sm:$0xff]  }
  0xc7   :  { %5103 = vmatpush1.bf16.msra.mxu1 %v7345_v12  ;;  %v7431_v12 = vld [vmem:[#allocation4 + $0x2d0] ss:$8 sps:$4 sm:$0xff]  }
  0xc8   :  { %5595 = vmatpush1.bf16.msra.mxu0 %v7348_v13  ;;  %5113 = vmatprep.subr.bf16.mxu1 %v7354_v14  ;;  %v7434_v13 = vld [vmem:[#allocation4 + $0xed0] ss:$8 sps:$4 sm:$0xff]   ;;  %v7439_v14 = vld [vmem:[#allocation4 + $0x2e4] ss:$8 sps:$4 sm:$0xff]  }
  0xc9   :  { %5605 = vmatprep.subr.bf16.mxu0 %v7358_v15  ;;  %v7442_v15 = vld [vmem:[#allocation4 + $0xee4] ss:$8 sps:$4 sm:$0xff]  }
  0xca   :  { %5105 = vmatmul.mubr.bf16.vlgmr.msra.gmra.mrb[0].mxu1 %v171_v16  ;;  %v7437_v16 = vld [vmem:[#allocation4 + $0x2e0] ss:$8 sps:$4 sm:$0xff]  }
  0xcb   :  { %5597 = vmatmul.mubr.bf16.vlgmr.msra.gmra.mrb[0].mxu0 %v195_v18  ;;  %5114 = vmatpush1.bf16.msra.mxu1 %v7352_v17  ;;  %v7440_v17 = vld [vmem:[#allocation4 + $0xee0] ss:$8 sps:$4 sm:$0xff]   ;;  %v7445_v18 = vld [vmem:[#allocation4 + $0x2f4] ss:$8 sps:$4 sm:$0xff]  }
  0xcc   :  { %5606 = vmatpush1.bf16.msra.mxu0 %v7356_v19  ;;  %5115 = vmatprep.subr.bf16.mxu1 %v7361_v20  ;;  %v7448_v19 = vld [vmem:[#allocation4 + $0xef4] ss:$8 sps:$4 sm:$0xff]   ;;  %v7443_v20 = vld [vmem:[#allocation4 + $0x2f0] ss:$8 sps:$4 sm:$0xff]  }
  0xcd   :  { %5607 = vmatprep.subr.bf16.mxu0 %v7364_v21  ;;  %5145 = vmatprep.mubr.bf16.mxu1 %v174_v27  ;;  %v7446_v21 = vld [vmem:[#allocation4 + $0xef0] ss:$8 sps:$4 sm:$0xff]   ;;  %v7456_v27 = vld [vmem:[#allocation4 + $0xf04] ss:$8 sps:$4 sm:$0xff]  }
  0xce   :  { %5637 = vmatprep.mubr.bf16.mxu0 %v198_v31  ;;  %v7450_v31 = vld [vmem:[#allocation4 + $0x300] ss:$8 sps:$4 sm:$0xff]  }
  0xcf   :  { %5116 = vmatpush1.bf16.msra.mxu1 %v7359_v25  ;;  %v8586_v25 = vld [vmem:[#allocation2 + $0x78] sm:$0xff] }
  0xd0   :  { %5608 = vmatpush1.bf16.msra.mxu0 %v7362_v26  ;;  %5117 = vmatprep.subr.bf16.mxu1 %v7367_v29  ;;  %v7452_v26 = vld [vmem:[#allocation4 + $0x304] ss:$8 sps:$4 sm:$0xff]   ;;  %v134_v29 = vcombine.high %v8586_v25, %v8586_v25 }
  0xd1   :  { %5609 = vmatprep.subr.bf16.mxu0 %v7370_v30  ;;  %v173_v30 = vpack.c.bf16 %v8576_v22, %v8576_v22  ;;  %v7465_v22 = vld [vmem:[#allocation4 + $0x324] ss:$8 sps:$4 sm:$0xff]  }
  0xd3   :  { %5118 = vmatpush1.bf16.msra.mxu1 %v7365_v32  ;;  %v197_v32 = vpack.c.bf16 %v8580_v24, %v8580_v24  ;;  %v7463_v24 = vld [vmem:[#allocation4 + $0x320] ss:$8 sps:$4 sm:$0xff]  }
  0xd4   :  { %5610 = vmatpush1.bf16.msra.mxu0 %v7368_v33  ;;  %5119 = vmatprep.subr.bf16.mxu1 %v7373_v34  ;;  %v7454_v33 = vld [vmem:[#allocation4 + $0xf00] ss:$8 sps:$4 sm:$0xff]   ;;  %v7459_v34 = vld [vmem:[#allocation4 + $0x314] ss:$8 sps:$4 sm:$0xff]  }
  0xd5   :  { %5611 = vmatprep.subr.bf16.mxu0 %v7376_v35  ;;  %v7462_v35 = vld [vmem:[#allocation4 + $0xf14] ss:$8 sps:$4 sm:$0xff]  }
  0xd7   :  { %5120 = vmatpush1.bf16.msra.mxu1 %v7371_v36  ;;  %v176_v36 = vpack.c.bf16 %v122_v28, %v122_v28  ;;  %v7535_v28 = vld [vmem:[#allocation4 + $0x3e0] ss:$8 sps:$4 sm:$0xff]  }
  0xd8   :  { %5612 = vmatpush1.bf16.msra.mxu0 %v7374_v37  ;;  %5121 = vmatprep.subr.bf16.mxu1 %v7379_v38  ;;  %v200_v37 = vpack.c.bf16 %v134_v29, %v134_v29  ;;  %v7457_v38 = vld [vmem:[#allocation4 + $0x310] ss:$8 sps:$4 sm:$0xff]   ;;  %v7538_v29 = vld [vmem:[#allocation4 + $0xfe0] ss:$8 sps:$4 sm:$0xff]  }
  0xd9   :  { %5613 = vmatprep.subr.bf16.mxu0 %v7382_v39  ;;  %v7460_v39 = vld [vmem:[#allocation4 + $0xf10] ss:$8 sps:$4 sm:$0xff]  }
  0xdb   :  { %5122 = vmatpush1.bf16.msra.mxu1 %v7377_v40  ;;  %v7468_v40 = vld [vmem:[#allocation4 + $0xf24] ss:$8 sps:$4 sm:$0xff]  }
  0xdc   :  { %5614 = vmatpush1.bf16.msra.mxu0 %v7380_v41  ;;  %5123 = vmatprep.subr.bf16.mxu1 %v7385_v42  ;;  %v7466_v41 = vld [vmem:[#allocation4 + $0xf20] ss:$8 sps:$4 sm:$0xff]   ;;  %v7471_v42 = vld [vmem:[#allocation4 + $0x334] ss:$8 sps:$4 sm:$0xff]  }
  0xdd   :  { %5615 = vmatprep.subr.bf16.mxu0 %v7388_v43  ;;  %v7474_v43 = vld [vmem:[#allocation4 + $0xf34] ss:$8 sps:$4 sm:$0xff]  }
  0xdf   :  { %5124 = vmatpush1.bf16.msra.mxu1 %v7383_v44  ;;  %v7469_v44 = vld [vmem:[#allocation4 + $0x330] ss:$8 sps:$4 sm:$0xff]  }
  0xe0   :  { %5616 = vmatpush1.bf16.msra.mxu0 %v7386_v45  ;;  %5125 = vmatprep.subr.bf16.mxu1 %v7391_v46  ;;  %v7472_v45 = vld [vmem:[#allocation4 + $0xf30] ss:$8 sps:$4 sm:$0xff]   ;;  %v7477_v46 = vld [vmem:[#allocation4 + $0x344] ss:$8 sps:$4 sm:$0xff]  }
  0xe1   :  { %5617 = vmatprep.subr.bf16.mxu0 %v7394_v47  ;;  %v7480_v47 = vld [vmem:[#allocation4 + $0xf44] ss:$8 sps:$4 sm:$0xff]  }
  0xe3   :  { %5126 = vmatpush1.bf16.msra.mxu1 %v7389_v48  ;;  %v7475_v48 = vld [vmem:[#allocation4 + $0x340] ss:$8 sps:$4 sm:$0xff]  }
  0xe4   :  { %5618 = vmatpush1.bf16.msra.mxu0 %v7392_v49  ;;  %5127 = vmatprep.subr.bf16.mxu1 %v7397_v50  ;;  %v7478_v49 = vld [vmem:[#allocation4 + $0xf40] ss:$8 sps:$4 sm:$0xff]   ;;  %v7483_v50 = vld [vmem:[#allocation4 + $0x354] ss:$8 sps:$4 sm:$0xff]  }
  0xe5   :  { %5619 = vmatprep.subr.bf16.mxu0 %v7400_v51  ;;  %v7486_v51 = vld [vmem:[#allocation4 + $0xf54] ss:$8 sps:$4 sm:$0xff]  }
  0xe7   :  { %5128 = vmatpush1.bf16.msra.mxu1 %v7395_v52  ;;  %v7481_v52 = vld [vmem:[#allocation4 + $0x350] ss:$8 sps:$4 sm:$0xff]  }
  0xe8   :  { %5620 = vmatpush1.bf16.msra.mxu0 %v7398_v53  ;;  %5129 = vmatprep.subr.bf16.mxu1 %v7403_v54  ;;  %v7484_v53 = vld [vmem:[#allocation4 + $0xf50] ss:$8 sps:$4 sm:$0xff]   ;;  %v7489_v54 = vld [vmem:[#allocation4 + $0x364] ss:$8 sps:$4 sm:$0xff]  }
  0xe9   :  { %5621 = vmatprep.subr.bf16.mxu0 %v7406_v55  ;;  %v7492_v55 = vld [vmem:[#allocation4 + $0xf64] ss:$8 sps:$4 sm:$0xff]  }
  0xeb   :  { %5130 = vmatpush1.bf16.msra.mxu1 %v7401_v56  ;;  %v7487_v56 = vld [vmem:[#allocation4 + $0x360] ss:$8 sps:$4 sm:$0xff]  }
  0xec   :  { %5622 = vmatpush1.bf16.msra.mxu0 %v7404_v57  ;;  %5131 = vmatprep.subr.bf16.mxu1 %v7409_v58  ;;  %v7490_v57 = vld [vmem:[#allocation4 + $0xf60] ss:$8 sps:$4 sm:$0xff]   ;;  %v7495_v58 = vld [vmem:[#allocation4 + $0x374] ss:$8 sps:$4 sm:$0xff]  }
  0xed   :  { %5623 = vmatprep.subr.bf16.mxu0 %v7412_v59  ;;  %v7498_v59 = vld [vmem:[#allocation4 + $0xf74] ss:$8 sps:$4 sm:$0xff]  }
  0xef   :  { %5132 = vmatpush1.bf16.msra.mxu1 %v7407_v60  ;;  %v7493_v60 = vld [vmem:[#allocation4 + $0x370] ss:$8 sps:$4 sm:$0xff]  }
  0xf0   :  { %5624 = vmatpush1.bf16.msra.mxu0 %v7410_v61  ;;  %5133 = vmatprep.subr.bf16.mxu1 %v7415_v62  ;;  %v7496_v61 = vld [vmem:[#allocation4 + $0xf70] ss:$8 sps:$4 sm:$0xff]   ;;  %v7501_v62 = vld [vmem:[#allocation4 + $0x384] ss:$8 sps:$4 sm:$0xff]  }
  0xf1   :  { %5625 = vmatprep.subr.bf16.mxu0 %v7418_v63  ;;  %v7504_v63 = vld [vmem:[#allocation4 + $0xf84] ss:$8 sps:$4 sm:$0xff]  }
  0xf3   :  { %5134 = vmatpush1.bf16.msra.mxu1 %v7413_v0  ;;  %v7499_v0 = vld [vmem:[#allocation4 + $0x380] ss:$8 sps:$4 sm:$0xff]  }
  0xf4   :  { %5626 = vmatpush1.bf16.msra.mxu0 %v7416_v1  ;;  %5135 = vmatprep.subr.bf16.mxu1 %v7421_v2  ;;  %v7502_v1 = vld [vmem:[#allocation4 + $0xf80] ss:$8 sps:$4 sm:$0xff]   ;;  %v7507_v2 = vld [vmem:[#allocation4 + $0x394] ss:$8 sps:$4 sm:$0xff]  }
  0xf5   :  { %5627 = vmatprep.subr.bf16.mxu0 %v7424_v3  ;;  %v7510_v3 = vld [vmem:[#allocation4 + $0xf94] ss:$8 sps:$4 sm:$0xff]  }
  0xf7   :  { %5136 = vmatpush1.bf16.msra.mxu1 %v7419_v4  ;;  %v7505_v4 = vld [vmem:[#allocation4 + $0x390] ss:$8 sps:$4 sm:$0xff]  }
  0xf8   :  { %5628 = vmatpush1.bf16.msra.mxu0 %v7422_v5  ;;  %5137 = vmatprep.subr.bf16.mxu1 %v7427_v6  ;;  %v7508_v5 = vld [vmem:[#allocation4 + $0xf90] ss:$8 sps:$4 sm:$0xff]   ;;  %v7513_v6 = vld [vmem:[#allocation4 + $0x3a4] ss:$8 sps:$4 sm:$0xff]  }
  0xf9   :  { %5629 = vmatprep.subr.bf16.mxu0 %v7430_v7  ;;  %v7516_v7 = vld [vmem:[#allocation4 + $0xfa4] ss:$8 sps:$4 sm:$0xff]  }
  0xfb   :  { %5138 = vmatpush1.bf16.msra.mxu1 %v7425_v8  ;;  %v7511_v8 = vld [vmem:[#allocation4 + $0x3a0] ss:$8 sps:$4 sm:$0xff]  }
  0xfc   :  { %5630 = vmatpush1.bf16.msra.mxu0 %v7428_v9  ;;  %5139 = vmatprep.subr.bf16.mxu1 %v7433_v10  ;;  %v7514_v9 = vld [vmem:[#allocation4 + $0xfa0] ss:$8 sps:$4 sm:$0xff]   ;;  %v7519_v10 = vld [vmem:[#allocation4 + $0x3b4] ss:$8 sps:$4 sm:$0xff]  }
  0xfd   :  { %5631 = vmatprep.subr.bf16.mxu0 %v7436_v11  ;;  %v7522_v11 = vld [vmem:[#allocation4 + $0xfb4] ss:$8 sps:$4 sm:$0xff]  }
  0xff   :  { %5140 = vmatpush1.bf16.msra.mxu1 %v7431_v12  ;;  %v7517_v12 = vld [vmem:[#allocation4 + $0x3b0] ss:$8 sps:$4 sm:$0xff]  }
 0x100   :  { %5632 = vmatpush1.bf16.msra.mxu0 %v7434_v13  ;;  %5141 = vmatprep.subr.bf16.mxu1 %v7439_v14  ;;  %v7520_v13 = vld [vmem:[#allocation4 + $0xfb0] ss:$8 sps:$4 sm:$0xff]   ;;  %v7525_v14 = vld [vmem:[#allocation4 + $0x3c4] ss:$8 sps:$4 sm:$0xff]  }
 0x101   :  { %5633 = vmatprep.subr.bf16.mxu0 %v7442_v15  ;;  %v7528_v15 = vld [vmem:[#allocation4 + $0xfc4] ss:$8 sps:$4 sm:$0xff]  }
 0x103   :  { %5142 = vmatpush1.bf16.msra.mxu1 %v7437_v16  ;;  %v7523_v16 = vld [vmem:[#allocation4 + $0x3c0] ss:$8 sps:$4 sm:$0xff]  }
 0x104   :  { %5634 = vmatpush1.bf16.msra.mxu0 %v7440_v17  ;;  %5143 = vmatprep.subr.bf16.mxu1 %v7445_v18  ;;  %v7526_v17 = vld [vmem:[#allocation4 + $0xfc0] ss:$8 sps:$4 sm:$0xff]   ;;  %v7531_v18 = vld [vmem:[#allocation4 + $0x3d4] ss:$8 sps:$4 sm:$0xff]  }
 0x105   :  { %5635 = vmatprep.subr.bf16.mxu0 %v7448_v19  ;;  %v7534_v19 = vld [vmem:[#allocation4 + $0xfd4] ss:$8 sps:$4 sm:$0xff]  }
 0x107   :  { %5144 = vmatpush1.bf16.msra.mxu1 %v7443_v20  ;;  %v7529_v20 = vld [vmem:[#allocation4 + $0x3d0] ss:$8 sps:$4 sm:$0xff]  }
 0x108   :  { %5636 = vmatpush1.bf16.msra.mxu0 %v7446_v21  ;;  %5154 = vmatprep.subr.bf16.mxu1 %v7452_v26  ;;  %v7532_v21 = vld [vmem:[#allocation4 + $0xfd0] ss:$8 sps:$4 sm:$0xff]   ;;  %v7537_v26 = vld [vmem:[#allocation4 + $0x3e4] ss:$8 sps:$4 sm:$0xff]  }
 0x109   :  { %5646 = vmatprep.subr.bf16.mxu0 %v7456_v27  ;;  %v7540_v27 = vld [vmem:[#allocation4 + $0xfe4] ss:$8 sps:$4 sm:$0xff]  }
 0x10a   :  { %5146 = vmatmul.mubr.bf16.vlgmr.msra.gmra.mrb[0].mxu1 %v173_v30  ;;  %v7543_v30 = vld [vmem:[#allocation4 + $0x3f4] ss:$8 sps:$4 sm:$0xff]  }
 0x10b   :  { %5638 = vmatmul.mubr.bf16.vlgmr.msra.gmra.mrb[0].mxu0 %v197_v32  ;;  %5155 = vmatpush1.bf16.msra.mxu1 %v7450_v31  ;;  %v7546_v31 = vld [vmem:[#allocation4 + $0xff4] ss:$8 sps:$4 sm:$0xff]  }
 0x10c   :  { %5647 = vmatpush1.bf16.msra.mxu0 %v7454_v33  ;;  %5156 = vmatprep.subr.bf16.mxu1 %v7459_v34  ;;  %v8596_v32 = vld [vmem:[#allocation2 + $0x20] sm:$0xff] }
 0x10d   :  { %5648 = vmatprep.subr.bf16.mxu0 %v7462_v35  ;;  %5186 = vmatprep.mubr.bf16.mxu1 %v176_v36  ;;  %v8598_v33 = vld [vmem:[#allocation2 + $0x80] sm:$0xff]  ;;  %v7550_v36 = vld [vmem:[#allocation4 + $0x404] ss:$8 sps:$4 sm:$0xff]  }
 0x10e   :  { %5678 = vmatprep.mubr.bf16.mxu0 %v200_v37  ;;  %v7541_v34 = vld [vmem:[#allocation4 + $0x3f0] ss:$8 sps:$4 sm:$0xff]   ;;  %v7554_v37 = vld [vmem:[#allocation4 + $0x1004] ss:$8 sps:$4 sm:$0xff]  }
 0x10f   :  { %5157 = vmatpush1.bf16.msra.mxu1 %v7457_v38  ;;  %v7544_v35 = vld [vmem:[#allocation4 + $0xff0] ss:$8 sps:$4 sm:$0xff]   ;;  %v123_v38 = vcombine.high %v8596_v32, %v8596_v32 }
 0x110   :  { %5649 = vmatpush1.bf16.msra.mxu0 %v7460_v39  ;;  %5158 = vmatprep.subr.bf16.mxu1 %v7465_v22  ;;  %v135_v39 = vcombine.high %v8598_v33, %v8598_v33  ;;  %v175_v22 = vpack.c.bf16 %v8584_v23, %v8584_v23  ;;  %v7563_v23 = vld [vmem:[#allocation4 + $0x424] ss:$8 sps:$4 sm:$0xff]  }
 0x111   :  { %5650 = vmatprep.subr.bf16.mxu0 %v7468_v40  ;;  %v199_v40 = vpack.c.bf16 %v8586_v25, %v8586_v25  ;;  %v7566_v25 = vld [vmem:[#allocation4 + $0x1024] ss:$8 sps:$4 sm:$0xff]  }
 0x113   :  { %5159 = vmatpush1.bf16.msra.mxu1 %v7463_v24  ;;  %v7548_v24 = vld [vmem:[#allocation4 + $0x400] ss:$8 sps:$4 sm:$0xff]  }
 0x114   :  { %5651 = vmatpush1.bf16.msra.mxu0 %v7466_v41  ;;  %5160 = vmatprep.subr.bf16.mxu1 %v7471_v42  ;;  %v7552_v41 = vld [vmem:[#allocation4 + $0x1000] ss:$8 sps:$4 sm:$0xff]   ;;  %v7557_v42 = vld [vmem:[#allocation4 + $0x414] ss:$8 sps:$4 sm:$0xff]  }
 0x115   :  { %5652 = vmatprep.subr.bf16.mxu0 %v7474_v43  ;;  %v7560_v43 = vld [vmem:[#allocation4 + $0x1014] ss:$8 sps:$4 sm:$0xff]  }
 0x117   :  { %5161 = vmatpush1.bf16.msra.mxu1 %v7469_v44  ;;  %v178_v44 = vpack.c.bf16 %v123_v38, %v123_v38  ;;  %v7633_v38 = vld [vmem:[#allocation4 + $0x4e0] ss:$8 sps:$4 sm:$0xff]  }
 0x118   :  { %5653 = vmatpush1.bf16.msra.mxu0 %v7472_v45  ;;  %5162 = vmatprep.subr.bf16.mxu1 %v7477_v46  ;;  %v202_v45 = vpack.c.bf16 %v135_v39, %v135_v39  ;;  %v7555_v46 = vld [vmem:[#allocation4 + $0x410] ss:$8 sps:$4 sm:$0xff]   ;;  %v7636_v39 = vld [vmem:[#allocation4 + $0x10e0] ss:$8 sps:$4 sm:$0xff]  }
 0x119   :  { %5654 = vmatprep.subr.bf16.mxu0 %v7480_v47  ;;  %v7558_v47 = vld [vmem:[#allocation4 + $0x1010] ss:$8 sps:$4 sm:$0xff]  }
 0x11b   :  { %5163 = vmatpush1.bf16.msra.mxu1 %v7475_v48  ;;  %v7561_v48 = vld [vmem:[#allocation4 + $0x420] ss:$8 sps:$4 sm:$0xff]  }
 0x11c   :  { %5655 = vmatpush1.bf16.msra.mxu0 %v7478_v49  ;;  %5164 = vmatprep.subr.bf16.mxu1 %v7483_v50  ;;  %v7564_v49 = vld [vmem:[#allocation4 + $0x1020] ss:$8 sps:$4 sm:$0xff]   ;;  %v7569_v50 = vld [vmem:[#allocation4 + $0x434] ss:$8 sps:$4 sm:$0xff]  }
 0x11d   :  { %5656 = vmatprep.subr.bf16.mxu0 %v7486_v51  ;;  %v7572_v51 = vld [vmem:[#allocation4 + $0x1034] ss:$8 sps:$4 sm:$0xff]  }
 0x11f   :  { %5165 = vmatpush1.bf16.msra.mxu1 %v7481_v52  ;;  %v7567_v52 = vld [vmem:[#allocation4 + $0x430] ss:$8 sps:$4 sm:$0xff]  }
 0x120   :  { %5657 = vmatpush1.bf16.msra.mxu0 %v7484_v53  ;;  %5166 = vmatprep.subr.bf16.mxu1 %v7489_v54  ;;  %v7570_v53 = vld [vmem:[#allocation4 + $0x1030] ss:$8 sps:$4 sm:$0xff]   ;;  %v7575_v54 = vld [vmem:[#allocation4 + $0x444] ss:$8 sps:$4 sm:$0xff]  }
 0x121   :  { %5658 = vmatprep.subr.bf16.mxu0 %v7492_v55  ;;  %v7578_v55 = vld [vmem:[#allocation4 + $0x1044] ss:$8 sps:$4 sm:$0xff]  }
 0x123   :  { %5167 = vmatpush1.bf16.msra.mxu1 %v7487_v56  ;;  %v7573_v56 = vld [vmem:[#allocation4 + $0x440] ss:$8 sps:$4 sm:$0xff]  }
 0x124   :  { %5659 = vmatpush1.bf16.msra.mxu0 %v7490_v57  ;;  %5168 = vmatprep.subr.bf16.mxu1 %v7495_v58  ;;  %v7576_v57 = vld [vmem:[#allocation4 + $0x1040] ss:$8 sps:$4 sm:$0xff]   ;;  %v7581_v58 = vld [vmem:[#allocation4 + $0x454] ss:$8 sps:$4 sm:$0xff]  }
 0x125   :  { %5660 = vmatprep.subr.bf16.mxu0 %v7498_v59  ;;  %v7584_v59 = vld [vmem:[#allocation4 + $0x1054] ss:$8 sps:$4 sm:$0xff]  }
 0x127   :  { %5169 = vmatpush1.bf16.msra.mxu1 %v7493_v60  ;;  %v7579_v60 = vld [vmem:[#allocation4 + $0x450] ss:$8 sps:$4 sm:$0xff]  }
 0x128   :  { %5661 = vmatpush1.bf16.msra.mxu0 %v7496_v61  ;;  %5170 = vmatprep.subr.bf16.mxu1 %v7501_v62  ;;  %v7582_v61 = vld [vmem:[#allocation4 + $0x1050] ss:$8 sps:$4 sm:$0xff]   ;;  %v7587_v62 = vld [vmem:[#allocation4 + $0x464] ss:$8 sps:$4 sm:$0xff]  }
 0x129   :  { %5662 = vmatprep.subr.bf16.mxu0 %v7504_v63  ;;  %v7590_v63 = vld [vmem:[#allocation4 + $0x1064] ss:$8 sps:$4 sm:$0xff]  }
 0x12b   :  { %5171 = vmatpush1.bf16.msra.mxu1 %v7499_v0  ;;  %v7585_v0 = vld [vmem:[#allocation4 + $0x460] ss:$8 sps:$4 sm:$0xff]  }
 0x12c   :  { %5663 = vmatpush1.bf16.msra.mxu0 %v7502_v1  ;;  %5172 = vmatprep.subr.bf16.mxu1 %v7507_v2  ;;  %v7588_v1 = vld [vmem:[#allocation4 + $0x1060] ss:$8 sps:$4 sm:$0xff]   ;;  %v7593_v2 = vld [vmem:[#allocation4 + $0x474] ss:$8 sps:$4 sm:$0xff]  }
 0x12d   :  { %5664 = vmatprep.subr.bf16.mxu0 %v7510_v3  ;;  %v7596_v3 = vld [vmem:[#allocation4 + $0x1074] ss:$8 sps:$4 sm:$0xff]  }
 0x12f   :  { %5173 = vmatpush1.bf16.msra.mxu1 %v7505_v4  ;;  %v7591_v4 = vld [vmem:[#allocation4 + $0x470] ss:$8 sps:$4 sm:$0xff]  }
 0x130   :  { %5665 = vmatpush1.bf16.msra.mxu0 %v7508_v5  ;;  %5174 = vmatprep.subr.bf16.mxu1 %v7513_v6  ;;  %v7594_v5 = vld [vmem:[#allocation4 + $0x1070] ss:$8 sps:$4 sm:$0xff]   ;;  %v7599_v6 = vld [vmem:[#allocation4 + $0x484] ss:$8 sps:$4 sm:$0xff]  }
 0x131   :  { %5666 = vmatprep.subr.bf16.mxu0 %v7516_v7  ;;  %v7602_v7 = vld [vmem:[#allocation4 + $0x1084] ss:$8 sps:$4 sm:$0xff]  }
 0x133   :  { %5175 = vmatpush1.bf16.msra.mxu1 %v7511_v8  ;;  %v7597_v8 = vld [vmem:[#allocation4 + $0x480] ss:$8 sps:$4 sm:$0xff]  }
 0x134   :  { %5667 = vmatpush1.bf16.msra.mxu0 %v7514_v9  ;;  %5176 = vmatprep.subr.bf16.mxu1 %v7519_v10  ;;  %v7600_v9 = vld [vmem:[#allocation4 + $0x1080] ss:$8 sps:$4 sm:$0xff]   ;;  %v7605_v10 = vld [vmem:[#allocation4 + $0x494] ss:$8 sps:$4 sm:$0xff]  }
 0x135   :  { %5668 = vmatprep.subr.bf16.mxu0 %v7522_v11  ;;  %v7608_v11 = vld [vmem:[#allocation4 + $0x1094] ss:$8 sps:$4 sm:$0xff]  }
 0x137   :  { %5177 = vmatpush1.bf16.msra.mxu1 %v7517_v12  ;;  %v7603_v12 = vld [vmem:[#allocation4 + $0x490] ss:$8 sps:$4 sm:$0xff]  }
 0x138   :  { %5669 = vmatpush1.bf16.msra.mxu0 %v7520_v13  ;;  %5178 = vmatprep.subr.bf16.mxu1 %v7525_v14  ;;  %v7606_v13 = vld [vmem:[#allocation4 + $0x1090] ss:$8 sps:$4 sm:$0xff]   ;;  %v7611_v14 = vld [vmem:[#allocation4 + $0x4a4] ss:$8 sps:$4 sm:$0xff]  }
 0x139   :  { %5670 = vmatprep.subr.bf16.mxu0 %v7528_v15  ;;  %v7614_v15 = vld [vmem:[#allocation4 + $0x10a4] ss:$8 sps:$4 sm:$0xff]  }
 0x13b   :  { %5179 = vmatpush1.bf16.msra.mxu1 %v7523_v16  ;;  %v7609_v16 = vld [vmem:[#allocation4 + $0x4a0] ss:$8 sps:$4 sm:$0xff]  }
 0x13c   :  { %5671 = vmatpush1.bf16.msra.mxu0 %v7526_v17  ;;  %5180 = vmatprep.subr.bf16.mxu1 %v7531_v18  ;;  %v7612_v17 = vld [vmem:[#allocation4 + $0x10a0] ss:$8 sps:$4 sm:$0xff]   ;;  %v7617_v18 = vld [vmem:[#allocation4 + $0x4b4] ss:$8 sps:$4 sm:$0xff]  }
 0x13d   :  { %5672 = vmatprep.subr.bf16.mxu0 %v7534_v19  ;;  %v7620_v19 = vld [vmem:[#allocation4 + $0x10b4] ss:$8 sps:$4 sm:$0xff]  }
 0x13f   :  { %5181 = vmatpush1.bf16.msra.mxu1 %v7529_v20  ;;  %v7615_v20 = vld [vmem:[#allocation4 + $0x4b0] ss:$8 sps:$4 sm:$0xff]  }
 0x140   :  { %5673 = vmatpush1.bf16.msra.mxu0 %v7532_v21  ;;  %5182 = vmatprep.subr.bf16.mxu1 %v7537_v26  ;;  %v7618_v21 = vld [vmem:[#allocation4 + $0x10b0] ss:$8 sps:$4 sm:$0xff]   ;;  %v7623_v26 = vld [vmem:[#allocation4 + $0x4c4] ss:$8 sps:$4 sm:$0xff]  }
 0x141   :  { %5674 = vmatprep.subr.bf16.mxu0 %v7540_v27  ;;  %v7626_v27 = vld [vmem:[#allocation4 + $0x10c4] ss:$8 sps:$4 sm:$0xff]  }
 0x143   :  { %5183 = vmatpush1.bf16.msra.mxu1 %v7535_v28  ;;  %v7621_v28 = vld [vmem:[#allocation4 + $0x4c0] ss:$8 sps:$4 sm:$0xff]  }
 0x144   :  { %5675 = vmatpush1.bf16.msra.mxu0 %v7538_v29  ;;  %5184 = vmatprep.subr.bf16.mxu1 %v7543_v30  ;;  %v7624_v29 = vld [vmem:[#allocation4 + $0x10c0] ss:$8 sps:$4 sm:$0xff]   ;;  %v7629_v30 = vld [vmem:[#allocation4 + $0x4d4] ss:$8 sps:$4 sm:$0xff]  }
 0x145   :  { %5676 = vmatprep.subr.bf16.mxu0 %v7546_v31  ;;  %v7632_v31 = vld [vmem:[#allocation4 + $0x10d4] ss:$8 sps:$4 sm:$0xff]  }
 0x147   :  { %5185 = vmatpush1.bf16.msra.mxu1 %v7541_v34  ;;  %v7627_v34 = vld [vmem:[#allocation4 + $0x4d0] ss:$8 sps:$4 sm:$0xff]  }
 0x148   :  { %5677 = vmatpush1.bf16.msra.mxu0 %v7544_v35  ;;  %5195 = vmatprep.subr.bf16.mxu1 %v7550_v36  ;;  %v7630_v35 = vld [vmem:[#allocation4 + $0x10d0] ss:$8 sps:$4 sm:$0xff]   ;;  %v7635_v36 = vld [vmem:[#allocation4 + $0x4e4] ss:$8 sps:$4 sm:$0xff]  }
 0x149   :  { %5687 = vmatprep.subr.bf16.mxu0 %v7554_v37  ;;  %v7638_v37 = vld [vmem:[#allocation4 + $0x10e4] ss:$8 sps:$4 sm:$0xff]  }
 0x14a   :  { %5187 = vmatmul.mubr.bf16.vlgmr.msra.gmra.mrb[0].mxu1 %v175_v22  ;;  %v7641_v22 = vld [vmem:[#allocation4 + $0x4f4] ss:$8 sps:$4 sm:$0xff]  }
 0x14b   :  { %5679 = vmatmul.mubr.bf16.vlgmr.msra.gmra.mrb[0].mxu0 %v199_v40  ;;  %5196 = vmatpush1.bf16.msra.mxu1 %v7548_v24  ;;  %v7644_v40 = vld [vmem:[#allocation4 + $0x10f4] ss:$8 sps:$4 sm:$0xff]   ;;  %v8608_v24 = vld [vmem:[#allocation2 + $0x28] sm:$0xff] }
 0x14c   :  { %5688 = vmatpush1.bf16.msra.mxu0 %v7552_v41  ;;  %5197 = vmatprep.subr.bf16.mxu1 %v7557_v42  ;;  %v8610_v41 = vld [vmem:[#allocation2 + $0x88] sm:$0xff]  ;;  %v7639_v42 = vld [vmem:[#allocation4 + $0x4f0] ss:$8 sps:$4 sm:$0xff]  }
 0x14d   :  { %5689 = vmatprep.subr.bf16.mxu0 %v7560_v43  ;;  %5227 = vmatprep.mubr.bf16.mxu1 %v178_v44  ;;  %v7642_v43 = vld [vmem:[#allocation4 + $0x10f0] ss:$8 sps:$4 sm:$0xff]   ;;  %v7648_v44 = vld [vmem:[#allocation4 + $0x504] ss:$8 sps:$4 sm:$0xff]  }
 0x14e   :  { %5719 = vmatprep.mubr.bf16.mxu0 %v202_v45  ;;  %v7652_v45 = vld [vmem:[#allocation4 + $0x1104] ss:$8 sps:$4 sm:$0xff]  }
 0x14f   :  { %5198 = vmatpush1.bf16.msra.mxu1 %v7555_v46  ;;  %v124_v46 = vcombine.high %v8608_v24, %v8608_v24 }
 0x150   :  { %5690 = vmatpush1.bf16.msra.mxu0 %v7558_v47  ;;  %5199 = vmatprep.subr.bf16.mxu1 %v7563_v23  ;;  %v136_v47 = vcombine.high %v8610_v41, %v8610_v41  ;;  %v177_v23 = vpack.c.bf16 %v8596_v32, %v8596_v32  ;;  %v7661_v32 = vld [vmem:[#allocation4 + $0x524] ss:$8 sps:$4 sm:$0xff]  }
 0x151   :  { %5691 = vmatprep.subr.bf16.mxu0 %v7566_v25  ;;  %v201_v25 = vpack.c.bf16 %v8598_v33, %v8598_v33  ;;  %v7664_v33 = vld [vmem:[#allocation4 + $0x1124] ss:$8 sps:$4 sm:$0xff]  }
 0x153   :  { %5200 = vmatpush1.bf16.msra.mxu1 %v7561_v48  ;;  %v7646_v48 = vld [vmem:[#allocation4 + $0x500] ss:$8 sps:$4 sm:$0xff]  }
 0x154   :  { %5692 = vmatpush1.bf16.msra.mxu0 %v7564_v49  ;;  %5201 = vmatprep.subr.bf16.mxu1 %v7569_v50  ;;  %v7650_v49 = vld [vmem:[#allocation4 + $0x1100] ss:$8 sps:$4 sm:$0xff]   ;;  %v7655_v50 = vld [vmem:[#allocation4 + $0x514] ss:$8 sps:$4 sm:$0xff]  }
 0x155   :  { %5693 = vmatprep.subr.bf16.mxu0 %v7572_v51  ;;  %v7658_v51 = vld [vmem:[#allocation4 + $0x1114] ss:$8 sps:$4 sm:$0xff]  }
 0x157   :  { %5202 = vmatpush1.bf16.msra.mxu1 %v7567_v52  ;;  %v180_v52 = vpack.c.bf16 %v124_v46, %v124_v46  ;;  %v7731_v46 = vld [vmem:[#allocation4 + $0x5e0] ss:$8 sps:$4 sm:$0xff]  }
 0x158   :  { %5694 = vmatpush1.bf16.msra.mxu0 %v7570_v53  ;;  %5203 = vmatprep.subr.bf16.mxu1 %v7575_v54  ;;  %v204_v53 = vpack.c.bf16 %v136_v47, %v136_v47  ;;  %v7653_v54 = vld [vmem:[#allocation4 + $0x510] ss:$8 sps:$4 sm:$0xff]   ;;  %v7734_v47 = vld [vmem:[#allocation4 + $0x11e0] ss:$8 sps:$4 sm:$0xff]  }
 0x159   :  { %5695 = vmatprep.subr.bf16.mxu0 %v7578_v55  ;;  %v7656_v55 = vld [vmem:[#allocation4 + $0x1110] ss:$8 sps:$4 sm:$0xff]  }
 0x15b   :  { %5204 = vmatpush1.bf16.msra.mxu1 %v7573_v56  ;;  %v7659_v56 = vld [vmem:[#allocation4 + $0x520] ss:$8 sps:$4 sm:$0xff]  }
 0x15c   :  { %5696 = vmatpush1.bf16.msra.mxu0 %v7576_v57  ;;  %5205 = vmatprep.subr.bf16.mxu1 %v7581_v58  ;;  %v7662_v57 = vld [vmem:[#allocation4 + $0x1120] ss:$8 sps:$4 sm:$0xff]   ;;  %v7667_v58 = vld [vmem:[#allocation4 + $0x534] ss:$8 sps:$4 sm:$0xff]  }
 0x15d   :  { %5697 = vmatprep.subr.bf16.mxu0 %v7584_v59  ;;  %v7670_v59 = vld [vmem:[#allocation4 + $0x1134] ss:$8 sps:$4 sm:$0xff]  }
 0x15f   :  { %5206 = vmatpush1.bf16.msra.mxu1 %v7579_v60  ;;  %v7665_v60 = vld [vmem:[#allocation4 + $0x530] ss:$8 sps:$4 sm:$0xff]  }
 0x160   :  { %5698 = vmatpush1.bf16.msra.mxu0 %v7582_v61  ;;  %5207 = vmatprep.subr.bf16.mxu1 %v7587_v62  ;;  %v7668_v61 = vld [vmem:[#allocation4 + $0x1130] ss:$8 sps:$4 sm:$0xff]   ;;  %v7673_v62 = vld [vmem:[#allocation4 + $0x544] ss:$8 sps:$4 sm:$0xff]  }
 0x161   :  { %5699 = vmatprep.subr.bf16.mxu0 %v7590_v63  ;;  %v7676_v63 = vld [vmem:[#allocation4 + $0x1144] ss:$8 sps:$4 sm:$0xff]  }
 0x163   :  { %5208 = vmatpush1.bf16.msra.mxu1 %v7585_v0  ;;  %v7671_v0 = vld [vmem:[#allocation4 + $0x540] ss:$8 sps:$4 sm:$0xff]  }
 0x164   :  { %5700 = vmatpush1.bf16.msra.mxu0 %v7588_v1  ;;  %5209 = vmatprep.subr.bf16.mxu1 %v7593_v2  ;;  %v7674_v1 = vld [vmem:[#allocation4 + $0x1140] ss:$8 sps:$4 sm:$0xff]   ;;  %v7679_v2 = vld [vmem:[#allocation4 + $0x554] ss:$8 sps:$4 sm:$0xff]  }
 0x165   :  { %5701 = vmatprep.subr.bf16.mxu0 %v7596_v3  ;;  %v7682_v3 = vld [vmem:[#allocation4 + $0x1154] ss:$8 sps:$4 sm:$0xff]  }
 0x167   :  { %5210 = vmatpush1.bf16.msra.mxu1 %v7591_v4  ;;  %v7677_v4 = vld [vmem:[#allocation4 + $0x550] ss:$8 sps:$4 sm:$0xff]  }
 0x168   :  { %5702 = vmatpush1.bf16.msra.mxu0 %v7594_v5  ;;  %5211 = vmatprep.subr.bf16.mxu1 %v7599_v6  ;;  %v7680_v5 = vld [vmem:[#allocation4 + $0x1150] ss:$8 sps:$4 sm:$0xff]   ;;  %v7685_v6 = vld [vmem:[#allocation4 + $0x564] ss:$8 sps:$4 sm:$0xff]  }
 0x169   :  { %5703 = vmatprep.subr.bf16.mxu0 %v7602_v7  ;;  %v7688_v7 = vld [vmem:[#allocation4 + $0x1164] ss:$8 sps:$4 sm:$0xff]  }
 0x16b   :  { %5212 = vmatpush1.bf16.msra.mxu1 %v7597_v8  ;;  %v7683_v8 = vld [vmem:[#allocation4 + $0x560] ss:$8 sps:$4 sm:$0xff]  }
 0x16c   :  { %5704 = vmatpush1.bf16.msra.mxu0 %v7600_v9  ;;  %5213 = vmatprep.subr.bf16.mxu1 %v7605_v10  ;;  %v7686_v9 = vld [vmem:[#allocation4 + $0x1160] ss:$8 sps:$4 sm:$0xff]   ;;  %v7691_v10 = vld [vmem:[#allocation4 + $0x574] ss:$8 sps:$4 sm:$0xff]  }
 0x16d   :  { %5705 = vmatprep.subr.bf16.mxu0 %v7608_v11  ;;  %v7694_v11 = vld [vmem:[#allocation4 + $0x1174] ss:$8 sps:$4 sm:$0xff]  }
 0x16f   :  { %5214 = vmatpush1.bf16.msra.mxu1 %v7603_v12  ;;  %v7689_v12 = vld [vmem:[#allocation4 + $0x570] ss:$8 sps:$4 sm:$0xff]  }
 0x170   :  { %5706 = vmatpush1.bf16.msra.mxu0 %v7606_v13  ;;  %5215 = vmatprep.subr.bf16.mxu1 %v7611_v14  ;;  %v7692_v13 = vld [vmem:[#allocation4 + $0x1170] ss:$8 sps:$4 sm:$0xff]   ;;  %v7697_v14 = vld [vmem:[#allocation4 + $0x584] ss:$8 sps:$4 sm:$0xff]  }
 0x171   :  { %5707 = vmatprep.subr.bf16.mxu0 %v7614_v15  ;;  %v7700_v15 = vld [vmem:[#allocation4 + $0x1184] ss:$8 sps:$4 sm:$0xff]  }
 0x173   :  { %5216 = vmatpush1.bf16.msra.mxu1 %v7609_v16  ;;  %v7695_v16 = vld [vmem:[#allocation4 + $0x580] ss:$8 sps:$4 sm:$0xff]  }
 0x174   :  { %5708 = vmatpush1.bf16.msra.mxu0 %v7612_v17  ;;  %5217 = vmatprep.subr.bf16.mxu1 %v7617_v18  ;;  %v7698_v17 = vld [vmem:[#allocation4 + $0x1180] ss:$8 sps:$4 sm:$0xff]   ;;  %v7703_v18 = vld [vmem:[#allocation4 + $0x594] ss:$8 sps:$4 sm:$0xff]  }
 0x175   :  { %5709 = vmatprep.subr.bf16.mxu0 %v7620_v19  ;;  %v7706_v19 = vld [vmem:[#allocation4 + $0x1194] ss:$8 sps:$4 sm:$0xff]  }
 0x177   :  { %5218 = vmatpush1.bf16.msra.mxu1 %v7615_v20  ;;  %v7701_v20 = vld [vmem:[#allocation4 + $0x590] ss:$8 sps:$4 sm:$0xff]  }
 0x178   :  { %5710 = vmatpush1.bf16.msra.mxu0 %v7618_v21  ;;  %5219 = vmatprep.subr.bf16.mxu1 %v7623_v26  ;;  %v7704_v21 = vld [vmem:[#allocation4 + $0x1190] ss:$8 sps:$4 sm:$0xff]   ;;  %v7709_v26 = vld [vmem:[#allocation4 + $0x5a4] ss:$8 sps:$4 sm:$0xff]  }
 0x179   :  { %5711 = vmatprep.subr.bf16.mxu0 %v7626_v27  ;;  %v7712_v27 = vld [vmem:[#allocation4 + $0x11a4] ss:$8 sps:$4 sm:$0xff]  }
 0x17b   :  { %5220 = vmatpush1.bf16.msra.mxu1 %v7621_v28  ;;  %v7707_v28 = vld [vmem:[#allocation4 + $0x5a0] ss:$8 sps:$4 sm:$0xff]  }
 0x17c   :  { %5712 = vmatpush1.bf16.msra.mxu0 %v7624_v29  ;;  %5221 = vmatprep.subr.bf16.mxu1 %v7629_v30  ;;  %v7710_v29 = vld [vmem:[#allocation4 + $0x11a0] ss:$8 sps:$4 sm:$0xff]   ;;  %v7715_v30 = vld [vmem:[#allocation4 + $0x5b4] ss:$8 sps:$4 sm:$0xff]  }
 0x17d   :  { %5713 = vmatprep.subr.bf16.mxu0 %v7632_v31  ;;  %v7718_v31 = vld [vmem:[#allocation4 + $0x11b4] ss:$8 sps:$4 sm:$0xff]  }
 0x17f   :  { %5222 = vmatpush1.bf16.msra.mxu1 %v7627_v34  ;;  %v7713_v34 = vld [vmem:[#allocation4 + $0x5b0] ss:$8 sps:$4 sm:$0xff]  }
 0x180   :  { %5714 = vmatpush1.bf16.msra.mxu0 %v7630_v35  ;;  %5223 = vmatprep.subr.bf16.mxu1 %v7635_v36  ;;  %v7716_v35 = vld [vmem:[#allocation4 + $0x11b0] ss:$8 sps:$4 sm:$0xff]   ;;  %v7721_v36 = vld [vmem:[#allocation4 + $0x5c4] ss:$8 sps:$4 sm:$0xff]  }
 0x181   :  { %5715 = vmatprep.subr.bf16.mxu0 %v7638_v37  ;;  %v7724_v37 = vld [vmem:[#allocation4 + $0x11c4] ss:$8 sps:$4 sm:$0xff]  }
 0x183   :  { %5224 = vmatpush1.bf16.msra.mxu1 %v7633_v38  ;;  %v7719_v38 = vld [vmem:[#allocation4 + $0x5c0] ss:$8 sps:$4 sm:$0xff]  }
 0x184   :  { %5716 = vmatpush1.bf16.msra.mxu0 %v7636_v39  ;;  %5225 = vmatprep.subr.bf16.mxu1 %v7641_v22  ;;  %v7722_v39 = vld [vmem:[#allocation4 + $0x11c0] ss:$8 sps:$4 sm:$0xff]   ;;  %v7727_v22 = vld [vmem:[#allocation4 + $0x5d4] ss:$8 sps:$4 sm:$0xff]  }
 0x185   :  { %5717 = vmatprep.subr.bf16.mxu0 %v7644_v40  ;;  %v7730_v40 = vld [vmem:[#allocation4 + $0x11d4] ss:$8 sps:$4 sm:$0xff]  }
 0x187   :  { %5226 = vmatpush1.bf16.msra.mxu1 %v7639_v42  ;;  %v7725_v42 = vld [vmem:[#allocation4 + $0x5d0] ss:$8 sps:$4 sm:$0xff]  }
 0x188   :  { %5718 = vmatpush1.bf16.msra.mxu0 %v7642_v43  ;;  %5236 = vmatprep.subr.bf16.mxu1 %v7648_v44  ;;  %v7728_v43 = vld [vmem:[#allocation4 + $0x11d0] ss:$8 sps:$4 sm:$0xff]   ;;  %v7733_v44 = vld [vmem:[#allocation4 + $0x5e4] ss:$8 sps:$4 sm:$0xff]  }
 0x189   :  { %5728 = vmatprep.subr.bf16.mxu0 %v7652_v45  ;;  %v7736_v45 = vld [vmem:[#allocation4 + $0x11e4] ss:$8 sps:$4 sm:$0xff]  }
 0x18a   :  { %5228 = vmatmul.mubr.bf16.vlgmr.msra.gmra.mrb[0].mxu1 %v177_v23  ;;  %v7739_v23 = vld [vmem:[#allocation4 + $0x5f4] ss:$8 sps:$4 sm:$0xff]  }
 0x18b   :  { %5720 = vmatmul.mubr.bf16.vlgmr.msra.gmra.mrb[0].mxu0 %v201_v25  ;;  %5237 = vmatpush1.bf16.msra.mxu1 %v7646_v48  ;;  %v7742_v25 = vld [vmem:[#allocation4 + $0x11f4] ss:$8 sps:$4 sm:$0xff]   ;;  %v8620_v48 = vld [vmem:[#allocation2 + $0x30] sm:$0xff] }
 0x18c   :  { %5729 = vmatpush1.bf16.msra.mxu0 %v7650_v49  ;;  %5238 = vmatprep.subr.bf16.mxu1 %v7655_v50  ;;  %v8622_v49 = vld [vmem:[#allocation2 + $0x90] sm:$0xff]  ;;  %v7737_v50 = vld [vmem:[#allocation4 + $0x5f0] ss:$8 sps:$4 sm:$0xff]  }
 0x18d   :  { %5730 = vmatprep.subr.bf16.mxu0 %v7658_v51  ;;  %5268 = vmatprep.mubr.bf16.mxu1 %v180_v52  ;;  %v7740_v51 = vld [vmem:[#allocation4 + $0x11f0] ss:$8 sps:$4 sm:$0xff]   ;;  %v7746_v52 = vld [vmem:[#allocation4 + $0x604] ss:$8 sps:$4 sm:$0xff]  }
 0x18e   :  { %5760 = vmatprep.mubr.bf16.mxu0 %v204_v53  ;;  %v7750_v53 = vld [vmem:[#allocation4 + $0x1204] ss:$8 sps:$4 sm:$0xff]  }
 0x18f   :  { %5239 = vmatpush1.bf16.msra.mxu1 %v7653_v54  ;;  %v125_v54 = vcombine.high %v8620_v48, %v8620_v48 }
 0x190   :  { %5731 = vmatpush1.bf16.msra.mxu0 %v7656_v55  ;;  %5240 = vmatprep.subr.bf16.mxu1 %v7661_v32  ;;  %v137_v55 = vcombine.high %v8622_v49, %v8622_v49  ;;  %v179_v32 = vpack.c.bf16 %v8608_v24, %v8608_v24  ;;  %v7759_v24 = vld [vmem:[#allocation4 + $0x624] ss:$8 sps:$4 sm:$0xff]  }
 0x191   :  { %5732 = vmatprep.subr.bf16.mxu0 %v7664_v33  ;;  %v203_v33 = vpack.c.bf16 %v8610_v41, %v8610_v41  ;;  %v7762_v41 = vld [vmem:[#allocation4 + $0x1224] ss:$8 sps:$4 sm:$0xff]  }
 0x193   :  { %5241 = vmatpush1.bf16.msra.mxu1 %v7659_v56  ;;  %v7744_v56 = vld [vmem:[#allocation4 + $0x600] ss:$8 sps:$4 sm:$0xff]  }
 0x194   :  { %5733 = vmatpush1.bf16.msra.mxu0 %v7662_v57  ;;  %5242 = vmatprep.subr.bf16.mxu1 %v7667_v58  ;;  %v7748_v57 = vld [vmem:[#allocation4 + $0x1200] ss:$8 sps:$4 sm:$0xff]   ;;  %v7753_v58 = vld [vmem:[#allocation4 + $0x614] ss:$8 sps:$4 sm:$0xff]  }
 0x195   :  { %5734 = vmatprep.subr.bf16.mxu0 %v7670_v59  ;;  %v7756_v59 = vld [vmem:[#allocation4 + $0x1214] ss:$8 sps:$4 sm:$0xff]  }
 0x197   :  { %5243 = vmatpush1.bf16.msra.mxu1 %v7665_v60  ;;  %v182_v60 = vpack.c.bf16 %v125_v54, %v125_v54  ;;  %v7829_v54 = vld [vmem:[#allocation4 + $0x6e0] ss:$8 sps:$4 sm:$0xff]  }
 0x198   :  { %5735 = vmatpush1.bf16.msra.mxu0 %v7668_v61  ;;  %5244 = vmatprep.subr.bf16.mxu1 %v7673_v62  ;;  %v206_v61 = vpack.c.bf16 %v137_v55, %v137_v55  ;;  %v7751_v62 = vld [vmem:[#allocation4 + $0x610] ss:$8 sps:$4 sm:$0xff]   ;;  %v7832_v55 = vld [vmem:[#allocation4 + $0x12e0] ss:$8 sps:$4 sm:$0xff]  }
 0x199   :  { %5736 = vmatprep.subr.bf16.mxu0 %v7676_v63  ;;  %v7754_v63 = vld [vmem:[#allocation4 + $0x1210] ss:$8 sps:$4 sm:$0xff]  }
 0x19b   :  { %5245 = vmatpush1.bf16.msra.mxu1 %v7671_v0  ;;  %v7757_v0 = vld [vmem:[#allocation4 + $0x620] ss:$8 sps:$4 sm:$0xff]  }
 0x19c   :  { %5737 = vmatpush1.bf16.msra.mxu0 %v7674_v1  ;;  %5246 = vmatprep.subr.bf16.mxu1 %v7679_v2  ;;  %v7760_v1 = vld [vmem:[#allocation4 + $0x1220] ss:$8 sps:$4 sm:$0xff]   ;;  %v7765_v2 = vld [vmem:[#allocation4 + $0x634] ss:$8 sps:$4 sm:$0xff]  }
 0x19d   :  { %5738 = vmatprep.subr.bf16.mxu0 %v7682_v3  ;;  %v7768_v3 = vld [vmem:[#allocation4 + $0x1234] ss:$8 sps:$4 sm:$0xff]  }
 0x19f   :  { %5247 = vmatpush1.bf16.msra.mxu1 %v7677_v4  ;;  %v7763_v4 = vld [vmem:[#allocation4 + $0x630] ss:$8 sps:$4 sm:$0xff]  }
 0x1a0   :  { %5739 = vmatpush1.bf16.msra.mxu0 %v7680_v5  ;;  %5248 = vmatprep.subr.bf16.mxu1 %v7685_v6  ;;  %v7766_v5 = vld [vmem:[#allocation4 + $0x1230] ss:$8 sps:$4 sm:$0xff]   ;;  %v7771_v6 = vld [vmem:[#allocation4 + $0x644] ss:$8 sps:$4 sm:$0xff]  }
 0x1a1   :  { %5740 = vmatprep.subr.bf16.mxu0 %v7688_v7  ;;  %v7774_v7 = vld [vmem:[#allocation4 + $0x1244] ss:$8 sps:$4 sm:$0xff]  }
 0x1a3   :  { %5249 = vmatpush1.bf16.msra.mxu1 %v7683_v8  ;;  %v7769_v8 = vld [vmem:[#allocation4 + $0x640] ss:$8 sps:$4 sm:$0xff]  }
 0x1a4   :  { %5741 = vmatpush1.bf16.msra.mxu0 %v7686_v9  ;;  %5250 = vmatprep.subr.bf16.mxu1 %v7691_v10  ;;  %v7772_v9 = vld [vmem:[#allocation4 + $0x1240] ss:$8 sps:$4 sm:$0xff]   ;;  %v7777_v10 = vld [vmem:[#allocation4 + $0x654] ss:$8 sps:$4 sm:$0xff]  }
 0x1a5   :  { %5742 = vmatprep.subr.bf16.mxu0 %v7694_v11  ;;  %v7780_v11 = vld [vmem:[#allocation4 + $0x1254] ss:$8 sps:$4 sm:$0xff]  }
 0x1a7   :  { %5251 = vmatpush1.bf16.msra.mxu1 %v7689_v12  ;;  %v7775_v12 = vld [vmem:[#allocation4 + $0x650] ss:$8 sps:$4 sm:$0xff]  }
 0x1a8   :  { %5743 = vmatpush1.bf16.msra.mxu0 %v7692_v13  ;;  %5252 = vmatprep.subr.bf16.mxu1 %v7697_v14  ;;  %v7778_v13 = vld [vmem:[#allocation4 + $0x1250] ss:$8 sps:$4 sm:$0xff]   ;;  %v7783_v14 = vld [vmem:[#allocation4 + $0x664] ss:$8 sps:$4 sm:$0xff]  }
 0x1a9   :  { %5744 = vmatprep.subr.bf16.mxu0 %v7700_v15  ;;  %v7786_v15 = vld [vmem:[#allocation4 + $0x1264] ss:$8 sps:$4 sm:$0xff]  }
 0x1ab   :  { %5253 = vmatpush1.bf16.msra.mxu1 %v7695_v16  ;;  %v7781_v16 = vld [vmem:[#allocation4 + $0x660] ss:$8 sps:$4 sm:$0xff]  }
 0x1ac   :  { %5745 = vmatpush1.bf16.msra.mxu0 %v7698_v17  ;;  %5254 = vmatprep.subr.bf16.mxu1 %v7703_v18  ;;  %v7784_v17 = vld [vmem:[#allocation4 + $0x1260] ss:$8 sps:$4 sm:$0xff]   ;;  %v7789_v18 = vld [vmem:[#allocation4 + $0x674] ss:$8 sps:$4 sm:$0xff]  }
 0x1ad   :  { %5746 = vmatprep.subr.bf16.mxu0 %v7706_v19  ;;  %v7792_v19 = vld [vmem:[#allocation4 + $0x1274] ss:$8 sps:$4 sm:$0xff]  }
 0x1af   :  { %5255 = vmatpush1.bf16.msra.mxu1 %v7701_v20  ;;  %v7787_v20 = vld [vmem:[#allocation4 + $0x670] ss:$8 sps:$4 sm:$0xff]  }
 0x1b0   :  { %5747 = vmatpush1.bf16.msra.mxu0 %v7704_v21  ;;  %5256 = vmatprep.subr.bf16.mxu1 %v7709_v26  ;;  %v7790_v21 = vld [vmem:[#allocation4 + $0x1270] ss:$8 sps:$4 sm:$0xff]   ;;  %v7795_v26 = vld [vmem:[#allocation4 + $0x684] ss:$8 sps:$4 sm:$0xff]  }
 0x1b1   :  { %5748 = vmatprep.subr.bf16.mxu0 %v7712_v27  ;;  %v7798_v27 = vld [vmem:[#allocation4 + $0x1284] ss:$8 sps:$4 sm:$0xff]  }
 0x1b3   :  { %5257 = vmatpush1.bf16.msra.mxu1 %v7707_v28  ;;  %v7793_v28 = vld [vmem:[#allocation4 + $0x680] ss:$8 sps:$4 sm:$0xff]  }
 0x1b4   :  { %5749 = vmatpush1.bf16.msra.mxu0 %v7710_v29  ;;  %5258 = vmatprep.subr.bf16.mxu1 %v7715_v30  ;;  %v7796_v29 = vld [vmem:[#allocation4 + $0x1280] ss:$8 sps:$4 sm:$0xff]   ;;  %v7801_v30 = vld [vmem:[#allocation4 + $0x694] ss:$8 sps:$4 sm:$0xff]  }
 0x1b5   :  { %5750 = vmatprep.subr.bf16.mxu0 %v7718_v31  ;;  %v7804_v31 = vld [vmem:[#allocation4 + $0x1294] ss:$8 sps:$4 sm:$0xff]  }
 0x1b7   :  { %5259 = vmatpush1.bf16.msra.mxu1 %v7713_v34  ;;  %v7799_v34 = vld [vmem:[#allocation4 + $0x690] ss:$8 sps:$4 sm:$0xff]  }
 0x1b8   :  { %5751 = vmatpush1.bf16.msra.mxu0 %v7716_v35  ;;  %5260 = vmatprep.subr.bf16.mxu1 %v7721_v36  ;;  %v7802_v35 = vld [vmem:[#allocation4 + $0x1290] ss:$8 sps:$4 sm:$0xff]   ;;  %v7807_v36 = vld [vmem:[#allocation4 + $0x6a4] ss:$8 sps:$4 sm:$0xff]  }
 0x1b9   :  { %5752 = vmatprep.subr.bf16.mxu0 %v7724_v37  ;;  %v7810_v37 = vld [vmem:[#allocation4 + $0x12a4] ss:$8 sps:$4 sm:$0xff]  }
 0x1bb   :  { %5261 = vmatpush1.bf16.msra.mxu1 %v7719_v38  ;;  %v7805_v38 = vld [vmem:[#allocation4 + $0x6a0] ss:$8 sps:$4 sm:$0xff]  }
 0x1bc   :  { %5753 = vmatpush1.bf16.msra.mxu0 %v7722_v39  ;;  %5262 = vmatprep.subr.bf16.mxu1 %v7727_v22  ;;  %v7808_v39 = vld [vmem:[#allocation4 + $0x12a0] ss:$8 sps:$4 sm:$0xff]   ;;  %v7813_v22 = vld [vmem:[#allocation4 + $0x6b4] ss:$8 sps:$4 sm:$0xff]  }
 0x1bd   :  { %5754 = vmatprep.subr.bf16.mxu0 %v7730_v40  ;;  %v7816_v40 = vld [vmem:[#allocation4 + $0x12b4] ss:$8 sps:$4 sm:$0xff]  }
 0x1bf   :  { %5263 = vmatpush1.bf16.msra.mxu1 %v7725_v42  ;;  %v7811_v42 = vld [vmem:[#allocation4 + $0x6b0] ss:$8 sps:$4 sm:$0xff]  }
 0x1c0   :  { %5755 = vmatpush1.bf16.msra.mxu0 %v7728_v43  ;;  %5264 = vmatprep.subr.bf16.mxu1 %v7733_v44  ;;  %v7814_v43 = vld [vmem:[#allocation4 + $0x12b0] ss:$8 sps:$4 sm:$0xff]   ;;  %v7819_v44 = vld [vmem:[#allocation4 + $0x6c4] ss:$8 sps:$4 sm:$0xff]  }
 0x1c1   :  { %5756 = vmatprep.subr.bf16.mxu0 %v7736_v45  ;;  %v7822_v45 = vld [vmem:[#allocation4 + $0x12c4] ss:$8 sps:$4 sm:$0xff]  }
 0x1c3   :  { %5265 = vmatpush1.bf16.msra.mxu1 %v7731_v46  ;;  %v7817_v46 = vld [vmem:[#allocation4 + $0x6c0] ss:$8 sps:$4 sm:$0xff]  }
 0x1c4   :  { %5757 = vmatpush1.bf16.msra.mxu0 %v7734_v47  ;;  %5266 = vmatprep.subr.bf16.mxu1 %v7739_v23  ;;  %v7820_v47 = vld [vmem:[#allocation4 + $0x12c0] ss:$8 sps:$4 sm:$0xff]   ;;  %v7825_v23 = vld [vmem:[#allocation4 + $0x6d4] ss:$8 sps:$4 sm:$0xff]  }
 0x1c5   :  { %5758 = vmatprep.subr.bf16.mxu0 %v7742_v25  ;;  %v7828_v25 = vld [vmem:[#allocation4 + $0x12d4] ss:$8 sps:$4 sm:$0xff]  }
 0x1c7   :  { %5267 = vmatpush1.bf16.msra.mxu1 %v7737_v50  ;;  %v7823_v50 = vld [vmem:[#allocation4 + $0x6d0] ss:$8 sps:$4 sm:$0xff]  }
 0x1c8   :  { %5759 = vmatpush1.bf16.msra.mxu0 %v7740_v51  ;;  %5277 = vmatprep.subr.bf16.mxu1 %v7746_v52  ;;  %v7826_v51 = vld [vmem:[#allocation4 + $0x12d0] ss:$8 sps:$4 sm:$0xff]   ;;  %v7831_v52 = vld [vmem:[#allocation4 + $0x6e4] ss:$8 sps:$4 sm:$0xff]  }
 0x1c9   :  { %5769 = vmatprep.subr.bf16.mxu0 %v7750_v53  ;;  %v7834_v53 = vld [vmem:[#allocation4 + $0x12e4] ss:$8 sps:$4 sm:$0xff]  }
 0x1ca   :  { %5269 = vmatmul.mubr.bf16.vlgmr.msra.gmra.mrb[0].mxu1 %v179_v32  ;;  %v7837_v32 = vld [vmem:[#allocation4 + $0x6f4] ss:$8 sps:$4 sm:$0xff]  }
 0x1cb   :  { %5761 = vmatmul.mubr.bf16.vlgmr.msra.gmra.mrb[0].mxu0 %v203_v33  ;;  %5278 = vmatpush1.bf16.msra.mxu1 %v7744_v56  ;;  %v7840_v33 = vld [vmem:[#allocation4 + $0x12f4] ss:$8 sps:$4 sm:$0xff]  }
 0x1cc   :  { %5770 = vmatpush1.bf16.msra.mxu0 %v7748_v57  ;;  %5279 = vmatprep.subr.bf16.mxu1 %v7753_v58  ;;  %v8632_v56 = vld [vmem:[#allocation2 + $0x38] sm:$0xff] }
 0x1cd   :  { %5771 = vmatprep.subr.bf16.mxu0 %v7756_v59  ;;  %5309 = vmatprep.mubr.bf16.mxu1 %v182_v60  ;;  %v8634_v57 = vld [vmem:[#allocation2 + $0x98] sm:$0xff]  ;;  %v7844_v60 = vld [vmem:[#allocation4 + $0x704] ss:$8 sps:$4 sm:$0xff]  }
 0x1ce   :  { %5801 = vmatprep.mubr.bf16.mxu0 %v206_v61  ;;  %v7835_v58 = vld [vmem:[#allocation4 + $0x6f0] ss:$8 sps:$4 sm:$0xff]   ;;  %v7848_v61 = vld [vmem:[#allocation4 + $0x1304] ss:$8 sps:$4 sm:$0xff]  }
 0x1cf   :  { %5280 = vmatpush1.bf16.msra.mxu1 %v7751_v62  ;;  %v7838_v59 = vld [vmem:[#allocation4 + $0x12f0] ss:$8 sps:$4 sm:$0xff]   ;;  %v126_v62 = vcombine.high %v8632_v56, %v8632_v56 }
 0x1d0   :  { %5772 = vmatpush1.bf16.msra.mxu0 %v7754_v63  ;;  %5281 = vmatprep.subr.bf16.mxu1 %v7759_v24  ;;  %v138_v63 = vcombine.high %v8634_v57, %v8634_v57  ;;  %v181_v24 = vpack.c.bf16 %v8620_v48, %v8620_v48  ;;  %v7857_v48 = vld [vmem:[#allocation4 + $0x724] ss:$8 sps:$4 sm:$0xff]  }
 0x1d1   :  { %5773 = vmatprep.subr.bf16.mxu0 %v7762_v41  ;;  %v205_v41 = vpack.c.bf16 %v8622_v49, %v8622_v49  ;;  %v7860_v49 = vld [vmem:[#allocation4 + $0x1324] ss:$8 sps:$4 sm:$0xff]  }
 0x1d3   :  { %5282 = vmatpush1.bf16.msra.mxu1 %v7757_v0  ;;  %v7842_v0 = vld [vmem:[#allocation4 + $0x700] ss:$8 sps:$4 sm:$0xff]  }
 0x1d4   :  { %5774 = vmatpush1.bf16.msra.mxu0 %v7760_v1  ;;  %5283 = vmatprep.subr.bf16.mxu1 %v7765_v2  ;;  %v7846_v1 = vld [vmem:[#allocation4 + $0x1300] ss:$8 sps:$4 sm:$0xff]   ;;  %v7851_v2 = vld [vmem:[#allocation4 + $0x714] ss:$8 sps:$4 sm:$0xff]  }
 0x1d5   :  { %5775 = vmatprep.subr.bf16.mxu0 %v7768_v3  ;;  %v7854_v3 = vld [vmem:[#allocation4 + $0x1314] ss:$8 sps:$4 sm:$0xff]  }
 0x1d7   :  { %5284 = vmatpush1.bf16.msra.mxu1 %v7763_v4  ;;  %v184_v4 = vpack.c.bf16 %v126_v62, %v126_v62  ;;  %v7927_v62 = vld [vmem:[#allocation4 + $0x7e0] ss:$8 sps:$4 sm:$0xff]  }
 0x1d8   :  { %5776 = vmatpush1.bf16.msra.mxu0 %v7766_v5  ;;  %5285 = vmatprep.subr.bf16.mxu1 %v7771_v6  ;;  %v208_v5 = vpack.c.bf16 %v138_v63, %v138_v63  ;;  %v7849_v6 = vld [vmem:[#allocation4 + $0x710] ss:$8 sps:$4 sm:$0xff]   ;;  %v7930_v63 = vld [vmem:[#allocation4 + $0x13e0] ss:$8 sps:$4 sm:$0xff]  }
 0x1d9   :  { %5777 = vmatprep.subr.bf16.mxu0 %v7774_v7  ;;  %v7852_v7 = vld [vmem:[#allocation4 + $0x1310] ss:$8 sps:$4 sm:$0xff]  }
 0x1db   :  { %5286 = vmatpush1.bf16.msra.mxu1 %v7769_v8  ;;  %v7855_v8 = vld [vmem:[#allocation4 + $0x720] ss:$8 sps:$4 sm:$0xff]  }
 0x1dc   :  { %5778 = vmatpush1.bf16.msra.mxu0 %v7772_v9  ;;  %5287 = vmatprep.subr.bf16.mxu1 %v7777_v10  ;;  %v7858_v9 = vld [vmem:[#allocation4 + $0x1320] ss:$8 sps:$4 sm:$0xff]   ;;  %v7863_v10 = vld [vmem:[#allocation4 + $0x734] ss:$8 sps:$4 sm:$0xff]  }
 0x1dd   :  { %5779 = vmatprep.subr.bf16.mxu0 %v7780_v11  ;;  %v7866_v11 = vld [vmem:[#allocation4 + $0x1334] ss:$8 sps:$4 sm:$0xff]  }
 0x1df   :  { %5288 = vmatpush1.bf16.msra.mxu1 %v7775_v12  ;;  %v7861_v12 = vld [vmem:[#allocation4 + $0x730] ss:$8 sps:$4 sm:$0xff]  }
 0x1e0   :  { %5780 = vmatpush1.bf16.msra.mxu0 %v7778_v13  ;;  %5289 = vmatprep.subr.bf16.mxu1 %v7783_v14  ;;  %v7864_v13 = vld [vmem:[#allocation4 + $0x1330] ss:$8 sps:$4 sm:$0xff]   ;;  %v7869_v14 = vld [vmem:[#allocation4 + $0x744] ss:$8 sps:$4 sm:$0xff]  }
 0x1e1   :  { %5781 = vmatprep.subr.bf16.mxu0 %v7786_v15  ;;  %v7872_v15 = vld [vmem:[#allocation4 + $0x1344] ss:$8 sps:$4 sm:$0xff]  }
 0x1e3   :  { %5290 = vmatpush1.bf16.msra.mxu1 %v7781_v16  ;;  %v7867_v16 = vld [vmem:[#allocation4 + $0x740] ss:$8 sps:$4 sm:$0xff]  }
 0x1e4   :  { %5782 = vmatpush1.bf16.msra.mxu0 %v7784_v17  ;;  %5291 = vmatprep.subr.bf16.mxu1 %v7789_v18  ;;  %v7870_v17 = vld [vmem:[#allocation4 + $0x1340] ss:$8 sps:$4 sm:$0xff]   ;;  %v7875_v18 = vld [vmem:[#allocation4 + $0x754] ss:$8 sps:$4 sm:$0xff]  }
 0x1e5   :  { %5783 = vmatprep.subr.bf16.mxu0 %v7792_v19  ;;  %v7878_v19 = vld [vmem:[#allocation4 + $0x1354] ss:$8 sps:$4 sm:$0xff]  }
 0x1e7   :  { %5292 = vmatpush1.bf16.msra.mxu1 %v7787_v20  ;;  %v7873_v20 = vld [vmem:[#allocation4 + $0x750] ss:$8 sps:$4 sm:$0xff]  }
 0x1e8   :  { %5784 = vmatpush1.bf16.msra.mxu0 %v7790_v21  ;;  %5293 = vmatprep.subr.bf16.mxu1 %v7795_v26  ;;  %v7876_v21 = vld [vmem:[#allocation4 + $0x1350] ss:$8 sps:$4 sm:$0xff]   ;;  %v7881_v26 = vld [vmem:[#allocation4 + $0x764] ss:$8 sps:$4 sm:$0xff]  }
 0x1e9   :  { %5785 = vmatprep.subr.bf16.mxu0 %v7798_v27  ;;  %v7884_v27 = vld [vmem:[#allocation4 + $0x1364] ss:$8 sps:$4 sm:$0xff]  }
 0x1eb   :  { %5294 = vmatpush1.bf16.msra.mxu1 %v7793_v28  ;;  %v7879_v28 = vld [vmem:[#allocation4 + $0x760] ss:$8 sps:$4 sm:$0xff]  }
 0x1ec   :  { %5786 = vmatpush1.bf16.msra.mxu0 %v7796_v29  ;;  %5295 = vmatprep.subr.bf16.mxu1 %v7801_v30  ;;  %v7882_v29 = vld [vmem:[#allocation4 + $0x1360] ss:$8 sps:$4 sm:$0xff]   ;;  %v7887_v30 = vld [vmem:[#allocation4 + $0x774] ss:$8 sps:$4 sm:$0xff]  }
 0x1ed   :  { %5787 = vmatprep.subr.bf16.mxu0 %v7804_v31  ;;  %v7890_v31 = vld [vmem:[#allocation4 + $0x1374] ss:$8 sps:$4 sm:$0xff]  }
 0x1ef   :  { %5296 = vmatpush1.bf16.msra.mxu1 %v7799_v34  ;;  %v7885_v34 = vld [vmem:[#allocation4 + $0x770] ss:$8 sps:$4 sm:$0xff]  }
 0x1f0   :  { %5788 = vmatpush1.bf16.msra.mxu0 %v7802_v35  ;;  %5297 = vmatprep.subr.bf16.mxu1 %v7807_v36  ;;  %v7888_v35 = vld [vmem:[#allocation4 + $0x1370] ss:$8 sps:$4 sm:$0xff]   ;;  %v7893_v36 = vld [vmem:[#allocation4 + $0x784] ss:$8 sps:$4 sm:$0xff]  }
 0x1f1   :  { %5789 = vmatprep.subr.bf16.mxu0 %v7810_v37  ;;  %v7896_v37 = vld [vmem:[#allocation4 + $0x1384] ss:$8 sps:$4 sm:$0xff]  }
 0x1f3   :  { %5298 = vmatpush1.bf16.msra.mxu1 %v7805_v38  ;;  %v7891_v38 = vld [vmem:[#allocation4 + $0x780] ss:$8 sps:$4 sm:$0xff]  }
 0x1f4   :  { %5790 = vmatpush1.bf16.msra.mxu0 %v7808_v39  ;;  %5299 = vmatprep.subr.bf16.mxu1 %v7813_v22  ;;  %v7894_v39 = vld [vmem:[#allocation4 + $0x1380] ss:$8 sps:$4 sm:$0xff]   ;;  %v7899_v22 = vld [vmem:[#allocation4 + $0x794] ss:$8 sps:$4 sm:$0xff]  }
 0x1f5   :  { %5791 = vmatprep.subr.bf16.mxu0 %v7816_v40  ;;  %v7902_v40 = vld [vmem:[#allocation4 + $0x1394] ss:$8 sps:$4 sm:$0xff]  }
 0x1f7   :  { %5300 = vmatpush1.bf16.msra.mxu1 %v7811_v42  ;;  %v7897_v42 = vld [vmem:[#allocation4 + $0x790] ss:$8 sps:$4 sm:$0xff]  }
 0x1f8   :  { %5792 = vmatpush1.bf16.msra.mxu0 %v7814_v43  ;;  %5301 = vmatprep.subr.bf16.mxu1 %v7819_v44  ;;  %v7900_v43 = vld [vmem:[#allocation4 + $0x1390] ss:$8 sps:$4 sm:$0xff]   ;;  %v7905_v44 = vld [vmem:[#allocation4 + $0x7a4] ss:$8 sps:$4 sm:$0xff]  }
 0x1f9   :  { %5793 = vmatprep.subr.bf16.mxu0 %v7822_v45  ;;  %v7908_v45 = vld [vmem:[#allocation4 + $0x13a4] ss:$8 sps:$4 sm:$0xff]  }
 0x1fb   :  { %5302 = vmatpush1.bf16.msra.mxu1 %v7817_v46  ;;  %v7903_v46 = vld [vmem:[#allocation4 + $0x7a0] ss:$8 sps:$4 sm:$0xff]  }
 0x1fc   :  { %5794 = vmatpush1.bf16.msra.mxu0 %v7820_v47  ;;  %5303 = vmatprep.subr.bf16.mxu1 %v7825_v23  ;;  %v7906_v47 = vld [vmem:[#allocation4 + $0x13a0] ss:$8 sps:$4 sm:$0xff]   ;;  %v7911_v23 = vld [vmem:[#allocation4 + $0x7b4] ss:$8 sps:$4 sm:$0xff]  }
 0x1fd   :  { %5795 = vmatprep.subr.bf16.mxu0 %v7828_v25  ;;  %v7914_v25 = vld [vmem:[#allocation4 + $0x13b4] ss:$8 sps:$4 sm:$0xff]  }
 0x1ff   :  { %5304 = vmatpush1.bf16.msra.mxu1 %v7823_v50  ;;  %v7909_v50 = vld [vmem:[#allocation4 + $0x7b0] ss:$8 sps:$4 sm:$0xff]  }
 0x200   :  { %5796 = vmatpush1.bf16.msra.mxu0 %v7826_v51  ;;  %5305 = vmatprep.subr.bf16.mxu1 %v7831_v52  ;;  %v7912_v51 = vld [vmem:[#allocation4 + $0x13b0] ss:$8 sps:$4 sm:$0xff]   ;;  %v7917_v52 = vld [vmem:[#allocation4 + $0x7c4] ss:$8 sps:$4 sm:$0xff]  }
 0x201   :  { %5797 = vmatprep.subr.bf16.mxu0 %v7834_v53  ;;  %v7920_v53 = vld [vmem:[#allocation4 + $0x13c4] ss:$8 sps:$4 sm:$0xff]  }
 0x203   :  { %5306 = vmatpush1.bf16.msra.mxu1 %v7829_v54  ;;  %v7915_v54 = vld [vmem:[#allocation4 + $0x7c0] ss:$8 sps:$4 sm:$0xff]  }
 0x204   :  { %5798 = vmatpush1.bf16.msra.mxu0 %v7832_v55  ;;  %5307 = vmatprep.subr.bf16.mxu1 %v7837_v32  ;;  %v7918_v55 = vld [vmem:[#allocation4 + $0x13c0] ss:$8 sps:$4 sm:$0xff]   ;;  %v7923_v32 = vld [vmem:[#allocation4 + $0x7d4] ss:$8 sps:$4 sm:$0xff]  }
 0x205   :  { %5799 = vmatprep.subr.bf16.mxu0 %v7840_v33  ;;  %v7926_v33 = vld [vmem:[#allocation4 + $0x13d4] ss:$8 sps:$4 sm:$0xff]  }
 0x207   :  { %5308 = vmatpush1.bf16.msra.mxu1 %v7835_v58  ;;  %v7921_v58 = vld [vmem:[#allocation4 + $0x7d0] ss:$8 sps:$4 sm:$0xff]  }
 0x208   :  { %5800 = vmatpush1.bf16.msra.mxu0 %v7838_v59  ;;  %5318 = vmatprep.subr.bf16.mxu1 %v7844_v60  ;;  %v7924_v59 = vld [vmem:[#allocation4 + $0x13d0] ss:$8 sps:$4 sm:$0xff]   ;;  %v7929_v60 = vld [vmem:[#allocation4 + $0x7e4] ss:$8 sps:$4 sm:$0xff]  }
 0x209   :  { %5810 = vmatprep.subr.bf16.mxu0 %v7848_v61  ;;  %v7932_v61 = vld [vmem:[#allocation4 + $0x13e4] ss:$8 sps:$4 sm:$0xff]  }
 0x20a   :  { %5310 = vmatmul.mubr.bf16.vlgmr.msra.gmra.mrb[0].mxu1 %v181_v24  ;;  %v7935_v24 = vld [vmem:[#allocation4 + $0x7f4] ss:$8 sps:$4 sm:$0xff]  }
 0x20b   :  { %5802 = vmatmul.mubr.bf16.vlgmr.msra.gmra.mrb[0].mxu0 %v205_v41  ;;  %5319 = vmatpush1.bf16.msra.mxu1 %v7842_v0  ;;  %v7938_v41 = vld [vmem:[#allocation4 + $0x13f4] ss:$8 sps:$4 sm:$0xff]  }
 0x20c   :  { %5811 = vmatpush1.bf16.msra.mxu0 %v7846_v1  ;;  %5320 = vmatprep.subr.bf16.mxu1 %v7851_v2  ;;  %v8644_v0 = vld [vmem:[#allocation2 + $0x40] sm:$0xff] }
 0x20d   :  { %5812 = vmatprep.subr.bf16.mxu0 %v7854_v3  ;;  %5350 = vmatprep.mubr.bf16.mxu1 %v184_v4  ;;  %v8646_v1 = vld [vmem:[#allocation2 + $0xa0] sm:$0xff]  ;;  %v7942_v4 = vld [vmem:[#allocation4 + $0x804] ss:$8 sps:$4 sm:$0xff]  }
 0x20e   :  { %5842 = vmatprep.mubr.bf16.mxu0 %v208_v5  ;;  %v7933_v2 = vld [vmem:[#allocation4 + $0x7f0] ss:$8 sps:$4 sm:$0xff]   ;;  %v7946_v5 = vld [vmem:[#allocation4 + $0x1404] ss:$8 sps:$4 sm:$0xff]  }
 0x20f   :  { %5321 = vmatpush1.bf16.msra.mxu1 %v7849_v6  ;;  %v7936_v3 = vld [vmem:[#allocation4 + $0x13f0] ss:$8 sps:$4 sm:$0xff]   ;;  %v127_v6 = vcombine.high %v8644_v0, %v8644_v0 }
 0x210   :  { %5813 = vmatpush1.bf16.msra.mxu0 %v7852_v7  ;;  %5322 = vmatprep.subr.bf16.mxu1 %v7857_v48  ;;  %v139_v7 = vcombine.high %v8646_v1, %v8646_v1  ;;  %v183_v48 = vpack.c.bf16 %v8632_v56, %v8632_v56  ;;  %v7955_v56 = vld [vmem:[#allocation4 + $0x824] ss:$8 sps:$4 sm:$0xff]  }
 0x211   :  { %5814 = vmatprep.subr.bf16.mxu0 %v7860_v49  ;;  %v207_v49 = vpack.c.bf16 %v8634_v57, %v8634_v57  ;;  %v7958_v57 = vld [vmem:[#allocation4 + $0x1424] ss:$8 sps:$4 sm:$0xff]  }
 0x213   :  { %5323 = vmatpush1.bf16.msra.mxu1 %v7855_v8  ;;  %v7940_v8 = vld [vmem:[#allocation4 + $0x800] ss:$8 sps:$4 sm:$0xff]  }
 0x214   :  { %5815 = vmatpush1.bf16.msra.mxu0 %v7858_v9  ;;  %5324 = vmatprep.subr.bf16.mxu1 %v7863_v10  ;;  %v7944_v9 = vld [vmem:[#allocation4 + $0x1400] ss:$8 sps:$4 sm:$0xff]   ;;  %v7949_v10 = vld [vmem:[#allocation4 + $0x814] ss:$8 sps:$4 sm:$0xff]  }
 0x215   :  { %5816 = vmatprep.subr.bf16.mxu0 %v7866_v11  ;;  %v7952_v11 = vld [vmem:[#allocation4 + $0x1414] ss:$8 sps:$4 sm:$0xff]  }
 0x217   :  { %5325 = vmatpush1.bf16.msra.mxu1 %v7861_v12  ;;  %v186_v12 = vpack.c.bf16 %v127_v6, %v127_v6  ;;  %v8025_v6 = vld [vmem:[#allocation4 + $0x8e0] ss:$8 sps:$4 sm:$0xff]  }
 0x218   :  { %5817 = vmatpush1.bf16.msra.mxu0 %v7864_v13  ;;  %5326 = vmatprep.subr.bf16.mxu1 %v7869_v14  ;;  %v210_v13 = vpack.c.bf16 %v139_v7, %v139_v7  ;;  %v7947_v14 = vld [vmem:[#allocation4 + $0x810] ss:$8 sps:$4 sm:$0xff]   ;;  %v8028_v7 = vld [vmem:[#allocation4 + $0x14e0] ss:$8 sps:$4 sm:$0xff]  }
 0x219   :  { %5818 = vmatprep.subr.bf16.mxu0 %v7872_v15  ;;  %v7950_v15 = vld [vmem:[#allocation4 + $0x1410] ss:$8 sps:$4 sm:$0xff]  }
 0x21b   :  { %5327 = vmatpush1.bf16.msra.mxu1 %v7867_v16  ;;  %v7953_v16 = vld [vmem:[#allocation4 + $0x820] ss:$8 sps:$4 sm:$0xff]  }
 0x21c   :  { %5819 = vmatpush1.bf16.msra.mxu0 %v7870_v17  ;;  %5328 = vmatprep.subr.bf16.mxu1 %v7875_v18  ;;  %v7956_v17 = vld [vmem:[#allocation4 + $0x1420] ss:$8 sps:$4 sm:$0xff]   ;;  %v7961_v18 = vld [vmem:[#allocation4 + $0x834] ss:$8 sps:$4 sm:$0xff]  }
 0x21d   :  { %5820 = vmatprep.subr.bf16.mxu0 %v7878_v19  ;;  %v7964_v19 = vld [vmem:[#allocation4 + $0x1434] ss:$8 sps:$4 sm:$0xff]  }
 0x21f   :  { %5329 = vmatpush1.bf16.msra.mxu1 %v7873_v20  ;;  %v7959_v20 = vld [vmem:[#allocation4 + $0x830] ss:$8 sps:$4 sm:$0xff]  }
 0x220   :  { %5821 = vmatpush1.bf16.msra.mxu0 %v7876_v21  ;;  %5330 = vmatprep.subr.bf16.mxu1 %v7881_v26  ;;  %v7962_v21 = vld [vmem:[#allocation4 + $0x1430] ss:$8 sps:$4 sm:$0xff]   ;;  %v7967_v26 = vld [vmem:[#allocation4 + $0x844] ss:$8 sps:$4 sm:$0xff]  }
 0x221   :  { %5822 = vmatprep.subr.bf16.mxu0 %v7884_v27  ;;  %v7970_v27 = vld [vmem:[#allocation4 + $0x1444] ss:$8 sps:$4 sm:$0xff]  }
 0x223   :  { %5331 = vmatpush1.bf16.msra.mxu1 %v7879_v28  ;;  %v7965_v28 = vld [vmem:[#allocation4 + $0x840] ss:$8 sps:$4 sm:$0xff]  }
 0x224   :  { %5823 = vmatpush1.bf16.msra.mxu0 %v7882_v29  ;;  %5332 = vmatprep.subr.bf16.mxu1 %v7887_v30  ;;  %v7968_v29 = vld [vmem:[#allocation4 + $0x1440] ss:$8 sps:$4 sm:$0xff]   ;;  %v7973_v30 = vld [vmem:[#allocation4 + $0x854] ss:$8 sps:$4 sm:$0xff]  }
 0x225   :  { %5824 = vmatprep.subr.bf16.mxu0 %v7890_v31  ;;  %v7976_v31 = vld [vmem:[#allocation4 + $0x1454] ss:$8 sps:$4 sm:$0xff]  }
 0x227   :  { %5333 = vmatpush1.bf16.msra.mxu1 %v7885_v34  ;;  %v7971_v34 = vld [vmem:[#allocation4 + $0x850] ss:$8 sps:$4 sm:$0xff]  }
 0x228   :  { %5825 = vmatpush1.bf16.msra.mxu0 %v7888_v35  ;;  %5334 = vmatprep.subr.bf16.mxu1 %v7893_v36  ;;  %v7974_v35 = vld [vmem:[#allocation4 + $0x1450] ss:$8 sps:$4 sm:$0xff]   ;;  %v7979_v36 = vld [vmem:[#allocation4 + $0x864] ss:$8 sps:$4 sm:$0xff]  }
 0x229   :  { %5826 = vmatprep.subr.bf16.mxu0 %v7896_v37  ;;  %v7982_v37 = vld [vmem:[#allocation4 + $0x1464] ss:$8 sps:$4 sm:$0xff]  }
 0x22b   :  { %5335 = vmatpush1.bf16.msra.mxu1 %v7891_v38  ;;  %v7977_v38 = vld [vmem:[#allocation4 + $0x860] ss:$8 sps:$4 sm:$0xff]  }
 0x22c   :  { %5827 = vmatpush1.bf16.msra.mxu0 %v7894_v39  ;;  %5336 = vmatprep.subr.bf16.mxu1 %v7899_v22  ;;  %v7980_v39 = vld [vmem:[#allocation4 + $0x1460] ss:$8 sps:$4 sm:$0xff]   ;;  %v7985_v22 = vld [vmem:[#allocation4 + $0x874] ss:$8 sps:$4 sm:$0xff]  }
 0x22d   :  { %5828 = vmatprep.subr.bf16.mxu0 %v7902_v40  ;;  %v7988_v40 = vld [vmem:[#allocation4 + $0x1474] ss:$8 sps:$4 sm:$0xff]  }
 0x22f   :  { %5337 = vmatpush1.bf16.msra.mxu1 %v7897_v42  ;;  %v7983_v42 = vld [vmem:[#allocation4 + $0x870] ss:$8 sps:$4 sm:$0xff]  }
 0x230   :  { %5829 = vmatpush1.bf16.msra.mxu0 %v7900_v43  ;;  %5338 = vmatprep.subr.bf16.mxu1 %v7905_v44  ;;  %v7986_v43 = vld [vmem:[#allocation4 + $0x1470] ss:$8 sps:$4 sm:$0xff]   ;;  %v7991_v44 = vld [vmem:[#allocation4 + $0x884] ss:$8 sps:$4 sm:$0xff]  }
 0x231   :  { %5830 = vmatprep.subr.bf16.mxu0 %v7908_v45  ;;  %v7994_v45 = vld [vmem:[#allocation4 + $0x1484] ss:$8 sps:$4 sm:$0xff]  }
 0x233   :  { %5339 = vmatpush1.bf16.msra.mxu1 %v7903_v46  ;;  %v7989_v46 = vld [vmem:[#allocation4 + $0x880] ss:$8 sps:$4 sm:$0xff]  }
 0x234   :  { %5831 = vmatpush1.bf16.msra.mxu0 %v7906_v47  ;;  %5340 = vmatprep.subr.bf16.mxu1 %v7911_v23  ;;  %v7992_v47 = vld [vmem:[#allocation4 + $0x1480] ss:$8 sps:$4 sm:$0xff]   ;;  %v7997_v23 = vld [vmem:[#allocation4 + $0x894] ss:$8 sps:$4 sm:$0xff]  }
 0x235   :  { %5832 = vmatprep.subr.bf16.mxu0 %v7914_v25  ;;  %v8000_v25 = vld [vmem:[#allocation4 + $0x1494] ss:$8 sps:$4 sm:$0xff]  }
 0x237   :  { %5341 = vmatpush1.bf16.msra.mxu1 %v7909_v50  ;;  %v7995_v50 = vld [vmem:[#allocation4 + $0x890] ss:$8 sps:$4 sm:$0xff]  }
 0x238   :  { %5833 = vmatpush1.bf16.msra.mxu0 %v7912_v51  ;;  %5342 = vmatprep.subr.bf16.mxu1 %v7917_v52  ;;  %v7998_v51 = vld [vmem:[#allocation4 + $0x1490] ss:$8 sps:$4 sm:$0xff]   ;;  %v8003_v52 = vld [vmem:[#allocation4 + $0x8a4] ss:$8 sps:$4 sm:$0xff]  }
 0x239   :  { %5834 = vmatprep.subr.bf16.mxu0 %v7920_v53  ;;  %v8006_v53 = vld [vmem:[#allocation4 + $0x14a4] ss:$8 sps:$4 sm:$0xff]  }
 0x23b   :  { %5343 = vmatpush1.bf16.msra.mxu1 %v7915_v54  ;;  %v8001_v54 = vld [vmem:[#allocation4 + $0x8a0] ss:$8 sps:$4 sm:$0xff]  }
 0x23c   :  { %5835 = vmatpush1.bf16.msra.mxu0 %v7918_v55  ;;  %5344 = vmatprep.subr.bf16.mxu1 %v7923_v32  ;;  %v8004_v55 = vld [vmem:[#allocation4 + $0x14a0] ss:$8 sps:$4 sm:$0xff]   ;;  %v8009_v32 = vld [vmem:[#allocation4 + $0x8b4] ss:$8 sps:$4 sm:$0xff]  }
 0x23d   :  { %5836 = vmatprep.subr.bf16.mxu0 %v7926_v33  ;;  %v8012_v33 = vld [vmem:[#allocation4 + $0x14b4] ss:$8 sps:$4 sm:$0xff]  }
 0x23f   :  { %5345 = vmatpush1.bf16.msra.mxu1 %v7921_v58  ;;  %v8007_v58 = vld [vmem:[#allocation4 + $0x8b0] ss:$8 sps:$4 sm:$0xff]  }
 0x240   :  { %5837 = vmatpush1.bf16.msra.mxu0 %v7924_v59  ;;  %5346 = vmatprep.subr.bf16.mxu1 %v7929_v60  ;;  %v8010_v59 = vld [vmem:[#allocation4 + $0x14b0] ss:$8 sps:$4 sm:$0xff]   ;;  %v8015_v60 = vld [vmem:[#allocation4 + $0x8c4] ss:$8 sps:$4 sm:$0xff]  }
 0x241   :  { %5838 = vmatprep.subr.bf16.mxu0 %v7932_v61  ;;  %v8018_v61 = vld [vmem:[#allocation4 + $0x14c4] ss:$8 sps:$4 sm:$0xff]  }
 0x243   :  { %5347 = vmatpush1.bf16.msra.mxu1 %v7927_v62  ;;  %v8013_v62 = vld [vmem:[#allocation4 + $0x8c0] ss:$8 sps:$4 sm:$0xff]  }
 0x244   :  { %5839 = vmatpush1.bf16.msra.mxu0 %v7930_v63  ;;  %5348 = vmatprep.subr.bf16.mxu1 %v7935_v24  ;;  %v8016_v63 = vld [vmem:[#allocation4 + $0x14c0] ss:$8 sps:$4 sm:$0xff]   ;;  %v8021_v24 = vld [vmem:[#allocation4 + $0x8d4] ss:$8 sps:$4 sm:$0xff]  }
 0x245   :  { %5840 = vmatprep.subr.bf16.mxu0 %v7938_v41  ;;  %v8024_v41 = vld [vmem:[#allocation4 + $0x14d4] ss:$8 sps:$4 sm:$0xff]  }
 0x247   :  { %5349 = vmatpush1.bf16.msra.mxu1 %v7933_v2  ;;  %v8019_v2 = vld [vmem:[#allocation4 + $0x8d0] ss:$8 sps:$4 sm:$0xff]  }
 0x248   :  { %5841 = vmatpush1.bf16.msra.mxu0 %v7936_v3  ;;  %5359 = vmatprep.subr.bf16.mxu1 %v7942_v4  ;;  %v8022_v3 = vld [vmem:[#allocation4 + $0x14d0] ss:$8 sps:$4 sm:$0xff]   ;;  %v8027_v4 = vld [vmem:[#allocation4 + $0x8e4] ss:$8 sps:$4 sm:$0xff]  }
 0x249   :  { %5851 = vmatprep.subr.bf16.mxu0 %v7946_v5  ;;  %v8030_v5 = vld [vmem:[#allocation4 + $0x14e4] ss:$8 sps:$4 sm:$0xff]  }
 0x24a   :  { %5351 = vmatmul.mubr.bf16.vlgmr.msra.gmra.mrb[0].mxu1 %v183_v48  ;;  %v8033_v48 = vld [vmem:[#allocation4 + $0x8f4] ss:$8 sps:$4 sm:$0xff]  }
 0x24b   :  { %5843 = vmatmul.mubr.bf16.vlgmr.msra.gmra.mrb[0].mxu0 %v207_v49  ;;  %5360 = vmatpush1.bf16.msra.mxu1 %v7940_v8  ;;  %v8036_v49 = vld [vmem:[#allocation4 + $0x14f4] ss:$8 sps:$4 sm:$0xff]   ;;  %v8656_v8 = vld [vmem:[#allocation2 + $0x48] sm:$0xff] }
 0x24c   :  { %5852 = vmatpush1.bf16.msra.mxu0 %v7944_v9  ;;  %5361 = vmatprep.subr.bf16.mxu1 %v7949_v10  ;;  %v8658_v9 = vld [vmem:[#allocation2 + $0xa8] sm:$0xff]  ;;  %v8031_v10 = vld [vmem:[#allocation4 + $0x8f0] ss:$8 sps:$4 sm:$0xff]  }
 0x24d   :  { %5853 = vmatprep.subr.bf16.mxu0 %v7952_v11  ;;  %5391 = vmatprep.mubr.bf16.mxu1 %v186_v12  ;;  %v8034_v11 = vld [vmem:[#allocation4 + $0x14f0] ss:$8 sps:$4 sm:$0xff]   ;;  %v8040_v12 = vld [vmem:[#allocation4 + $0x904] ss:$8 sps:$4 sm:$0xff]  }
 0x24e   :  { %5883 = vmatprep.mubr.bf16.mxu0 %v210_v13  ;;  %v8044_v13 = vld [vmem:[#allocation4 + $0x1504] ss:$8 sps:$4 sm:$0xff]  }
 0x24f   :  { %5362 = vmatpush1.bf16.msra.mxu1 %v7947_v14  ;;  %v128_v14 = vcombine.high %v8656_v8, %v8656_v8 }
 0x250   :  { %5854 = vmatpush1.bf16.msra.mxu0 %v7950_v15  ;;  %5363 = vmatprep.subr.bf16.mxu1 %v7955_v56  ;;  %v140_v15 = vcombine.high %v8658_v9, %v8658_v9  ;;  %v185_v56 = vpack.c.bf16 %v8644_v0, %v8644_v0  ;;  %v8053_v0 = vld [vmem:[#allocation4 + $0x924] ss:$8 sps:$4 sm:$0xff]  }
 0x251   :  { %5855 = vmatprep.subr.bf16.mxu0 %v7958_v57  ;;  %v209_v57 = vpack.c.bf16 %v8646_v1, %v8646_v1  ;;  %v8056_v1 = vld [vmem:[#allocation4 + $0x1524] ss:$8 sps:$4 sm:$0xff]  }
 0x253   :  { %5364 = vmatpush1.bf16.msra.mxu1 %v7953_v16  ;;  %v8038_v16 = vld [vmem:[#allocation4 + $0x900] ss:$8 sps:$4 sm:$0xff]  }
 0x254   :  { %5856 = vmatpush1.bf16.msra.mxu0 %v7956_v17  ;;  %5365 = vmatprep.subr.bf16.mxu1 %v7961_v18  ;;  %v8042_v17 = vld [vmem:[#allocation4 + $0x1500] ss:$8 sps:$4 sm:$0xff]   ;;  %v8047_v18 = vld [vmem:[#allocation4 + $0x914] ss:$8 sps:$4 sm:$0xff]  }
 0x255   :  { %5857 = vmatprep.subr.bf16.mxu0 %v7964_v19  ;;  %v8050_v19 = vld [vmem:[#allocation4 + $0x1514] ss:$8 sps:$4 sm:$0xff]  }
 0x257   :  { %5366 = vmatpush1.bf16.msra.mxu1 %v7959_v20  ;;  %v188_v20 = vpack.c.bf16 %v128_v14, %v128_v14  ;;  %v8123_v14 = vld [vmem:[#allocation4 + $0x9e0] ss:$8 sps:$4 sm:$0xff]  }
 0x258   :  { %5858 = vmatpush1.bf16.msra.mxu0 %v7962_v21  ;;  %5367 = vmatprep.subr.bf16.mxu1 %v7967_v26  ;;  %v212_v21 = vpack.c.bf16 %v140_v15, %v140_v15  ;;  %v8045_v26 = vld [vmem:[#allocation4 + $0x910] ss:$8 sps:$4 sm:$0xff]   ;;  %v8126_v15 = vld [vmem:[#allocation4 + $0x15e0] ss:$8 sps:$4 sm:$0xff]  }
 0x259   :  { %5859 = vmatprep.subr.bf16.mxu0 %v7970_v27  ;;  %v8048_v27 = vld [vmem:[#allocation4 + $0x1510] ss:$8 sps:$4 sm:$0xff]  }
 0x25b   :  { %5368 = vmatpush1.bf16.msra.mxu1 %v7965_v28  ;;  %v8051_v28 = vld [vmem:[#allocation4 + $0x920] ss:$8 sps:$4 sm:$0xff]  }
 0x25c   :  { %5860 = vmatpush1.bf16.msra.mxu0 %v7968_v29  ;;  %5369 = vmatprep.subr.bf16.mxu1 %v7973_v30  ;;  %v8054_v29 = vld [vmem:[#allocation4 + $0x1520] ss:$8 sps:$4 sm:$0xff]   ;;  %v8059_v30 = vld [vmem:[#allocation4 + $0x934] ss:$8 sps:$4 sm:$0xff]  }
 0x25d   :  { %5861 = vmatprep.subr.bf16.mxu0 %v7976_v31  ;;  %v8062_v31 = vld [vmem:[#allocation4 + $0x1534] ss:$8 sps:$4 sm:$0xff]  }
 0x25f   :  { %5370 = vmatpush1.bf16.msra.mxu1 %v7971_v34  ;;  %v8057_v34 = vld [vmem:[#allocation4 + $0x930] ss:$8 sps:$4 sm:$0xff]  }
 0x260   :  { %5862 = vmatpush1.bf16.msra.mxu0 %v7974_v35  ;;  %5371 = vmatprep.subr.bf16.mxu1 %v7979_v36  ;;  %v8060_v35 = vld [vmem:[#allocation4 + $0x1530] ss:$8 sps:$4 sm:$0xff]   ;;  %v8065_v36 = vld [vmem:[#allocation4 + $0x944] ss:$8 sps:$4 sm:$0xff]  }
 0x261   :  { %5863 = vmatprep.subr.bf16.mxu0 %v7982_v37  ;;  %v8068_v37 = vld [vmem:[#allocation4 + $0x1544] ss:$8 sps:$4 sm:$0xff]  }
 0x263   :  { %5372 = vmatpush1.bf16.msra.mxu1 %v7977_v38  ;;  %v8063_v38 = vld [vmem:[#allocation4 + $0x940] ss:$8 sps:$4 sm:$0xff]  }
 0x264   :  { %5864 = vmatpush1.bf16.msra.mxu0 %v7980_v39  ;;  %5373 = vmatprep.subr.bf16.mxu1 %v7985_v22  ;;  %v8066_v39 = vld [vmem:[#allocation4 + $0x1540] ss:$8 sps:$4 sm:$0xff]   ;;  %v8071_v22 = vld [vmem:[#allocation4 + $0x954] ss:$8 sps:$4 sm:$0xff]  }
 0x265   :  { %5865 = vmatprep.subr.bf16.mxu0 %v7988_v40  ;;  %v8074_v40 = vld [vmem:[#allocation4 + $0x1554] ss:$8 sps:$4 sm:$0xff]  }
 0x267   :  { %5374 = vmatpush1.bf16.msra.mxu1 %v7983_v42  ;;  %v8069_v42 = vld [vmem:[#allocation4 + $0x950] ss:$8 sps:$4 sm:$0xff]  }
 0x268   :  { %5866 = vmatpush1.bf16.msra.mxu0 %v7986_v43  ;;  %5375 = vmatprep.subr.bf16.mxu1 %v7991_v44  ;;  %v8072_v43 = vld [vmem:[#allocation4 + $0x1550] ss:$8 sps:$4 sm:$0xff]   ;;  %v8077_v44 = vld [vmem:[#allocation4 + $0x964] ss:$8 sps:$4 sm:$0xff]  }
 0x269   :  { %5867 = vmatprep.subr.bf16.mxu0 %v7994_v45  ;;  %v8080_v45 = vld [vmem:[#allocation4 + $0x1564] ss:$8 sps:$4 sm:$0xff]  }
 0x26b   :  { %5376 = vmatpush1.bf16.msra.mxu1 %v7989_v46  ;;  %v8075_v46 = vld [vmem:[#allocation4 + $0x960] ss:$8 sps:$4 sm:$0xff]  }
 0x26c   :  { %5868 = vmatpush1.bf16.msra.mxu0 %v7992_v47  ;;  %5377 = vmatprep.subr.bf16.mxu1 %v7997_v23  ;;  %v8078_v47 = vld [vmem:[#allocation4 + $0x1560] ss:$8 sps:$4 sm:$0xff]   ;;  %v8083_v23 = vld [vmem:[#allocation4 + $0x974] ss:$8 sps:$4 sm:$0xff]  }
 0x26d   :  { %5869 = vmatprep.subr.bf16.mxu0 %v8000_v25  ;;  %v8086_v25 = vld [vmem:[#allocation4 + $0x1574] ss:$8 sps:$4 sm:$0xff]  }
 0x26f   :  { %5378 = vmatpush1.bf16.msra.mxu1 %v7995_v50  ;;  %v8081_v50 = vld [vmem:[#allocation4 + $0x970] ss:$8 sps:$4 sm:$0xff]  }
 0x270   :  { %5870 = vmatpush1.bf16.msra.mxu0 %v7998_v51  ;;  %5379 = vmatprep.subr.bf16.mxu1 %v8003_v52  ;;  %v8084_v51 = vld [vmem:[#allocation4 + $0x1570] ss:$8 sps:$4 sm:$0xff]   ;;  %v8089_v52 = vld [vmem:[#allocation4 + $0x984] ss:$8 sps:$4 sm:$0xff]  }
 0x271   :  { %5871 = vmatprep.subr.bf16.mxu0 %v8006_v53  ;;  %v8092_v53 = vld [vmem:[#allocation4 + $0x1584] ss:$8 sps:$4 sm:$0xff]  }
 0x273   :  { %5380 = vmatpush1.bf16.msra.mxu1 %v8001_v54  ;;  %v8087_v54 = vld [vmem:[#allocation4 + $0x980] ss:$8 sps:$4 sm:$0xff]  }
 0x274   :  { %5872 = vmatpush1.bf16.msra.mxu0 %v8004_v55  ;;  %5381 = vmatprep.subr.bf16.mxu1 %v8009_v32  ;;  %v8090_v55 = vld [vmem:[#allocation4 + $0x1580] ss:$8 sps:$4 sm:$0xff]   ;;  %v8095_v32 = vld [vmem:[#allocation4 + $0x994] ss:$8 sps:$4 sm:$0xff]  }
 0x275   :  { %5873 = vmatprep.subr.bf16.mxu0 %v8012_v33  ;;  %v8098_v33 = vld [vmem:[#allocation4 + $0x1594] ss:$8 sps:$4 sm:$0xff]  }
 0x277   :  { %5382 = vmatpush1.bf16.msra.mxu1 %v8007_v58  ;;  %v8093_v58 = vld [vmem:[#allocation4 + $0x990] ss:$8 sps:$4 sm:$0xff]  }
 0x278   :  { %5874 = vmatpush1.bf16.msra.mxu0 %v8010_v59  ;;  %5383 = vmatprep.subr.bf16.mxu1 %v8015_v60  ;;  %v8096_v59 = vld [vmem:[#allocation4 + $0x1590] ss:$8 sps:$4 sm:$0xff]   ;;  %v8101_v60 = vld [vmem:[#allocation4 + $0x9a4] ss:$8 sps:$4 sm:$0xff]  }
 0x279   :  { %5875 = vmatprep.subr.bf16.mxu0 %v8018_v61  ;;  %v8104_v61 = vld [vmem:[#allocation4 + $0x15a4] ss:$8 sps:$4 sm:$0xff]  }
 0x27b   :  { %5384 = vmatpush1.bf16.msra.mxu1 %v8013_v62  ;;  %v8099_v62 = vld [vmem:[#allocation4 + $0x9a0] ss:$8 sps:$4 sm:$0xff]  }
 0x27c   :  { %5876 = vmatpush1.bf16.msra.mxu0 %v8016_v63  ;;  %5385 = vmatprep.subr.bf16.mxu1 %v8021_v24  ;;  %v8102_v63 = vld [vmem:[#allocation4 + $0x15a0] ss:$8 sps:$4 sm:$0xff]   ;;  %v8107_v24 = vld [vmem:[#allocation4 + $0x9b4] ss:$8 sps:$4 sm:$0xff]  }
 0x27d   :  { %5877 = vmatprep.subr.bf16.mxu0 %v8024_v41  ;;  %v8110_v41 = vld [vmem:[#allocation4 + $0x15b4] ss:$8 sps:$4 sm:$0xff]  }
 0x27f   :  { %5386 = vmatpush1.bf16.msra.mxu1 %v8019_v2  ;;  %v8105_v2 = vld [vmem:[#allocation4 + $0x9b0] ss:$8 sps:$4 sm:$0xff]  }
 0x280   :  { %5878 = vmatpush1.bf16.msra.mxu0 %v8022_v3  ;;  %5387 = vmatprep.subr.bf16.mxu1 %v8027_v4  ;;  %v8108_v3 = vld [vmem:[#allocation4 + $0x15b0] ss:$8 sps:$4 sm:$0xff]   ;;  %v8113_v4 = vld [vmem:[#allocation4 + $0x9c4] ss:$8 sps:$4 sm:$0xff]  }
 0x281   :  { %5879 = vmatprep.subr.bf16.mxu0 %v8030_v5  ;;  %v8116_v5 = vld [vmem:[#allocation4 + $0x15c4] ss:$8 sps:$4 sm:$0xff]  }
 0x283   :  { %5388 = vmatpush1.bf16.msra.mxu1 %v8025_v6  ;;  %v8111_v6 = vld [vmem:[#allocation4 + $0x9c0] ss:$8 sps:$4 sm:$0xff]  }
 0x284   :  { %5880 = vmatpush1.bf16.msra.mxu0 %v8028_v7  ;;  %5389 = vmatprep.subr.bf16.mxu1 %v8033_v48  ;;  %v8114_v7 = vld [vmem:[#allocation4 + $0x15c0] ss:$8 sps:$4 sm:$0xff]   ;;  %v8119_v48 = vld [vmem:[#allocation4 + $0x9d4] ss:$8 sps:$4 sm:$0xff]  }
 0x285   :  { %5881 = vmatprep.subr.bf16.mxu0 %v8036_v49  ;;  %v8122_v49 = vld [vmem:[#allocation4 + $0x15d4] ss:$8 sps:$4 sm:$0xff]  }
 0x287   :  { %5390 = vmatpush1.bf16.msra.mxu1 %v8031_v10  ;;  %v8117_v10 = vld [vmem:[#allocation4 + $0x9d0] ss:$8 sps:$4 sm:$0xff]  }
 0x288   :  { %5882 = vmatpush1.bf16.msra.mxu0 %v8034_v11  ;;  %5400 = vmatprep.subr.bf16.mxu1 %v8040_v12  ;;  %v8120_v11 = vld [vmem:[#allocation4 + $0x15d0] ss:$8 sps:$4 sm:$0xff]   ;;  %v8125_v12 = vld [vmem:[#allocation4 + $0x9e4] ss:$8 sps:$4 sm:$0xff]  }
 0x289   :  { %5892 = vmatprep.subr.bf16.mxu0 %v8044_v13  ;;  %v8128_v13 = vld [vmem:[#allocation4 + $0x15e4] ss:$8 sps:$4 sm:$0xff]  }
 0x28a   :  { %5392 = vmatmul.mubr.bf16.vlgmr.msra.gmra.mrb[0].mxu1 %v185_v56  ;;  %v8131_v56 = vld [vmem:[#allocation4 + $0x9f4] ss:$8 sps:$4 sm:$0xff]  }
 0x28b   :  { %5884 = vmatmul.mubr.bf16.vlgmr.msra.gmra.mrb[0].mxu0 %v209_v57  ;;  %5401 = vmatpush1.bf16.msra.mxu1 %v8038_v16  ;;  %v8134_v57 = vld [vmem:[#allocation4 + $0x15f4] ss:$8 sps:$4 sm:$0xff]   ;;  %v8668_v16 = vld [vmem:[#allocation2 + $0x50] sm:$0xff] }
 0x28c   :  { %5893 = vmatpush1.bf16.msra.mxu0 %v8042_v17  ;;  %5402 = vmatprep.subr.bf16.mxu1 %v8047_v18  ;;  %v8670_v17 = vld [vmem:[#allocation2 + $0xb0] sm:$0xff]  ;;  %v8129_v18 = vld [vmem:[#allocation4 + $0x9f0] ss:$8 sps:$4 sm:$0xff]  }
 0x28d   :  { %5894 = vmatprep.subr.bf16.mxu0 %v8050_v19  ;;  %5432 = vmatprep.mubr.bf16.mxu1 %v188_v20  ;;  %v8132_v19 = vld [vmem:[#allocation4 + $0x15f0] ss:$8 sps:$4 sm:$0xff]   ;;  %v8138_v20 = vld [vmem:[#allocation4 + $0xa04] ss:$8 sps:$4 sm:$0xff]  }
 0x28e   :  { %5924 = vmatprep.mubr.bf16.mxu0 %v212_v21  ;;  %v8142_v21 = vld [vmem:[#allocation4 + $0x1604] ss:$8 sps:$4 sm:$0xff]  }
 0x28f   :  { %5403 = vmatpush1.bf16.msra.mxu1 %v8045_v26  ;;  %v129_v26 = vcombine.high %v8668_v16, %v8668_v16 }
 0x290   :  { %5895 = vmatpush1.bf16.msra.mxu0 %v8048_v27  ;;  %5404 = vmatprep.subr.bf16.mxu1 %v8053_v0  ;;  %v141_v27 = vcombine.high %v8670_v17, %v8670_v17  ;;  %v187_v0 = vpack.c.bf16 %v8656_v8, %v8656_v8  ;;  %v8151_v8 = vld [vmem:[#allocation4 + $0xa24] ss:$8 sps:$4 sm:$0xff]  }
 0x291   :  { %5896 = vmatprep.subr.bf16.mxu0 %v8056_v1  ;;  %v211_v1 = vpack.c.bf16 %v8658_v9, %v8658_v9  ;;  %v8154_v9 = vld [vmem:[#allocation4 + $0x1624] ss:$8 sps:$4 sm:$0xff]  }
 0x293   :  { %5405 = vmatpush1.bf16.msra.mxu1 %v8051_v28  ;;  %v8136_v28 = vld [vmem:[#allocation4 + $0xa00] ss:$8 sps:$4 sm:$0xff]  }
 0x294   :  { %5897 = vmatpush1.bf16.msra.mxu0 %v8054_v29  ;;  %5406 = vmatprep.subr.bf16.mxu1 %v8059_v30  ;;  %v8140_v29 = vld [vmem:[#allocation4 + $0x1600] ss:$8 sps:$4 sm:$0xff]   ;;  %v8145_v30 = vld [vmem:[#allocation4 + $0xa14] ss:$8 sps:$4 sm:$0xff]  }
 0x295   :  { %5898 = vmatprep.subr.bf16.mxu0 %v8062_v31  ;;  %v8148_v31 = vld [vmem:[#allocation4 + $0x1614] ss:$8 sps:$4 sm:$0xff]  }
 0x297   :  { %5407 = vmatpush1.bf16.msra.mxu1 %v8057_v34  ;;  %v190_v34 = vpack.c.bf16 %v129_v26, %v129_v26  ;;  %v8221_v26 = vld [vmem:[#allocation4 + $0xae0] ss:$8 sps:$4 sm:$0xff]  }
 0x298   :  { %5899 = vmatpush1.bf16.msra.mxu0 %v8060_v35  ;;  %5408 = vmatprep.subr.bf16.mxu1 %v8065_v36  ;;  %v214_v35 = vpack.c.bf16 %v141_v27, %v141_v27  ;;  %v8143_v36 = vld [vmem:[#allocation4 + $0xa10] ss:$8 sps:$4 sm:$0xff]   ;;  %v8224_v27 = vld [vmem:[#allocation4 + $0x16e0] ss:$8 sps:$4 sm:$0xff]  }
 0x299   :  { %5900 = vmatprep.subr.bf16.mxu0 %v8068_v37  ;;  %v8146_v37 = vld [vmem:[#allocation4 + $0x1610] ss:$8 sps:$4 sm:$0xff]  }
 0x29b   :  { %5409 = vmatpush1.bf16.msra.mxu1 %v8063_v38  ;;  %v8149_v38 = vld [vmem:[#allocation4 + $0xa20] ss:$8 sps:$4 sm:$0xff]  }
 0x29c   :  { %5901 = vmatpush1.bf16.msra.mxu0 %v8066_v39  ;;  %5410 = vmatprep.subr.bf16.mxu1 %v8071_v22  ;;  %v8152_v39 = vld [vmem:[#allocation4 + $0x1620] ss:$8 sps:$4 sm:$0xff]   ;;  %v8157_v22 = vld [vmem:[#allocation4 + $0xa34] ss:$8 sps:$4 sm:$0xff]  }
 0x29d   :  { %5902 = vmatprep.subr.bf16.mxu0 %v8074_v40  ;;  %v8160_v40 = vld [vmem:[#allocation4 + $0x1634] ss:$8 sps:$4 sm:$0xff]  }
 0x29f   :  { %5411 = vmatpush1.bf16.msra.mxu1 %v8069_v42  ;;  %v8155_v42 = vld [vmem:[#allocation4 + $0xa30] ss:$8 sps:$4 sm:$0xff]  }
 0x2a0   :  { %5903 = vmatpush1.bf16.msra.mxu0 %v8072_v43  ;;  %5412 = vmatprep.subr.bf16.mxu1 %v8077_v44  ;;  %v8158_v43 = vld [vmem:[#allocation4 + $0x1630] ss:$8 sps:$4 sm:$0xff]   ;;  %v8163_v44 = vld [vmem:[#allocation4 + $0xa44] ss:$8 sps:$4 sm:$0xff]  }
 0x2a1   :  { %5904 = vmatprep.subr.bf16.mxu0 %v8080_v45  ;;  %v8166_v45 = vld [vmem:[#allocation4 + $0x1644] ss:$8 sps:$4 sm:$0xff]  }
 0x2a3   :  { %5413 = vmatpush1.bf16.msra.mxu1 %v8075_v46  ;;  %v8161_v46 = vld [vmem:[#allocation4 + $0xa40] ss:$8 sps:$4 sm:$0xff]  }
 0x2a4   :  { %5905 = vmatpush1.bf16.msra.mxu0 %v8078_v47  ;;  %5414 = vmatprep.subr.bf16.mxu1 %v8083_v23  ;;  %v8164_v47 = vld [vmem:[#allocation4 + $0x1640] ss:$8 sps:$4 sm:$0xff]   ;;  %v8169_v23 = vld [vmem:[#allocation4 + $0xa54] ss:$8 sps:$4 sm:$0xff]  }
 0x2a5   :  { %5906 = vmatprep.subr.bf16.mxu0 %v8086_v25  ;;  %v8172_v25 = vld [vmem:[#allocation4 + $0x1654] ss:$8 sps:$4 sm:$0xff]  }
 0x2a7   :  { %5415 = vmatpush1.bf16.msra.mxu1 %v8081_v50  ;;  %v8167_v50 = vld [vmem:[#allocation4 + $0xa50] ss:$8 sps:$4 sm:$0xff]  }
 0x2a8   :  { %5907 = vmatpush1.bf16.msra.mxu0 %v8084_v51  ;;  %5416 = vmatprep.subr.bf16.mxu1 %v8089_v52  ;;  %v8170_v51 = vld [vmem:[#allocation4 + $0x1650] ss:$8 sps:$4 sm:$0xff]   ;;  %v8175_v52 = vld [vmem:[#allocation4 + $0xa64] ss:$8 sps:$4 sm:$0xff]  }
 0x2a9   :  { %5908 = vmatprep.subr.bf16.mxu0 %v8092_v53  ;;  %v8178_v53 = vld [vmem:[#allocation4 + $0x1664] ss:$8 sps:$4 sm:$0xff]  }
 0x2ab   :  { %5417 = vmatpush1.bf16.msra.mxu1 %v8087_v54  ;;  %v8173_v54 = vld [vmem:[#allocation4 + $0xa60] ss:$8 sps:$4 sm:$0xff]  }
 0x2ac   :  { %5909 = vmatpush1.bf16.msra.mxu0 %v8090_v55  ;;  %5418 = vmatprep.subr.bf16.mxu1 %v8095_v32  ;;  %v8176_v55 = vld [vmem:[#allocation4 + $0x1660] ss:$8 sps:$4 sm:$0xff]   ;;  %v8181_v32 = vld [vmem:[#allocation4 + $0xa74] ss:$8 sps:$4 sm:$0xff]  }
 0x2ad   :  { %5910 = vmatprep.subr.bf16.mxu0 %v8098_v33  ;;  %v8184_v33 = vld [vmem:[#allocation4 + $0x1674] ss:$8 sps:$4 sm:$0xff]  }
 0x2af   :  { %5419 = vmatpush1.bf16.msra.mxu1 %v8093_v58  ;;  %v8179_v58 = vld [vmem:[#allocation4 + $0xa70] ss:$8 sps:$4 sm:$0xff]  }
 0x2b0   :  { %5911 = vmatpush1.bf16.msra.mxu0 %v8096_v59  ;;  %5420 = vmatprep.subr.bf16.mxu1 %v8101_v60  ;;  %v8182_v59 = vld [vmem:[#allocation4 + $0x1670] ss:$8 sps:$4 sm:$0xff]   ;;  %v8187_v60 = vld [vmem:[#allocation4 + $0xa84] ss:$8 sps:$4 sm:$0xff]  }
 0x2b1   :  { %5912 = vmatprep.subr.bf16.mxu0 %v8104_v61  ;;  %v8190_v61 = vld [vmem:[#allocation4 + $0x1684] ss:$8 sps:$4 sm:$0xff]  }
 0x2b3   :  { %5421 = vmatpush1.bf16.msra.mxu1 %v8099_v62  ;;  %v8185_v62 = vld [vmem:[#allocation4 + $0xa80] ss:$8 sps:$4 sm:$0xff]  }
 0x2b4   :  { %5913 = vmatpush1.bf16.msra.mxu0 %v8102_v63  ;;  %5422 = vmatprep.subr.bf16.mxu1 %v8107_v24  ;;  %v8188_v63 = vld [vmem:[#allocation4 + $0x1680] ss:$8 sps:$4 sm:$0xff]   ;;  %v8193_v24 = vld [vmem:[#allocation4 + $0xa94] ss:$8 sps:$4 sm:$0xff]  }
 0x2b5   :  { %5914 = vmatprep.subr.bf16.mxu0 %v8110_v41  ;;  %v8196_v41 = vld [vmem:[#allocation4 + $0x1694] ss:$8 sps:$4 sm:$0xff]  }
 0x2b7   :  { %5423 = vmatpush1.bf16.msra.mxu1 %v8105_v2  ;;  %v8191_v2 = vld [vmem:[#allocation4 + $0xa90] ss:$8 sps:$4 sm:$0xff]  }
 0x2b8   :  { %5915 = vmatpush1.bf16.msra.mxu0 %v8108_v3  ;;  %5424 = vmatprep.subr.bf16.mxu1 %v8113_v4  ;;  %v8194_v3 = vld [vmem:[#allocation4 + $0x1690] ss:$8 sps:$4 sm:$0xff]   ;;  %v8199_v4 = vld [vmem:[#allocation4 + $0xaa4] ss:$8 sps:$4 sm:$0xff]  }
 0x2b9   :  { %5916 = vmatprep.subr.bf16.mxu0 %v8116_v5  ;;  %v8202_v5 = vld [vmem:[#allocation4 + $0x16a4] ss:$8 sps:$4 sm:$0xff]  }
 0x2bb   :  { %5425 = vmatpush1.bf16.msra.mxu1 %v8111_v6  ;;  %v8197_v6 = vld [vmem:[#allocation4 + $0xaa0] ss:$8 sps:$4 sm:$0xff]  }
 0x2bc   :  { %5917 = vmatpush1.bf16.msra.mxu0 %v8114_v7  ;;  %5426 = vmatprep.subr.bf16.mxu1 %v8119_v48  ;;  %v8200_v7 = vld [vmem:[#allocation4 + $0x16a0] ss:$8 sps:$4 sm:$0xff]   ;;  %v8205_v48 = vld [vmem:[#allocation4 + $0xab4] ss:$8 sps:$4 sm:$0xff]  }
 0x2bd   :  { %5918 = vmatprep.subr.bf16.mxu0 %v8122_v49  ;;  %v8208_v49 = vld [vmem:[#allocation4 + $0x16b4] ss:$8 sps:$4 sm:$0xff]  }
 0x2bf   :  { %5427 = vmatpush1.bf16.msra.mxu1 %v8117_v10  ;;  %v8203_v10 = vld [vmem:[#allocation4 + $0xab0] ss:$8 sps:$4 sm:$0xff]  }
 0x2c0   :  { %5919 = vmatpush1.bf16.msra.mxu0 %v8120_v11  ;;  %5428 = vmatprep.subr.bf16.mxu1 %v8125_v12  ;;  %v8206_v11 = vld [vmem:[#allocation4 + $0x16b0] ss:$8 sps:$4 sm:$0xff]   ;;  %v8211_v12 = vld [vmem:[#allocation4 + $0xac4] ss:$8 sps:$4 sm:$0xff]  }
 0x2c1   :  { %5920 = vmatprep.subr.bf16.mxu0 %v8128_v13  ;;  %v8214_v13 = vld [vmem:[#allocation4 + $0x16c4] ss:$8 sps:$4 sm:$0xff]  }
 0x2c3   :  { %5429 = vmatpush1.bf16.msra.mxu1 %v8123_v14  ;;  %v8209_v14 = vld [vmem:[#allocation4 + $0xac0] ss:$8 sps:$4 sm:$0xff]  }
 0x2c4   :  { %5921 = vmatpush1.bf16.msra.mxu0 %v8126_v15  ;;  %5430 = vmatprep.subr.bf16.mxu1 %v8131_v56  ;;  %v8212_v15 = vld [vmem:[#allocation4 + $0x16c0] ss:$8 sps:$4 sm:$0xff]   ;;  %v8217_v56 = vld [vmem:[#allocation4 + $0xad4] ss:$8 sps:$4 sm:$0xff]  }
 0x2c5   :  { %5922 = vmatprep.subr.bf16.mxu0 %v8134_v57  ;;  %v8220_v57 = vld [vmem:[#allocation4 + $0x16d4] ss:$8 sps:$4 sm:$0xff]  }
 0x2c7   :  { %5431 = vmatpush1.bf16.msra.mxu1 %v8129_v18  ;;  %v8215_v18 = vld [vmem:[#allocation4 + $0xad0] ss:$8 sps:$4 sm:$0xff]  }
 0x2c8   :  { %5923 = vmatpush1.bf16.msra.mxu0 %v8132_v19  ;;  %5441 = vmatprep.subr.bf16.mxu1 %v8138_v20  ;;  %v8218_v19 = vld [vmem:[#allocation4 + $0x16d0] ss:$8 sps:$4 sm:$0xff]   ;;  %v8223_v20 = vld [vmem:[#allocation4 + $0xae4] ss:$8 sps:$4 sm:$0xff]  }
 0x2c9   :  { %5933 = vmatprep.subr.bf16.mxu0 %v8142_v21  ;;  %v8226_v21 = vld [vmem:[#allocation4 + $0x16e4] ss:$8 sps:$4 sm:$0xff]  }
 0x2ca   :  { %5433 = vmatmul.mubr.bf16.vlgmr.msra.gmra.mrb[0].mxu1 %v187_v0  ;;  %v8229_v0 = vld [vmem:[#allocation4 + $0xaf4] ss:$8 sps:$4 sm:$0xff]  }
 0x2cb   :  { %5925 = vmatmul.mubr.bf16.vlgmr.msra.gmra.mrb[0].mxu0 %v211_v1  ;;  %5442 = vmatpush1.bf16.msra.mxu1 %v8136_v28  ;;  %v8232_v1 = vld [vmem:[#allocation4 + $0x16f4] ss:$8 sps:$4 sm:$0xff]  }
 0x2cc   :  { %5934 = vmatpush1.bf16.msra.mxu0 %v8140_v29  ;;  %5443 = vmatprep.subr.bf16.mxu1 %v8145_v30  ;;  %v8680_v28 = vld [vmem:[#allocation2 + $0x58] sm:$0xff] }
 0x2cd   :  { %5935 = vmatprep.subr.bf16.mxu0 %v8148_v31  ;;  %5473 = vmatprep.mubr.bf16.mxu1 %v190_v34  ;;  %v8682_v29 = vld [vmem:[#allocation2 + $0xb8] sm:$0xff]  ;;  %v8236_v34 = vld [vmem:[#allocation4 + $0xb04] ss:$8 sps:$4 sm:$0xff]  }
 0x2ce   :  { %5965 = vmatprep.mubr.bf16.mxu0 %v214_v35  ;;  %v8227_v30 = vld [vmem:[#allocation4 + $0xaf0] ss:$8 sps:$4 sm:$0xff]   ;;  %v8240_v35 = vld [vmem:[#allocation4 + $0x1704] ss:$8 sps:$4 sm:$0xff]  }
 0x2cf   :  { %5444 = vmatpush1.bf16.msra.mxu1 %v8143_v36  ;;  %v8230_v31 = vld [vmem:[#allocation4 + $0x16f0] ss:$8 sps:$4 sm:$0xff]   ;;  %v130_v36 = vcombine.high %v8680_v28, %v8680_v28 }
 0x2d0   :  { %5936 = vmatpush1.bf16.msra.mxu0 %v8146_v37  ;;  %5445 = vmatprep.subr.bf16.mxu1 %v8151_v8  ;;  %v142_v37 = vcombine.high %v8682_v29, %v8682_v29  ;;  %v189_v8 = vpack.c.bf16 %v8668_v16, %v8668_v16  ;;  %v8249_v16 = vld [vmem:[#allocation4 + $0xb24] ss:$8 sps:$4 sm:$0xff]  }
 0x2d1   :  { %5937 = vmatprep.subr.bf16.mxu0 %v8154_v9  ;;  %v213_v9 = vpack.c.bf16 %v8670_v17, %v8670_v17  ;;  %v8252_v17 = vld [vmem:[#allocation4 + $0x1724] ss:$8 sps:$4 sm:$0xff]  }
 0x2d3   :  { %5446 = vmatpush1.bf16.msra.mxu1 %v8149_v38  ;;  %v8234_v38 = vld [vmem:[#allocation4 + $0xb00] ss:$8 sps:$4 sm:$0xff]  }
 0x2d4   :  { %5938 = vmatpush1.bf16.msra.mxu0 %v8152_v39  ;;  %5447 = vmatprep.subr.bf16.mxu1 %v8157_v22  ;;  %v8238_v39 = vld [vmem:[#allocation4 + $0x1700] ss:$8 sps:$4 sm:$0xff]   ;;  %v8243_v22 = vld [vmem:[#allocation4 + $0xb14] ss:$8 sps:$4 sm:$0xff]  }
 0x2d5   :  { %5939 = vmatprep.subr.bf16.mxu0 %v8160_v40  ;;  %v8246_v40 = vld [vmem:[#allocation4 + $0x1714] ss:$8 sps:$4 sm:$0xff]  }
 0x2d7   :  { %5448 = vmatpush1.bf16.msra.mxu1 %v8155_v42  ;;  %v192_v42 = vpack.c.bf16 %v130_v36, %v130_v36  ;;  %v8319_v36 = vld [vmem:[#allocation4 + $0xbe0] ss:$8 sps:$4 sm:$0xff]  }
 0x2d8   :  { %5940 = vmatpush1.bf16.msra.mxu0 %v8158_v43  ;;  %5449 = vmatprep.subr.bf16.mxu1 %v8163_v44  ;;  %v216_v43 = vpack.c.bf16 %v142_v37, %v142_v37  ;;  %v8241_v44 = vld [vmem:[#allocation4 + $0xb10] ss:$8 sps:$4 sm:$0xff]   ;;  %v8322_v37 = vld [vmem:[#allocation4 + $0x17e0] ss:$8 sps:$4 sm:$0xff]  }
 0x2d9   :  { %5941 = vmatprep.subr.bf16.mxu0 %v8166_v45  ;;  %v8244_v45 = vld [vmem:[#allocation4 + $0x1710] ss:$8 sps:$4 sm:$0xff]  }
 0x2db   :  { %5450 = vmatpush1.bf16.msra.mxu1 %v8161_v46  ;;  %v8247_v46 = vld [vmem:[#allocation4 + $0xb20] ss:$8 sps:$4 sm:$0xff]  }
 0x2dc   :  { %5942 = vmatpush1.bf16.msra.mxu0 %v8164_v47  ;;  %5451 = vmatprep.subr.bf16.mxu1 %v8169_v23  ;;  %v8250_v47 = vld [vmem:[#allocation4 + $0x1720] ss:$8 sps:$4 sm:$0xff]   ;;  %v8255_v23 = vld [vmem:[#allocation4 + $0xb34] ss:$8 sps:$4 sm:$0xff]  }
 0x2dd   :  { %5943 = vmatprep.subr.bf16.mxu0 %v8172_v25  ;;  %v8258_v25 = vld [vmem:[#allocation4 + $0x1734] ss:$8 sps:$4 sm:$0xff]  }
 0x2df   :  { %5452 = vmatpush1.bf16.msra.mxu1 %v8167_v50  ;;  %v8253_v50 = vld [vmem:[#allocation4 + $0xb30] ss:$8 sps:$4 sm:$0xff]  }
 0x2e0   :  { %5944 = vmatpush1.bf16.msra.mxu0 %v8170_v51  ;;  %5453 = vmatprep.subr.bf16.mxu1 %v8175_v52  ;;  %v8256_v51 = vld [vmem:[#allocation4 + $0x1730] ss:$8 sps:$4 sm:$0xff]   ;;  %v8261_v52 = vld [vmem:[#allocation4 + $0xb44] ss:$8 sps:$4 sm:$0xff]  }
 0x2e1   :  { %5945 = vmatprep.subr.bf16.mxu0 %v8178_v53  ;;  %v8264_v53 = vld [vmem:[#allocation4 + $0x1744] ss:$8 sps:$4 sm:$0xff]  }
 0x2e3   :  { %5454 = vmatpush1.bf16.msra.mxu1 %v8173_v54  ;;  %v8259_v54 = vld [vmem:[#allocation4 + $0xb40] ss:$8 sps:$4 sm:$0xff]  }
 0x2e4   :  { %5946 = vmatpush1.bf16.msra.mxu0 %v8176_v55  ;;  %5455 = vmatprep.subr.bf16.mxu1 %v8181_v32  ;;  %v8262_v55 = vld [vmem:[#allocation4 + $0x1740] ss:$8 sps:$4 sm:$0xff]   ;;  %v8267_v32 = vld [vmem:[#allocation4 + $0xb54] ss:$8 sps:$4 sm:$0xff]  }
 0x2e5   :  { %5947 = vmatprep.subr.bf16.mxu0 %v8184_v33  ;;  %v8270_v33 = vld [vmem:[#allocation4 + $0x1754] ss:$8 sps:$4 sm:$0xff]  }
 0x2e7   :  { %5456 = vmatpush1.bf16.msra.mxu1 %v8179_v58  ;;  %v8265_v58 = vld [vmem:[#allocation4 + $0xb50] ss:$8 sps:$4 sm:$0xff]  }
 0x2e8   :  { %5948 = vmatpush1.bf16.msra.mxu0 %v8182_v59  ;;  %5457 = vmatprep.subr.bf16.mxu1 %v8187_v60  ;;  %v8268_v59 = vld [vmem:[#allocation4 + $0x1750] ss:$8 sps:$4 sm:$0xff]   ;;  %v8273_v60 = vld [vmem:[#allocation4 + $0xb64] ss:$8 sps:$4 sm:$0xff]  }
 0x2e9   :  { %5949 = vmatprep.subr.bf16.mxu0 %v8190_v61  ;;  %v8276_v61 = vld [vmem:[#allocation4 + $0x1764] ss:$8 sps:$4 sm:$0xff]  }
 0x2eb   :  { %5458 = vmatpush1.bf16.msra.mxu1 %v8185_v62  ;;  %v8271_v62 = vld [vmem:[#allocation4 + $0xb60] ss:$8 sps:$4 sm:$0xff]  }
 0x2ec   :  { %5950 = vmatpush1.bf16.msra.mxu0 %v8188_v63  ;;  %5459 = vmatprep.subr.bf16.mxu1 %v8193_v24  ;;  %v8274_v63 = vld [vmem:[#allocation4 + $0x1760] ss:$8 sps:$4 sm:$0xff]   ;;  %v8279_v24 = vld [vmem:[#allocation4 + $0xb74] ss:$8 sps:$4 sm:$0xff]  }
 0x2ed   :  { %5951 = vmatprep.subr.bf16.mxu0 %v8196_v41  ;;  %v8282_v41 = vld [vmem:[#allocation4 + $0x1774] ss:$8 sps:$4 sm:$0xff]  }
 0x2ef   :  { %5460 = vmatpush1.bf16.msra.mxu1 %v8191_v2  ;;  %v8277_v2 = vld [vmem:[#allocation4 + $0xb70] ss:$8 sps:$4 sm:$0xff]  }
 0x2f0   :  { %5952 = vmatpush1.bf16.msra.mxu0 %v8194_v3  ;;  %5461 = vmatprep.subr.bf16.mxu1 %v8199_v4  ;;  %v8280_v3 = vld [vmem:[#allocation4 + $0x1770] ss:$8 sps:$4 sm:$0xff]   ;;  %v8285_v4 = vld [vmem:[#allocation4 + $0xb84] ss:$8 sps:$4 sm:$0xff]  }
 0x2f1   :  { %5953 = vmatprep.subr.bf16.mxu0 %v8202_v5  ;;  %v8288_v5 = vld [vmem:[#allocation4 + $0x1784] ss:$8 sps:$4 sm:$0xff]  }
 0x2f3   :  { %5462 = vmatpush1.bf16.msra.mxu1 %v8197_v6  ;;  %v8283_v6 = vld [vmem:[#allocation4 + $0xb80] ss:$8 sps:$4 sm:$0xff]  }
 0x2f4   :  { %5954 = vmatpush1.bf16.msra.mxu0 %v8200_v7  ;;  %5463 = vmatprep.subr.bf16.mxu1 %v8205_v48  ;;  %v8286_v7 = vld [vmem:[#allocation4 + $0x1780] ss:$8 sps:$4 sm:$0xff]   ;;  %v8291_v48 = vld [vmem:[#allocation4 + $0xb94] ss:$8 sps:$4 sm:$0xff]  }
 0x2f5   :  { %5955 = vmatprep.subr.bf16.mxu0 %v8208_v49  ;;  %v8294_v49 = vld [vmem:[#allocation4 + $0x1794] ss:$8 sps:$4 sm:$0xff]  }
 0x2f7   :  { %5464 = vmatpush1.bf16.msra.mxu1 %v8203_v10  ;;  %v8289_v10 = vld [vmem:[#allocation4 + $0xb90] ss:$8 sps:$4 sm:$0xff]  }
 0x2f8   :  { %5956 = vmatpush1.bf16.msra.mxu0 %v8206_v11  ;;  %5465 = vmatprep.subr.bf16.mxu1 %v8211_v12  ;;  %v8292_v11 = vld [vmem:[#allocation4 + $0x1790] ss:$8 sps:$4 sm:$0xff]   ;;  %v8297_v12 = vld [vmem:[#allocation4 + $0xba4] ss:$8 sps:$4 sm:$0xff]  }
 0x2f9   :  { %5957 = vmatprep.subr.bf16.mxu0 %v8214_v13  ;;  %v8300_v13 = vld [vmem:[#allocation4 + $0x17a4] ss:$8 sps:$4 sm:$0xff]  }
 0x2fb   :  { %5466 = vmatpush1.bf16.msra.mxu1 %v8209_v14  ;;  %v8295_v14 = vld [vmem:[#allocation4 + $0xba0] ss:$8 sps:$4 sm:$0xff]  }
 0x2fc   :  { %5958 = vmatpush1.bf16.msra.mxu0 %v8212_v15  ;;  %5467 = vmatprep.subr.bf16.mxu1 %v8217_v56  ;;  %v8298_v15 = vld [vmem:[#allocation4 + $0x17a0] ss:$8 sps:$4 sm:$0xff]   ;;  %v8303_v56 = vld [vmem:[#allocation4 + $0xbb4] ss:$8 sps:$4 sm:$0xff]  }
 0x2fd   :  { %5959 = vmatprep.subr.bf16.mxu0 %v8220_v57  ;;  %v8306_v57 = vld [vmem:[#allocation4 + $0x17b4] ss:$8 sps:$4 sm:$0xff]  }
 0x2ff   :  { %5468 = vmatpush1.bf16.msra.mxu1 %v8215_v18  ;;  %v8301_v18 = vld [vmem:[#allocation4 + $0xbb0] ss:$8 sps:$4 sm:$0xff]  }
 0x300   :  { %5960 = vmatpush1.bf16.msra.mxu0 %v8218_v19  ;;  %5469 = vmatprep.subr.bf16.mxu1 %v8223_v20  ;;  %v8304_v19 = vld [vmem:[#allocation4 + $0x17b0] ss:$8 sps:$4 sm:$0xff]   ;;  %v8309_v20 = vld [vmem:[#allocation4 + $0xbc4] ss:$8 sps:$4 sm:$0xff]  }
 0x301   :  { %5961 = vmatprep.subr.bf16.mxu0 %v8226_v21  ;;  %v8312_v21 = vld [vmem:[#allocation4 + $0x17c4] ss:$8 sps:$4 sm:$0xff]  }
 0x303   :  { %5470 = vmatpush1.bf16.msra.mxu1 %v8221_v26  ;;  %v8307_v26 = vld [vmem:[#allocation4 + $0xbc0] ss:$8 sps:$4 sm:$0xff]  }
 0x304   :  { %5962 = vmatpush1.bf16.msra.mxu0 %v8224_v27  ;;  %5471 = vmatprep.subr.bf16.mxu1 %v8229_v0  ;;  %v8310_v27 = vld [vmem:[#allocation4 + $0x17c0] ss:$8 sps:$4 sm:$0xff]   ;;  %v8315_v0 = vld [vmem:[#allocation4 + $0xbd4] ss:$8 sps:$4 sm:$0xff]  }
 0x305   :  { %5963 = vmatprep.subr.bf16.mxu0 %v8232_v1  ;;  %v8318_v1 = vld [vmem:[#allocation4 + $0x17d4] ss:$8 sps:$4 sm:$0xff]  }
 0x307   :  { %5472 = vmatpush1.bf16.msra.mxu1 %v8227_v30  ;;  %v8313_v30 = vld [vmem:[#allocation4 + $0xbd0] ss:$8 sps:$4 sm:$0xff]  }
 0x308   :  { %5964 = vmatpush1.bf16.msra.mxu0 %v8230_v31  ;;  %5482 = vmatprep.subr.bf16.mxu1 %v8236_v34  ;;  %v8316_v31 = vld [vmem:[#allocation4 + $0x17d0] ss:$8 sps:$4 sm:$0xff]   ;;  %v8321_v34 = vld [vmem:[#allocation4 + $0xbe4] ss:$8 sps:$4 sm:$0xff]  }
 0x309   :  { %5974 = vmatprep.subr.bf16.mxu0 %v8240_v35  ;;  %v8324_v35 = vld [vmem:[#allocation4 + $0x17e4] ss:$8 sps:$4 sm:$0xff]  }
 0x30a   :  { %5474 = vmatmul.mubr.bf16.vlgmr.msra.gmra.mrb[0].mxu1 %v189_v8  ;;  %v8327_v8 = vld [vmem:[#allocation4 + $0xbf4] ss:$8 sps:$4 sm:$0xff]  }
 0x30b   :  { %5966 = vmatmul.mubr.bf16.vlgmr.msra.gmra.mrb[0].mxu0 %v213_v9  ;;  %5483 = vmatpush1.bf16.msra.mxu1 %v8234_v38  ;;  %v8330_v9 = vld [vmem:[#allocation4 + $0x17f4] ss:$8 sps:$4 sm:$0xff]  }
 0x30c   :  { %5975 = vmatpush1.bf16.msra.mxu0 %v8238_v39  ;;  %5484 = vmatprep.subr.bf16.mxu1 %v8243_v22  ;;  %v8692_v38 = vld [vmem:[#allocation2 + $0xc0] sm:$0xff] }
 0x30d   :  { %5976 = vmatprep.subr.bf16.mxu0 %v8246_v40  ;;  %5514 = vmatprep.mubr.bf16.mxu1 %v192_v42  ;;  %v8325_v39 = vld [vmem:[#allocation4 + $0xbf0] ss:$8 sps:$4 sm:$0xff]   ;;  %v143_v40 = vcombine.high %v8692_v38, %v8692_v38  ;;  %v8335_v42 = vld [vmem:[#allocation4 + $0x1804] ss:$8 sps:$4 sm:$0xff]  }
 0x30e   :  { %6006 = vmatprep.mubr.bf16.mxu0 %v216_v43  ;;  %v8328_v22 = vld [vmem:[#allocation4 + $0x17f0] ss:$8 sps:$4 sm:$0xff]   ;;  %v191_v43 = vpack.c.bf16 %v8680_v28, %v8680_v28  ;;  %v8344_v28 = vld [vmem:[#allocation4 + $0x1834] ss:$8 sps:$4 sm:$0xff]  }
 0x30f   :  { %5485 = vmatpush1.bf16.msra.mxu1 %v8241_v44  ;;  %v215_v44 = vpack.c.bf16 %v8682_v29, %v8682_v29  ;;  %v8347_v29 = vld [vmem:[#allocation4 + $0x1844] ss:$8 sps:$4 sm:$0xff]  }
 0x310   :  { %5977 = vmatpush1.bf16.msra.mxu0 %v8244_v45  ;;  %5486 = vmatprep.subr.bf16.mxu1 %v8249_v16  ;;  %v8333_v45 = vld [vmem:[#allocation4 + $0x1800] ss:$8 sps:$4 sm:$0xff]   ;;  %v218_v16 = vpack.c.bf16 %v143_v40, %v143_v40  ;;  %v6066_v40 = vld [vmem:[%s8804_s3 + $0x40] sm:$0xff] }
 0x311   :  { %5978 = vmatprep.subr.bf16.mxu0 %v8252_v17  ;;  %v8338_v17 = vld [vmem:[#allocation4 + $0x1814] ss:$8 sps:$4 sm:$0xff]  }
 0x313   :  { %5487 = vmatpush1.bf16.msra.mxu1 %v8247_v46  ;;  %v8336_v46 = vld [vmem:[#allocation4 + $0x1810] ss:$8 sps:$4 sm:$0xff]  }
 0x314   :  { %5979 = vmatpush1.bf16.msra.mxu0 %v8250_v47  ;;  %5488 = vmatprep.subr.bf16.mxu1 %v8255_v23  ;;  %v8341_v47 = vld [vmem:[#allocation4 + $0x1824] ss:$8 sps:$4 sm:$0xff]   ;;  %v8339_v23 = vld [vmem:[#allocation4 + $0x1820] ss:$8 sps:$4 sm:$0xff]  }
 0x315   :  { %5980 = vmatprep.subr.bf16.mxu0 %v8258_v25  ;;  %v8342_v25 = vld [vmem:[#allocation4 + $0x1830] ss:$8 sps:$4 sm:$0xff]  }
 0x317   :  { %5489 = vmatpush1.bf16.msra.mxu1 %v8253_v50  ;;  %v8345_v50 = vld [vmem:[#allocation4 + $0x1840] ss:$8 sps:$4 sm:$0xff]  }
 0x318   :  { %5981 = vmatpush1.bf16.msra.mxu0 %v8256_v51  ;;  %5490 = vmatprep.subr.bf16.mxu1 %v8261_v52  ;;  %v8350_v51 = vld [vmem:[#allocation4 + $0x1854] ss:$8 sps:$4 sm:$0xff]   ;;  %v8348_v52 = vld [vmem:[#allocation4 + $0x1850] ss:$8 sps:$4 sm:$0xff]  }
 0x319   :  { %5982 = vmatprep.subr.bf16.mxu0 %v8264_v53  ;;  %v8353_v53 = vld [vmem:[#allocation4 + $0x1864] ss:$8 sps:$4 sm:$0xff]  }
 0x31b   :  { %5491 = vmatpush1.bf16.msra.mxu1 %v8259_v54  ;;  %v8351_v54 = vld [vmem:[#allocation4 + $0x1860] ss:$8 sps:$4 sm:$0xff]  }
 0x31c   :  { %5983 = vmatpush1.bf16.msra.mxu0 %v8262_v55  ;;  %5492 = vmatprep.subr.bf16.mxu1 %v8267_v32  ;;  %v8356_v55 = vld [vmem:[#allocation4 + $0x1874] ss:$8 sps:$4 sm:$0xff]   ;;  %v8354_v32 = vld [vmem:[#allocation4 + $0x1870] ss:$8 sps:$4 sm:$0xff]  }
 0x31d   :  { %5984 = vmatprep.subr.bf16.mxu0 %v8270_v33  ;;  %v8359_v33 = vld [vmem:[#allocation4 + $0x1884] ss:$8 sps:$4 sm:$0xff]  }
 0x31f   :  { %5493 = vmatpush1.bf16.msra.mxu1 %v8265_v58  ;;  %v8357_v58 = vld [vmem:[#allocation4 + $0x1880] ss:$8 sps:$4 sm:$0xff]  }
 0x320   :  { %5985 = vmatpush1.bf16.msra.mxu0 %v8268_v59  ;;  %5494 = vmatprep.subr.bf16.mxu1 %v8273_v60  ;;  %v8362_v59 = vld [vmem:[#allocation4 + $0x1894] ss:$8 sps:$4 sm:$0xff]   ;;  %v8360_v60 = vld [vmem:[#allocation4 + $0x1890] ss:$8 sps:$4 sm:$0xff]  }
 0x321   :  { %5986 = vmatprep.subr.bf16.mxu0 %v8276_v61  ;;  %v8365_v61 = vld [vmem:[#allocation4 + $0x18a4] ss:$8 sps:$4 sm:$0xff]  }
 0x323   :  { %5495 = vmatpush1.bf16.msra.mxu1 %v8271_v62  ;;  %v8363_v62 = vld [vmem:[#allocation4 + $0x18a0] ss:$8 sps:$4 sm:$0xff]  }
 0x324   :  { %5987 = vmatpush1.bf16.msra.mxu0 %v8274_v63  ;;  %5496 = vmatprep.subr.bf16.mxu1 %v8279_v24  ;;  %v8368_v63 = vld [vmem:[#allocation4 + $0x18b4] ss:$8 sps:$4 sm:$0xff]   ;;  %v8366_v24 = vld [vmem:[#allocation4 + $0x18b0] ss:$8 sps:$4 sm:$0xff]  }
 0x325   :  { %5988 = vmatprep.subr.bf16.mxu0 %v8282_v41  ;;  %v8371_v41 = vld [vmem:[#allocation4 + $0x18c4] ss:$8 sps:$4 sm:$0xff]  }
 0x327   :  { %5497 = vmatpush1.bf16.msra.mxu1 %v8277_v2  ;;  %v8369_v2 = vld [vmem:[#allocation4 + $0x18c0] ss:$8 sps:$4 sm:$0xff]  }
 0x328   :  { %5989 = vmatpush1.bf16.msra.mxu0 %v8280_v3  ;;  %5498 = vmatprep.subr.bf16.mxu1 %v8285_v4  ;;  %v8374_v3 = vld [vmem:[#allocation4 + $0x18d4] ss:$8 sps:$4 sm:$0xff]   ;;  %v8372_v4 = vld [vmem:[#allocation4 + $0x18d0] ss:$8 sps:$4 sm:$0xff]  }
 0x329   :  { %5990 = vmatprep.subr.bf16.mxu0 %v8288_v5  ;;  %v8377_v5 = vld [vmem:[#allocation4 + $0x18e4] ss:$8 sps:$4 sm:$0xff]  }
 0x32b   :  { %5499 = vmatpush1.bf16.msra.mxu1 %v8283_v6  ;;  %v8375_v6 = vld [vmem:[#allocation4 + $0x18e0] ss:$8 sps:$4 sm:$0xff]  }
 0x32c   :  { %5991 = vmatpush1.bf16.msra.mxu0 %v8286_v7  ;;  %5500 = vmatprep.subr.bf16.mxu1 %v8291_v48  ;;  %v8380_v7 = vld [vmem:[#allocation4 + $0x18f4] ss:$8 sps:$4 sm:$0xff]   ;;  %v8378_v48 = vld [vmem:[#allocation4 + $0x18f0] ss:$8 sps:$4 sm:$0xff]  }
 0x32d   :  { %5992 = vmatprep.subr.bf16.mxu0 %v8294_v49  ;;  %v217_v49 = vpack.c.bf16 %v8692_v38, %v8692_v38  ;;  %v6083_v38 = vld [vmem:[%s8804_s3 + $0xc8] sm:$0xff] }
 0x32f   :  { %5501 = vmatpush1.bf16.msra.mxu1 %v8289_v10  ;;  %v6074_v10 = vld [vmem:[%s8804_s3 + $0x80] sm:$0xff] }
 0x330   :  { %5993 = vmatpush1.bf16.msra.mxu0 %v8292_v11  ;;  %5502 = vmatprep.subr.bf16.mxu1 %v8297_v12  ;;  %v6075_v11 = vld [vmem:[%s8804_s3 + $0x88] sm:$0xff]  ;;  %v6058_v12 = vld [vmem:[%s8804_s3] sm:$0xff] }
 0x331   :  { %5994 = vmatprep.subr.bf16.mxu0 %v8300_v13  ;;  %v7023_v13 = vpack.c.bf16 %v6075_v11, %v6074_v10 }
 0x333   :  { %5503 = vmatpush1.bf16.msra.mxu1 %v8295_v14  ;;  %v6059_v14 = vld [vmem:[%s8804_s3 + $0x8] sm:$0xff] }
 0x334   :  { %5995 = vmatpush1.bf16.msra.mxu0 %v8298_v15  ;;  %5504 = vmatprep.subr.bf16.mxu1 %v8303_v56  ;;  %v6076_v15 = vld [vmem:[%s8804_s3 + $0x90] sm:$0xff]  ;;  %v6077_v56 = vld [vmem:[%s8804_s3 + $0x98] sm:$0xff] }
 0x335   :  { %5996 = vmatprep.subr.bf16.mxu0 %v8306_v57  ;;  %v7025_v57 = vpack.c.bf16 %v6059_v14, %v6058_v12 }
 0x337   :  { %5505 = vmatpush1.bf16.msra.mxu1 %v8301_v18  ;;  %v7027_v18 = vpack.c.bf16 %v6077_v56, %v6076_v15 }
 0x338   :  { %5997 = vmatpush1.bf16.msra.mxu0 %v8304_v19  ;;  %5506 = vmatprep.subr.bf16.mxu1 %v8309_v20  ;;  %v6060_v19 = vld [vmem:[%s8804_s3 + $0x10] sm:$0xff]  ;;  %v6061_v20 = vld [vmem:[%s8804_s3 + $0x18] sm:$0xff] }
 0x339   :  { %5998 = vmatprep.subr.bf16.mxu0 %v8312_v21  ;;  %v6078_v21 = vld [vmem:[%s8804_s3 + $0xa0] sm:$0xff] }
 0x33b   :  { %5507 = vmatpush1.bf16.msra.mxu1 %v8307_v26  ;;  %v6079_v26 = vld [vmem:[%s8804_s3 + $0xa8] sm:$0xff] }
 0x33c   :  { %5999 = vmatpush1.bf16.msra.mxu0 %v8310_v27  ;;  %5508 = vmatprep.subr.bf16.mxu1 %v8315_v0  ;;  %v7029_v27 = vpack.c.bf16 %v6061_v20, %v6060_v19  ;;  %v7031_v0 = vpack.c.bf16 %v6079_v26, %v6078_v21 }
 0x33d   :  { %6000 = vmatprep.subr.bf16.mxu0 %v8318_v1  ;;  %v6062_v1 = vld [vmem:[%s8804_s3 + $0x20] sm:$0xff] }
 0x33f   :  { %5509 = vmatpush1.bf16.msra.mxu1 %v8313_v30  ;;  %v6063_v30 = vld [vmem:[%s8804_s3 + $0x28] sm:$0xff] }
 0x340   :  { %6001 = vmatpush1.bf16.msra.mxu0 %v8316_v31  ;;  %5510 = vmatprep.subr.bf16.mxu1 %v8321_v34  ;;  %v6080_v31 = vld [vmem:[%s8804_s3 + $0xb0] sm:$0xff]  ;;  %v6081_v34 = vld [vmem:[%s8804_s3 + $0xb8] sm:$0xff] }
 0x341   :  { %6002 = vmatprep.subr.bf16.mxu0 %v8324_v35  ;;  %v7033_v35 = vpack.c.bf16 %v6063_v30, %v6062_v1 }
 0x343   :  { %5511 = vmatpush1.bf16.msra.mxu1 %v8319_v36  ;;  %v7035_v36 = vpack.c.bf16 %v6081_v34, %v6080_v31 }
 0x344   :  { %6003 = vmatpush1.bf16.msra.mxu0 %v8322_v37  ;;  %5512 = vmatprep.subr.bf16.mxu1 %v8327_v8  ;;  %v6064_v37 = vld [vmem:[%s8804_s3 + $0x30] sm:$0xff]  ;;  %v6065_v8 = vld [vmem:[%s8804_s3 + $0x38] sm:$0xff] }
 0x345   :  { %6004 = vmatprep.subr.bf16.mxu0 %v8330_v9  ;;  %v6082_v9 = vld [vmem:[%s8804_s3 + $0xc0] sm:$0xff] }
 0x347   :  { %5513 = vmatpush1.bf16.msra.mxu1 %v8325_v39  ;;  %v7037_v39 = vpack.c.bf16 %v6065_v8, %v6064_v37 }
 0x348   :  { %6005 = vmatpush1.bf16.msra.mxu0 %v8328_v22  ;;  %7024 = vmatprep.subr.bf16.mxu1 %v7023_v13  ;;  %v7039_v22 = vpack.c.bf16 %v6083_v38, %v6082_v9 }
 0x349   :  { %6015 = vmatprep.subr.bf16.mxu0 %v8335_v42  ;;  %v6067_v42 = vld [vmem:[%s8804_s3 + $0x48] sm:$0xff] }
 0x34a   :  { %5515 = vmatmul.mubr.bf16.vlgmr.msra.gmra.mrb[0].mxu1 %v191_v43  ;;  %v6084_v43 = vld [vmem:[%s8804_s3 + $0xd0] sm:$0xff] }
 0x34b   :  { %6007 = vmatmul.mubr.bf16.vlgmr.msra.gmra.mrb[0].mxu0 %v215_v44  ;;  %7026 = vmatpush3.bf16.msra.mxu1 %v7025_v57  ;;  %v6085_v44 = vld [vmem:[%s8804_s3 + $0xd8] sm:$0xff]  ;;  %v6987_v57 = vld [vmem:[#allocation7] ss:$0 sm:$0xff] }
 0x34c   :  { %6016 = vmatpush1.bf16.msra.mxu0 %v8333_v45  ;;  %6047 = vmatprep.mubr.bf16.mxu0 %v218_v16  ;;  %v7041_v45 = vpack.c.bf16 %v6067_v42, %v6066_v40  ;;  %v7043_v16 = vpack.c.bf16 %v6085_v44, %v6084_v43 }
 0x34d   :  { %6017 = vmatprep.subr.bf16.mxu0 %v8338_v17  ;;  %7028 = vmatprep.subr.bf16.mxu1 %v7027_v18  ;;  %v6068_v17 = vld [vmem:[%s8804_s3 + $0x50] sm:$0xff] }
 0x34f   :  { %7030 = vmatpush3.bf16.msra.mxu1 %v7029_v27 }
 0x350   :  { %6018 = vmatpush1.bf16.msra.mxu0 %v8336_v46  ;;  %7032 = vmatprep.subr.bf16.mxu1 %v7031_v0  ;;  %v6069_v46 = vld [vmem:[%s8804_s3 + $0x58] sm:$0xff] }
 0x351   :  { %6019 = vmatprep.subr.bf16.mxu0 %v8341_v47  ;;  %v6086_v47 = vld [vmem:[%s8804_s3 + $0xe0] sm:$0xff] }
 0x353   :  { %7034 = vmatpush3.bf16.msra.mxu1 %v7033_v35 }
 0x354   :  { %6020 = vmatpush1.bf16.msra.mxu0 %v8339_v23  ;;  %7036 = vmatprep.subr.bf16.mxu1 %v7035_v36  ;;  %v6087_v23 = vld [vmem:[%s8804_s3 + $0xe8] sm:$0xff] }
 0x355   :  { %6021 = vmatprep.subr.bf16.mxu0 %v8344_v28  ;;  %v7045_v28 = vpack.c.bf16 %v6069_v46, %v6068_v17 }
 0x357   :  { %7038 = vmatpush3.bf16.msra.mxu1 %v7037_v39 }
 0x358   :  { %6022 = vmatpush1.bf16.msra.mxu0 %v8342_v25  ;;  %7040 = vmatprep.subr.bf16.mxu1 %v7039_v22  ;;  %v7047_v25 = vpack.c.bf16 %v6087_v23, %v6086_v47 }
 0x359   :  { %6023 = vmatprep.subr.bf16.mxu0 %v8347_v29  ;;  %v6070_v29 = vld [vmem:[%s8804_s3 + $0x60] sm:$0xff] }
 0x35b   :  { %7042 = vmatpush3.bf16.msra.mxu1 %v7041_v45 }
 0x35c   :  { %6024 = vmatpush1.bf16.msra.mxu0 %v8345_v50  ;;  %7044 = vmatprep.subr.bf16.mxu1 %v7043_v16  ;;  %v6071_v50 = vld [vmem:[%s8804_s3 + $0x68] sm:$0xff] }
 0x35d   :  { %6025 = vmatprep.subr.bf16.mxu0 %v8350_v51  ;;  %v7049_v51 = vpack.c.bf16 %v6071_v50, %v6070_v29 }
 0x35f   :  { %7046 = vmatpush3.bf16.msra.mxu1 %v7045_v28 }
 0x360   :  { %6026 = vmatpush1.bf16.msra.mxu0 %v8348_v52  ;;  %7048 = vmatprep.subr.bf16.mxu1 %v7047_v25  ;;  %v6088_v52 = vld [vmem:[%s8804_s3 + $0xf0] sm:$0xff] }
 0x361   :  { %6027 = vmatprep.subr.bf16.mxu0 %v8353_v53  ;;  %v6089_v53 = vld [vmem:[%s8804_s3 + $0xf8] sm:$0xff] }
 0x363   :  { %7050 = vmatpush3.bf16.msra.mxu1 %v7049_v51 }
 0x364   :  { %6028 = vmatpush1.bf16.msra.mxu0 %v8351_v54  ;;  %v7051_v54 = vpack.c.bf16 %v6089_v53, %v6088_v52 }
 0x365   :  { %6029 = vmatprep.subr.bf16.mxu0 %v8356_v55  ;;  %v6072_v55 = vld [vmem:[%s8804_s3 + $0x70] sm:$0xff] }
 0x366   :  { %7052 = vmatprep.subr.bf16.mxu1 %v7051_v54 }
 0x368   :  { %6030 = vmatpush1.bf16.msra.mxu0 %v8354_v32  ;;  %v6073_v32 = vld [vmem:[%s8804_s3 + $0x78] sm:$0xff] }
 0x369   :  { %6031 = vmatprep.subr.bf16.mxu0 %v8359_v33  ;;  %v7053_v33 = vpack.c.bf16 %v6073_v32, %v6072_v55 }
 0x36b   :  { %7054 = vmatpush3.bf16.msra.mxu1 %v7053_v33 }
 0x36c   :  { %6032 = vmatpush1.bf16.msra.mxu0 %v8357_v58 }
 0x36d   :  { %6033 = vmatprep.subr.bf16.mxu0 %v8362_v59 }
 0x370   :  { %6034 = vmatpush1.bf16.msra.mxu0 %v8360_v60 }
 0x371   :  { %6035 = vmatprep.subr.bf16.mxu0 %v8365_v61 }
 0x374   :  { %6036 = vmatpush1.bf16.msra.mxu0 %v8363_v62  ;;  %v1021_v62 = vlaneseq }
 0x375   :  { %6037 = vmatprep.subr.bf16.mxu0 %v8368_v63 }
 0x376   :  { %v1022_v63 = vshrl.u32 %v1021_v62, 7 }
 0x378   :  { %6038 = vmatpush1.bf16.msra.mxu0 %v8366_v24  ;;  %v1023_v24 = vsub.s32 0, %v1022_v63 }
 0x379   :  { %6039 = vmatprep.subr.bf16.mxu0 %v8371_v41  ;;  %v1019_v41 = vld [vmem:[#allocation6] sm:$0x3] }
 0x37c   :  { %6040 = vmatpush1.bf16.msra.mxu0 %v8369_v2  ;;  %v1027_v2 = vsub.s32 1, %v1022_v63 }
 0x37d   :  { %6041 = vmatprep.subr.bf16.mxu0 %v8374_v3  ;;  %v1024_v3 = vrot.slane %v1019_v41, %v1023_v24 }
 0x380   :  { %6042 = vmatpush1.bf16.msra.mxu0 %v8372_v4  ;;  %v1028_v4 = vrot.slane %v1019_v41, %v1027_v2 }
 0x381   :  { %6043 = vmatprep.subr.bf16.mxu0 %v8377_v5 }
 0x384   :  { %6044 = vmatpush1.bf16.msra.mxu0 %v8375_v6 }
 0x385   :  { %6045 = vmatprep.subr.bf16.mxu0 %v8380_v7 }
 0x388   :  { %6046 = vmatpush1.bf16.msra.mxu0 %v8378_v48 }
 0x38b   :  { %6048 = vmatmul.mubr.bf16.vlgmr.msra.gmra.mrb[0].mxu0 %v217_v49 }
 0x41d   :  { %v5516_v58 = vpop.f32.mrb[0].mxu1 }
 0x41e   :  { %v5518_v59 = vpop.f32.mrb[1].mxu1  ;;  %v7055_v5 = vadd.f32 %v5516_v58, %v1024_v3 }
 0x41f   :  { %v5520_v60 = vpop.f32.mrb[2].mxu1  ;;  %v7057_v6 = vadd.f32 %v5518_v59, %v1028_v4 }
 0x420   :  { %v5521_v61 = vpop.f32.mrb[3].mxu1 }
 0x45e   :  { %v6049_v7 = vpop.f32.mrb[0].mxu0 }
 0x45f   :  { %v7056_v48 = vadd.f32 %v7055_v5, %v6049_v7  ;;  %v6051_v49 = vpop.f32.mrb[1].mxu0 }
 0x460   :  { %v7058_v10 = vadd.f32 %v7057_v6, %v6051_v49  ;;  %v6053_v11 = vpop.f32.mrb[2].mxu0 }
 0x461   :  { %v6054_v12 = vpop.f32.mrb[3].mxu0  ;;  %v6056_v14 = vmax.f32 %v7056_v48, 0.0 }
 0x462   :  { %v6057_v13 = vmax.f32 %v7058_v10, 0.0 }
 0x464   :  { %6161 = vmatprep.mubr.f32.mxu1 %v6057_v13 }
 0x465   :  { %6162 = vmatmul.mubr.f32.vlgmr.msra.gmra.mrb[4].mxu1 %v6056_v14 }
 0x538   :  { %v7020_v15 = vpop.f32.mrb[4].mxu1 }
 0x539   :  { %v7021_v56 = vpop.f32.mrb[5].mxu1 }
 0x53a   :  { %v7022_v18 = vadd.f32 %v7021_v56, %v7020_v15 }
 0x53c   :  { %v6164_v19 = vadd.f32 %v7022_v18, %v6987_v57 }
 0x53e   :  { %v6168_v20 = vsel %vm6167_vm0, %v6164_v19, -inf }
 0x53f   :  { %6169 = vmax.xlane.f32.xlu0 %v6168_v20 }
 0x5cc   :  { %v6170_v21 = vpop.xlane.xlu0 %6169 }
 0x5cd   :  { %v6171_v26 = vsub.f32 %v6164_v19, %v6170_v21 }
 0x5cf   :  { %v6172_v27 = vmul.f32 1.442695, %v6171_v26 }
 0x5d1   :  { %8382 = vpow2.f32 %v6172_v27 }
 0x5db   :  { %v8383_v0 = vpop.eup %8382 }
 0x5dc   :  { %v6174_v1 = vsel %vm6167_vm0, %v8383_v0, 0.0 }
 0x5dd   :  { %6175 = vadd.xlane.f32.xlu0 %v6174_v1 }
 0x66a   :  { %v6176_v30 = vpop.xlane.xlu0 %6175 }
 0x66b   :  { %8384 = vrcp.f32 %v6176_v30 }
 0x675   :  { %v8385_v31 = vpop.eup %8384 }
 0x676   :  { %v6178_v34 = vmul.f32 %v8385_v31, %v8383_v0 }
 0x678   :  { %6179 = vst.msk [vmem:[%s8806_s5] sm:$0xf] %vm6167_vm0, %v6178_v34 }
 0x679   :  { %6184 = vsyncpa [#allocation3], 1 }
 0x67a   :  { %6185 = vsyncpa [#allocation5], 1 }
 0x67b   :  { %6186 = vsyncpa [#allocation8], 1 }

</bundles_post_ra>
